<compile_context>
chip_gen: v5e
topology: v5e:2x2
jax: 0.10.0
libtpu: 0.0.40
codegen_flags: <defaults>
</compile_context>

<pallas_src>
import functools
import math

import numpy as np

import jax
import jax.numpy as jnp
from jax import lax
from jax.experimental import pallas as pl
from jax.experimental.pallas import tpu as pltpu

_INV_SQRT2 = 1.0 / math.sqrt(2.0)


# --------------------------------------------------------------------------
# Static layout of the three resolutions inside one halo-padded scratch slab.
# --------------------------------------------------------------------------
def _round_up8(v):
    return ((v + 7) // 8) * 8


def _halo_layout(H, W, n):
    """Place the 3 token segments with >= (Wr+1) zero rows around each.

    Returns (layout, slab_rows) with layout entries
    (Hr, Wr, token_offset, token_count, scratch_start).  The zero halo means
    every shifted 3x3-tap read stays inside the slab and reads zeros when the
    spatial row is out of range.
    """
    segs = ((2 * H, 2 * W, 0, 16 * n),
            (H, W, 16 * n, 4 * n),
            (H // 2, W // 2, 20 * n, n))
    layout = []
    pos = 0
    prev_halo = 0
    for Hr, Wr, off, cnt in segs:
        halo = Wr + 1
        start = _round_up8(pos + max(halo, prev_halo))
        layout.append((Hr, Wr, off, cnt, start))
        pos = start + cnt
        prev_halo = halo
    total = _round_up8(pos + prev_halo)
    return tuple(layout), total


def _gap_rows(layout, total):
    """Rows of the slab never written by a segment copy (must stay zero)."""
    gaps = []
    pos = 0
    for _, _, _, cnt, start in layout:
        if start > pos:
            gaps.append((pos, start - pos))
        pos = start + cnt
    if total > pos:
        gaps.append((pos, total - pos))
    return tuple(gaps)


def _edge_masks(H, W, n):
    """(N, 2) float32: col 0 = token has a left neighbour, col 1 = right."""
    chunks = []
    for Hr, Wr in ((2 * H, 2 * W), (H, W), (H // 2, W // 2)):
        col = np.tile(np.arange(Wr), Hr)
        chunks.append(np.stack([col > 0, col < Wr - 1], axis=1))
    return np.concatenate(chunks, axis=0).astype(np.float32)


# --------------------------------------------------------------------------
# Fused kernel: fc1 -> depthwise 3x3 (zero halo in-kernel) -> GELU -> fc2
# One grid step == `block_b` batch elements.
# --------------------------------------------------------------------------
def _conv_ffn_kernel(layout, gaps, slab_rows, block_b, n_tokens,
                     mask_ref, x_ref, w1_ref, b1_ref, wdw_ref, bdw_ref,
                     w2_ref, b2_ref, o_ref, h_ref, g_ref):
    chid = w1_ref.shape[1]

    # ----- fc1: one MXU call for the whole (block_b * N) token slab ---------
    h = (jnp.dot(x_ref[...], w1_ref[...], preferred_element_type=jnp.float32)
         + b1_ref[...])

    # ----- scatter into zero-halo scratch (one slab per batch element) ------
    for bi in range(block_b):
        base = bi * slab_rows
        # Re-zero only the halo/gap rows; segment rows are overwritten below.
        for gstart, glen in gaps:
            h_ref[base + gstart:base + gstart + glen, :] = jnp.zeros(
                (glen, chid), h_ref.dtype)
        for _, _, off, cnt, start in layout:
            src = bi * n_tokens + off
            h_ref[base + start:base + start + cnt, :] = (
                h[src:src + cnt, :].astype(h_ref.dtype))

    # ----- depthwise 3x3 conv + exact GELU, per resolution ------------------
    for bi in range(block_b):
        base = bi * slab_rows
        for _, w_r, off, cnt, start in layout:
            s0 = base + start
            left = center = right = None
            for ky in range(3):
                row = s0 + (ky - 1) * w_r
                tl = (h_ref[row - 1:row - 1 + cnt, :]
                      * wdw_ref[3 * ky + 0:3 * ky + 1, :])
                tc = (h_ref[row:row + cnt, :]
                      * wdw_ref[3 * ky + 1:3 * ky + 2, :])
                tr = (h_ref[row + 1:row + 1 + cnt, :]
                      * wdw_ref[3 * ky + 2:3 * ky + 3, :])
                left = tl if left is None else left + tl
                center = tc if center is None else center + tc
                right = tr if right is None else right + tr
            # Edge-column validity, applied ONCE per resolution (not per tap).
            m_l = mask_ref[off:off + cnt, 0:1]
            m_r = mask_ref[off:off + cnt, 1:2]
            acc = center + left * m_l + right * m_r + bdw_ref[...]
            # exact (erf) GELU, matching nn.GELU() default
            g = 0.5 * acc * (1.0 + lax.erf(acc * _INV_SQRT2))
            dst = bi * n_tokens + off
            g_ref[dst:dst + cnt, :] = g.astype(g_ref.dtype)

    # ----- fc2: ONE MXU matmul + ONE contiguous output store ----------------
    out = (jnp.dot(g_ref[...], w2_ref[...], preferred_element_type=jnp.float32)
           + b2_ref[...])
    o_ref[...] = out.astype(o_ref.dtype)


# --------------------------------------------------------------------------
# Wrapper
# --------------------------------------------------------------------------
def conv_ffn_forward(x, H, W, params, *, block_b=1,
                     mxu_dtype=jnp.bfloat16, conv_dtype=jnp.float32):
    """x: (B, N, C_in) with N == 21 * (H*W // 4); H, W even."""
    B, N, Cin = x.shape
    assert N % 21 == 0 and H % 2 == 0 and W % 2 == 0
    n = N // 21
    assert 4 * n == H * W
    assert B % block_b == 0
    assert (block_b * N) % 8 == 0 or block_b == B
    Chid = params["w1"].shape[1]
    Cout = params["w2"].shape[1]

    layout, slab_rows = _halo_layout(H, W, n)
    gaps = _gap_rows(layout, slab_rows)
    masks = jnp.asarray(_edge_masks(H, W, n))

    kernel = functools.partial(_conv_ffn_kernel, layout, gaps, slab_rows,
                               block_b, N)

    grid_spec = pltpu.PrefetchScalarGridSpec(
        num_scalar_prefetch=0,
        grid=(B // block_b,),
        in_specs=[
            pl.BlockSpec((N, 2), lambda b: (0, 0)),              # edge masks
            pl.BlockSpec((block_b * N, Cin), lambda b: (b, 0)),  # x (flat)
            pl.BlockSpec((Cin, Chid), lambda b: (0, 0)),         # w1 (resident)
            pl.BlockSpec((1, Chid), lambda b: (0, 0)),           # b1
            pl.BlockSpec((9, Chid), lambda b: (0, 0)),           # dw weight
            pl.BlockSpec((1, Chid), lambda b: (0, 0)),           # dw bias
            pl.BlockSpec((Chid, Cout), lambda b: (0, 0)),        # w2
            pl.BlockSpec((1, Cout), lambda b: (0, 0)),           # b2
        ],
        out_specs=pl.BlockSpec((block_b * N, Cout), lambda b: (b, 0)),
        scratch_shapes=[
            pltpu.VMEM((block_b * slab_rows, Chid), conv_dtype),  # halo slab
            pltpu.VMEM((block_b * N, Chid), mxu_dtype),           # GELU buffer
        ],
    )

    out_flat = pl.pallas_call(
        kernel,
        out_shape=jax.ShapeDtypeStruct((B * N, Cout), jnp.float32),
        grid_spec=grid_spec,
        compiler_params=pltpu.CompilerParams(
            dimension_semantics=("parallel",)),
    )(
        masks,
        x.reshape(B * N, Cin).astype(mxu_dtype),
        params["w1"].astype(mxu_dtype),
        params["b1"].reshape(1, Chid).astype(jnp.float32),
        params["wdw"].astype(jnp.float32),
        params["bdw"].reshape(1, Chid).astype(jnp.float32),
        params["w2"].astype(mxu_dtype),
        params["b2"].reshape(1, Cout).astype(jnp.float32),
    )
    return out_flat.reshape(B, N, Cout)


# --------------------------------------------------------------------------
# Pure-JAX reference (depthwise HWIO kernel is (3, 3, 1, C))
# --------------------------------------------------------------------------
def conv_ffn_reference(x, H, W, params):
    B, N, Cin = x.shape
    n = N // 21
    Chid = params["w1"].shape[1]
    h = x @ params["w1"] + params["b1"]

    wdw = params["wdw"].reshape(3, 3, 1, Chid)   # HWIO, depth multiplier 1

    def dw(xm):  # xm: (B, Hr, Wr, C) NHWC
        out = lax.conv_general_dilated(
            xm, wdw, window_strides=(1, 1), padding="SAME",
            dimension_numbers=("NHWC", "HWIO", "NHWC"),
            feature_group_count=Chid)
        return out + params["bdw"]

    y1 = dw(h[:, :16 * n, :].reshape(B, 2 * H, 2 * W, Chid)).reshape(B, 16 * n, Chid)
    y2 = dw(h[:, 16 * n:20 * n, :].reshape(B, H, W, Chid)).reshape(B, 4 * n, Chid)
    y3 = dw(h[:, 20 * n:, :].reshape(B, H // 2, W // 2, Chid)).reshape(B, n, Chid)
    y = jnp.concatenate([y1, y2, y3], axis=1)
    y = jax.nn.gelu(y, approximate=False)        # nn.GELU exact (erf)
    # nn.Dropout(p=0.0) is the identity in eval/forward semantics.
    return y @ params["w2"] + params["b2"]


if __name__ == "__main__":
    B, H, W = 2, 8, 8
    in_features, hidden_features, out_features = 32, 64, 32
    n = (H * W) // 4
    N = 21 * n  # 336 tokens: 16n + 4n + n

    key = jax.random.PRNGKey(0)
    ks = jax.random.split(key, 7)
    params = {
        "w1": 0.2 * jax.random.normal(ks[0], (in_features, hidden_features), jnp.float32),
        "b1": 0.05 * jax.random.normal(ks[1], (hidden_features,), jnp.float32),
        # depthwise Conv2d weight (C,1,3,3) stored as (9, C) = (ky*3+kx, C)
        "wdw": 0.2 * jax.random.normal(ks[2], (9, hidden_features), jnp.float32),
        "bdw": 0.05 * jax.random.normal(ks[3], (hidden_features,), jnp.float32),
        "w2": 0.2 * jax.random.normal(ks[4], (hidden_features, out_features), jnp.float32),
        "b2": 0.05 * jax.random.normal(ks[5], (out_features,), jnp.float32),
    }
    x = jax.random.normal(ks[6], (B, N, in_features), jnp.float32)

    ref = jax.block_until_ready(conv_ffn_reference(x, H, W, params))

    def check(out, tag):
        assert out.shape == (B, N, out_features), (tag, out.shape)
        err = jnp.abs(out - ref)
        # Element-wise tolerance (bf16 MXU operands, f32 accumulation).
        ok = bool(jnp.all(err <= 0.08 + 0.04 * jnp.abs(ref)))
        assert ok, (tag, float(jnp.max(err)))

    # Default config: f32 conv scratch, one batch element per grid step.
    out1 = jax.block_until_ready(conv_ffn_forward(x, H, W, params))
    check(out1, "block_b=1/f32-scratch")

    # v6e/v7x-flavoured config: bf16 activation scratch, 2 batch elems / step.
    out2 = jax.block_until_ready(
        conv_ffn_forward(x, H, W, params, block_b=2, conv_dtype=jnp.bfloat16))
    check(out2, "block_b=2/bf16-scratch")

    print("KERNEL_OK")
</pallas_src>

<mosaic_0001>
module attributes {stable_mosaic.version = 11 : i64} {
  func.func @_conv_ffn_kernel(%arg0: i32, %arg1: memref<336x2xf32, #tpu.memory_space<vmem>>, %arg2: memref<336x32xbf16, #tpu.memory_space<vmem>>, %arg3: memref<32x64xbf16, #tpu.memory_space<vmem>>, %arg4: memref<1x64xf32, #tpu.memory_space<vmem>>, %arg5: memref<9x64xf32, #tpu.memory_space<vmem>>, %arg6: memref<1x64xf32, #tpu.memory_space<vmem>>, %arg7: memref<64x32xbf16, #tpu.memory_space<vmem>>, %arg8: memref<1x32xf32, #tpu.memory_space<vmem>>, %arg9: memref<336x32xf32, #tpu.memory_space<vmem>>, %arg10: memref<408x64xf32, #tpu.memory_space<vmem>>, %arg11: memref<336x64xbf16, #tpu.memory_space<vmem>>) attributes {dimension_semantics = [#tpu.dimension_semantics<parallel>], iteration_bounds = array<i64: 2>, scalar_prefetch = 0 : i64, scratch_operands = 2 : i64, tpu.core_type = #tpu.core_type<tc>, window_params = [{pipeline_mode = #tpu.pipeline_mode<synchronous>, transform_indices = @transform_0, window_bounds = array<i64: 336, 2>}, {transform_indices = @transform_1, window_bounds = array<i64: 336, 32>}, {pipeline_mode = #tpu.pipeline_mode<synchronous>, transform_indices = @transform_2, window_bounds = array<i64: 32, 64>}, {pipeline_mode = #tpu.pipeline_mode<synchronous>, transform_indices = @transform_3, window_bounds = array<i64: 1, 64>}, {pipeline_mode = #tpu.pipeline_mode<synchronous>, transform_indices = @transform_4, window_bounds = array<i64: 9, 64>}, {pipeline_mode = #tpu.pipeline_mode<synchronous>, transform_indices = @transform_5, window_bounds = array<i64: 1, 64>}, {pipeline_mode = #tpu.pipeline_mode<synchronous>, transform_indices = @transform_6, window_bounds = array<i64: 64, 32>}, {pipeline_mode = #tpu.pipeline_mode<synchronous>, transform_indices = @transform_7, window_bounds = array<i64: 1, 32>}, {transform_indices = @transform_8, window_bounds = array<i64: 336, 32>}]} {
    %c0 = arith.constant 0 : index
    %c0_0 = arith.constant 0 : index
    %0 = vector.load %arg2[%c0, %c0_0] : memref<336x32xbf16, #tpu.memory_space<vmem>>, vector<336x32xbf16>
    %c0_1 = arith.constant 0 : index
    %c0_2 = arith.constant 0 : index
    %1 = vector.load %arg3[%c0_1, %c0_2] : memref<32x64xbf16, #tpu.memory_space<vmem>>, vector<32x64xbf16>
    %cst = arith.constant dense<0.000000e+00> : vector<336x64xf32>
    %2 = tpu.matmul %0, %1, %cst {dimension_numbers = #tpu.dot_dimension_numbers<[1], [0], [0], [1], [0, 0, 1, 1], [], []>} : vector<336x32xbf16>, vector<32x64xbf16>, vector<336x64xf32> -> vector<336x64xf32>
    %c0_3 = arith.constant 0 : index
    %c0_4 = arith.constant 0 : index
    %3 = vector.load %arg4[%c0_3, %c0_4] : memref<1x64xf32, #tpu.memory_space<vmem>>, vector<1x64xf32>
    %4 = vector.broadcast %3 : vector<1x64xf32> to vector<336x64xf32>
    %5 = arith.addf %2, %4 : vector<336x64xf32>
    %cst_5 = arith.constant 0.000000e+00 : f32
    %6 = vector.broadcast %cst_5 : f32 to vector<24x64xf32>
    %c0_6 = arith.constant 0 : index
    %c0_7 = arith.constant 0 : index
    %7 = vector.load %arg10[%c0_6, %c0_7] : memref<408x64xf32, #tpu.memory_space<vmem>>, vector<24x64xf32>
    tpu.vector_store %arg10[%c0_6, %c0_7], %6 {strides = array<i32>} : memref<408x64xf32, #tpu.memory_space<vmem>>, vector<24x64xf32>,
    %cst_8 = arith.constant 0.000000e+00 : f32
    %8 = vector.broadcast %cst_8 : f32 to vector<24x64xf32>
    %c280 = arith.constant 280 : index
    %c0_9 = arith.constant 0 : index
    %9 = vector.load %arg10[%c280, %c0_9] : memref<408x64xf32, #tpu.memory_space<vmem>>, vector<24x64xf32>
    tpu.vector_store %arg10[%c280, %c0_9], %8 {strides = array<i32>} : memref<408x64xf32, #tpu.memory_space<vmem>>, vector<24x64xf32>,
    %cst_10 = arith.constant 0.000000e+00 : f32
    %10 = vector.broadcast %cst_10 : f32 to vector<16x64xf32>
    %c368 = arith.constant 368 : index
    %c0_11 = arith.constant 0 : index
    %11 = vector.load %arg10[%c368, %c0_11] : memref<408x64xf32, #tpu.memory_space<vmem>>, vector<16x64xf32>
    tpu.vector_store %arg10[%c368, %c0_11], %10 {strides = array<i32>} : memref<408x64xf32, #tpu.memory_space<vmem>>, vector<16x64xf32>,
    %cst_12 = arith.constant 0.000000e+00 : f32
    %12 = vector.broadcast %cst_12 : f32 to vector<8x64xf32>
    %c400 = arith.constant 400 : index
    %c0_13 = arith.constant 0 : index
    %13 = vector.load %arg10[%c400, %c0_13] : memref<408x64xf32, #tpu.memory_space<vmem>>, vector<8x64xf32>
    tpu.vector_store %arg10[%c400, %c0_13], %12 {strides = array<i32>} : memref<408x64xf32, #tpu.memory_space<vmem>>, vector<8x64xf32>,
    %14 = vector.extract_strided_slice %5 {offsets = [0, 0], sizes = [256, 64], strides = [1, 1]} : vector<336x64xf32> to vector<256x64xf32>
    %c24 = arith.constant 24 : index
    %c0_14 = arith.constant 0 : index
    %15 = vector.load %arg10[%c24, %c0_14] : memref<408x64xf32, #tpu.memory_space<vmem>>, vector<256x64xf32>
    tpu.vector_store %arg10[%c24, %c0_14], %14 {strides = array<i32>} : memref<408x64xf32, #tpu.memory_space<vmem>>, vector<256x64xf32>,
    %16 = vector.extract_strided_slice %5 {offsets = [256, 0], sizes = [64, 64], strides = [1, 1]} : vector<336x64xf32> to vector<64x64xf32>
    %c304 = arith.constant 304 : index
    %c0_15 = arith.constant 0 : index
    %17 = vector.load %arg10[%c304, %c0_15] : memref<408x64xf32, #tpu.memory_space<vmem>>, vector<64x64xf32>
    tpu.vector_store %arg10[%c304, %c0_15], %16 {strides = array<i32>} : memref<408x64xf32, #tpu.memory_space<vmem>>, vector<64x64xf32>,
    %18 = vector.extract_strided_slice %5 {offsets = [320, 0], sizes = [16, 64], strides = [1, 1]} : vector<336x64xf32> to vector<16x64xf32>
    %c384 = arith.constant 384 : index
    %c0_16 = arith.constant 0 : index
    %19 = vector.load %arg10[%c384, %c0_16] : memref<408x64xf32, #tpu.memory_space<vmem>>, vector<16x64xf32>
    tpu.vector_store %arg10[%c384, %c0_16], %18 {strides = array<i32>} : memref<408x64xf32, #tpu.memory_space<vmem>>, vector<16x64xf32>,
    %c7 = arith.constant 7 : index
    %c0_17 = arith.constant 0 : index
    %20 = vector.load %arg10[%c7, %c0_17] : memref<408x64xf32, #tpu.memory_space<vmem>>, vector<256x64xf32>
    %c0_18 = arith.constant 0 : index
    %c0_19 = arith.constant 0 : index
    %21 = vector.load %arg5[%c0_18, %c0_19] : memref<9x64xf32, #tpu.memory_space<vmem>>, vector<1x64xf32>
    %22 = vector.broadcast %21 : vector<1x64xf32> to vector<256x64xf32>
    %23 = arith.mulf %20, %22 : vector<256x64xf32>
    %c8 = arith.constant 8 : index
    %c0_20 = arith.constant 0 : index
    %24 = vector.load %arg10[%c8, %c0_20] : memref<408x64xf32, #tpu.memory_space<vmem>>, vector<256x64xf32>
    %c1 = arith.constant 1 : index
    %c0_21 = arith.constant 0 : index
    %25 = vector.load %arg5[%c1, %c0_21] : memref<9x64xf32, #tpu.memory_space<vmem>>, vector<1x64xf32>
    %26 = vector.broadcast %25 : vector<1x64xf32> to vector<256x64xf32>
    %27 = arith.mulf %24, %26 : vector<256x64xf32>
    %c9 = arith.constant 9 : index
    %c0_22 = arith.constant 0 : index
    %28 = vector.load %arg10[%c9, %c0_22] : memref<408x64xf32, #tpu.memory_space<vmem>>, vector<256x64xf32>
    %c2 = arith.constant 2 : index
    %c0_23 = arith.constant 0 : index
    %29 = vector.load %arg5[%c2, %c0_23] : memref<9x64xf32, #tpu.memory_space<vmem>>, vector<1x64xf32>
    %30 = vector.broadcast %29 : vector<1x64xf32> to vector<256x64xf32>
    %31 = arith.mulf %28, %30 : vector<256x64xf32>
    %c23 = arith.constant 23 : index
    %c0_24 = arith.constant 0 : index
    %32 = vector.load %arg10[%c23, %c0_24] : memref<408x64xf32, #tpu.memory_space<vmem>>, vector<256x64xf32>
    %c3 = arith.constant 3 : index
    %c0_25 = arith.constant 0 : index
    %33 = vector.load %arg5[%c3, %c0_25] : memref<9x64xf32, #tpu.memory_space<vmem>>, vector<1x64xf32>
    %34 = vector.broadcast %33 : vector<1x64xf32> to vector<256x64xf32>
    %35 = arith.mulf %32, %34 : vector<256x64xf32>
    %c24_26 = arith.constant 24 : index
    %c0_27 = arith.constant 0 : index
    %36 = vector.load %arg10[%c24_26, %c0_27] : memref<408x64xf32, #tpu.memory_space<vmem>>, vector<256x64xf32>
    %c4 = arith.constant 4 : index
    %c0_28 = arith.constant 0 : index
    %37 = vector.load %arg5[%c4, %c0_28] : memref<9x64xf32, #tpu.memory_space<vmem>>, vector<1x64xf32>
    %38 = vector.broadcast %37 : vector<1x64xf32> to vector<256x64xf32>
    %39 = arith.mulf %36, %38 : vector<256x64xf32>
    %c25 = arith.constant 25 : index
    %c0_29 = arith.constant 0 : index
    %40 = vector.load %arg10[%c25, %c0_29] : memref<408x64xf32, #tpu.memory_space<vmem>>, vector<256x64xf32>
    %c5 = arith.constant 5 : index
    %c0_30 = arith.constant 0 : index
    %41 = vector.load %arg5[%c5, %c0_30] : memref<9x64xf32, #tpu.memory_space<vmem>>, vector<1x64xf32>
    %42 = vector.broadcast %41 : vector<1x64xf32> to vector<256x64xf32>
    %43 = arith.mulf %40, %42 : vector<256x64xf32>
    %44 = arith.addf %23, %35 : vector<256x64xf32>
    %45 = arith.addf %27, %39 : vector<256x64xf32>
    %46 = arith.addf %31, %43 : vector<256x64xf32>
    %c39 = arith.constant 39 : index
    %c0_31 = arith.constant 0 : index
    %47 = vector.load %arg10[%c39, %c0_31] : memref<408x64xf32, #tpu.memory_space<vmem>>, vector<256x64xf32>
    %c6 = arith.constant 6 : index
    %c0_32 = arith.constant 0 : index
    %48 = vector.load %arg5[%c6, %c0_32] : memref<9x64xf32, #tpu.memory_space<vmem>>, vector<1x64xf32>
    %49 = vector.broadcast %48 : vector<1x64xf32> to vector<256x64xf32>
    %50 = arith.mulf %47, %49 : vector<256x64xf32>
    %c40 = arith.constant 40 : index
    %c0_33 = arith.constant 0 : index
    %51 = vector.load %arg10[%c40, %c0_33] : memref<408x64xf32, #tpu.memory_space<vmem>>, vector<256x64xf32>
    %c7_34 = arith.constant 7 : index
    %c0_35 = arith.constant 0 : index
    %52 = vector.load %arg5[%c7_34, %c0_35] : memref<9x64xf32, #tpu.memory_space<vmem>>, vector<1x64xf32>
    %53 = vector.broadcast %52 : vector<1x64xf32> to vector<256x64xf32>
    %54 = arith.mulf %51, %53 : vector<256x64xf32>
    %c41 = arith.constant 41 : index
    %c0_36 = arith.constant 0 : index
    %55 = vector.load %arg10[%c41, %c0_36] : memref<408x64xf32, #tpu.memory_space<vmem>>, vector<256x64xf32>
    %c8_37 = arith.constant 8 : index
    %c0_38 = arith.constant 0 : index
    %56 = vector.load %arg5[%c8_37, %c0_38] : memref<9x64xf32, #tpu.memory_space<vmem>>, vector<1x64xf32>
    %57 = vector.broadcast %56 : vector<1x64xf32> to vector<256x64xf32>
    %58 = arith.mulf %55, %57 : vector<256x64xf32>
    %59 = arith.addf %44, %50 : vector<256x64xf32>
    %60 = arith.addf %45, %54 : vector<256x64xf32>
    %61 = arith.addf %46, %58 : vector<256x64xf32>
    %c0_39 = arith.constant 0 : index
    %c0_40 = arith.constant 0 : index
    %62 = vector.load %arg1[%c0_39, %c0_40] : memref<336x2xf32, #tpu.memory_space<vmem>>, vector<256x1xf32>
    %c0_41 = arith.constant 0 : index
    %c1_42 = arith.constant 1 : index
    %63 = vector.load %arg1[%c0_41, %c1_42] : memref<336x2xf32, #tpu.memory_space<vmem>>, vector<256x1xf32>
    %64 = vector.broadcast %62 : vector<256x1xf32> to vector<256x64xf32>
    %65 = arith.mulf %59, %64 : vector<256x64xf32>
    %66 = arith.addf %60, %65 : vector<256x64xf32>
    %67 = vector.broadcast %63 : vector<256x1xf32> to vector<256x64xf32>
    %68 = arith.mulf %61, %67 : vector<256x64xf32>
    %69 = arith.addf %66, %68 : vector<256x64xf32>
    %c0_43 = arith.constant 0 : index
    %c0_44 = arith.constant 0 : index
    %70 = vector.load %arg6[%c0_43, %c0_44] : memref<1x64xf32, #tpu.memory_space<vmem>>, vector<1x64xf32>
    %71 = vector.broadcast %70 : vector<1x64xf32> to vector<256x64xf32>
    %72 = arith.addf %69, %71 : vector<256x64xf32>
    %cst_45 = arith.constant 5.000000e-01 : f32
    %73 = vector.broadcast %cst_45 : f32 to vector<256x64xf32>
    %74 = arith.mulf %73, %72 : vector<256x64xf32>
    %cst_46 = arith.constant 0.707106769 : f32
    %75 = vector.broadcast %cst_46 : f32 to vector<256x64xf32>
    %76 = arith.mulf %72, %75 : vector<256x64xf32>
    %77 = math.erf %76 : vector<256x64xf32>
    %cst_47 = arith.constant 1.000000e+00 : f32
    %78 = vector.broadcast %cst_47 : f32 to vector<256x64xf32>
    %79 = arith.addf %78, %77 : vector<256x64xf32>
    %80 = arith.mulf %74, %79 : vector<256x64xf32>
    %81 = arith.truncf %80 : vector<256x64xf32> to vector<256x64xbf16>
    %c0_48 = arith.constant 0 : index
    %c0_49 = arith.constant 0 : index
    %82 = vector.load %arg11[%c0_48, %c0_49] : memref<336x64xbf16, #tpu.memory_space<vmem>>, vector<256x64xbf16>
    tpu.vector_store %arg11[%c0_48, %c0_49], %81 {strides = array<i32>} : memref<336x64xbf16, #tpu.memory_space<vmem>>, vector<256x64xbf16>,
    %c295 = arith.constant 295 : index
    %c0_50 = arith.constant 0 : index
    %83 = vector.load %arg10[%c295, %c0_50] : memref<408x64xf32, #tpu.memory_space<vmem>>, vector<64x64xf32>
    %c0_51 = arith.constant 0 : index
    %c0_52 = arith.constant 0 : index
    %84 = vector.load %arg5[%c0_51, %c0_52] : memref<9x64xf32, #tpu.memory_space<vmem>>, vector<1x64xf32>
    %85 = vector.broadcast %84 : vector<1x64xf32> to vector<64x64xf32>
    %86 = arith.mulf %83, %85 : vector<64x64xf32>
    %c296 = arith.constant 296 : index
    %c0_53 = arith.constant 0 : index
    %87 = vector.load %arg10[%c296, %c0_53] : memref<408x64xf32, #tpu.memory_space<vmem>>, vector<64x64xf32>
    %c1_54 = arith.constant 1 : index
    %c0_55 = arith.constant 0 : index
    %88 = vector.load %arg5[%c1_54, %c0_55] : memref<9x64xf32, #tpu.memory_space<vmem>>, vector<1x64xf32>
    %89 = vector.broadcast %88 : vector<1x64xf32> to vector<64x64xf32>
    %90 = arith.mulf %87, %89 : vector<64x64xf32>
    %c297 = arith.constant 297 : index
    %c0_56 = arith.constant 0 : index
    %91 = vector.load %arg10[%c297, %c0_56] : memref<408x64xf32, #tpu.memory_space<vmem>>, vector<64x64xf32>
    %c2_57 = arith.constant 2 : index
    %c0_58 = arith.constant 0 : index
    %92 = vector.load %arg5[%c2_57, %c0_58] : memref<9x64xf32, #tpu.memory_space<vmem>>, vector<1x64xf32>
    %93 = vector.broadcast %92 : vector<1x64xf32> to vector<64x64xf32>
    %94 = arith.mulf %91, %93 : vector<64x64xf32>
    %c303 = arith.constant 303 : index
    %c0_59 = arith.constant 0 : index
    %95 = vector.load %arg10[%c303, %c0_59] : memref<408x64xf32, #tpu.memory_space<vmem>>, vector<64x64xf32>
    %c3_60 = arith.constant 3 : index
    %c0_61 = arith.constant 0 : index
    %96 = vector.load %arg5[%c3_60, %c0_61] : memref<9x64xf32, #tpu.memory_space<vmem>>, vector<1x64xf32>
    %97 = vector.broadcast %96 : vector<1x64xf32> to vector<64x64xf32>
    %98 = arith.mulf %95, %97 : vector<64x64xf32>
    %c304_62 = arith.constant 304 : index
    %c0_63 = arith.constant 0 : index
    %99 = vector.load %arg10[%c304_62, %c0_63] : memref<408x64xf32, #tpu.memory_space<vmem>>, vector<64x64xf32>
    %c4_64 = arith.constant 4 : index
    %c0_65 = arith.constant 0 : index
    %100 = vector.load %arg5[%c4_64, %c0_65] : memref<9x64xf32, #tpu.memory_space<vmem>>, vector<1x64xf32>
    %101 = vector.broadcast %100 : vector<1x64xf32> to vector<64x64xf32>
    %102 = arith.mulf %99, %101 : vector<64x64xf32>
    %c305 = arith.constant 305 : index
    %c0_66 = arith.constant 0 : index
    %103 = vector.load %arg10[%c305, %c0_66] : memref<408x64xf32, #tpu.memory_space<vmem>>, vector<64x64xf32>
    %c5_67 = arith.constant 5 : index
    %c0_68 = arith.constant 0 : index
    %104 = vector.load %arg5[%c5_67, %c0_68] : memref<9x64xf32, #tpu.memory_space<vmem>>, vector<1x64xf32>
    %105 = vector.broadcast %104 : vector<1x64xf32> to vector<64x64xf32>
    %106 = arith.mulf %103, %105 : vector<64x64xf32>
    %107 = arith.addf %86, %98 : vector<64x64xf32>
    %108 = arith.addf %90, %102 : vector<64x64xf32>
    %109 = arith.addf %94, %106 : vector<64x64xf32>
    %c311 = arith.constant 311 : index
    %c0_69 = arith.constant 0 : index
    %110 = vector.load %arg10[%c311, %c0_69] : memref<408x64xf32, #tpu.memory_space<vmem>>, vector<64x64xf32>
    %c6_70 = arith.constant 6 : index
    %c0_71 = arith.constant 0 : index
    %111 = vector.load %arg5[%c6_70, %c0_71] : memref<9x64xf32, #tpu.memory_space<vmem>>, vector<1x64xf32>
    %112 = vector.broadcast %111 : vector<1x64xf32> to vector<64x64xf32>
    %113 = arith.mulf %110, %112 : vector<64x64xf32>
    %c312 = arith.constant 312 : index
    %c0_72 = arith.constant 0 : index
    %114 = vector.load %arg10[%c312, %c0_72] : memref<408x64xf32, #tpu.memory_space<vmem>>, vector<64x64xf32>
    %c7_73 = arith.constant 7 : index
    %c0_74 = arith.constant 0 : index
    %115 = vector.load %arg5[%c7_73, %c0_74] : memref<9x64xf32, #tpu.memory_space<vmem>>, vector<1x64xf32>
    %116 = vector.broadcast %115 : vector<1x64xf32> to vector<64x64xf32>
    %117 = arith.mulf %114, %116 : vector<64x64xf32>
    %c313 = arith.constant 313 : index
    %c0_75 = arith.constant 0 : index
    %118 = vector.load %arg10[%c313, %c0_75] : memref<408x64xf32, #tpu.memory_space<vmem>>, vector<64x64xf32>
    %c8_76 = arith.constant 8 : index
    %c0_77 = arith.constant 0 : index
    %119 = vector.load %arg5[%c8_76, %c0_77] : memref<9x64xf32, #tpu.memory_space<vmem>>, vector<1x64xf32>
    %120 = vector.broadcast %119 : vector<1x64xf32> to vector<64x64xf32>
    %121 = arith.mulf %118, %120 : vector<64x64xf32>
    %122 = arith.addf %107, %113 : vector<64x64xf32>
    %123 = arith.addf %108, %117 : vector<64x64xf32>
    %124 = arith.addf %109, %121 : vector<64x64xf32>
    %c256 = arith.constant 256 : index
    %c0_78 = arith.constant 0 : index
    %125 = vector.load %arg1[%c256, %c0_78] : memref<336x2xf32, #tpu.memory_space<vmem>>, vector<64x1xf32>
    %c256_79 = arith.constant 256 : index
    %c1_80 = arith.constant 1 : index
    %126 = vector.load %arg1[%c256_79, %c1_80] : memref<336x2xf32, #tpu.memory_space<vmem>>, vector<64x1xf32>
    %127 = vector.broadcast %125 : vector<64x1xf32> to vector<64x64xf32>
    %128 = arith.mulf %122, %127 : vector<64x64xf32>
    %129 = arith.addf %123, %128 : vector<64x64xf32>
    %130 = vector.broadcast %126 : vector<64x1xf32> to vector<64x64xf32>
    %131 = arith.mulf %124, %130 : vector<64x64xf32>
    %132 = arith.addf %129, %131 : vector<64x64xf32>
    %c0_81 = arith.constant 0 : index
    %c0_82 = arith.constant 0 : index
    %133 = vector.load %arg6[%c0_81, %c0_82] : memref<1x64xf32, #tpu.memory_space<vmem>>, vector<1x64xf32>
    %134 = vector.broadcast %133 : vector<1x64xf32> to vector<64x64xf32>
    %135 = arith.addf %132, %134 : vector<64x64xf32>
    %cst_83 = arith.constant 5.000000e-01 : f32
    %136 = vector.broadcast %cst_83 : f32 to vector<64x64xf32>
    %137 = arith.mulf %136, %135 : vector<64x64xf32>
    %cst_84 = arith.constant 0.707106769 : f32
    %138 = vector.broadcast %cst_84 : f32 to vector<64x64xf32>
    %139 = arith.mulf %135, %138 : vector<64x64xf32>
    %140 = math.erf %139 : vector<64x64xf32>
    %cst_85 = arith.constant 1.000000e+00 : f32
    %141 = vector.broadcast %cst_85 : f32 to vector<64x64xf32>
    %142 = arith.addf %141, %140 : vector<64x64xf32>
    %143 = arith.mulf %137, %142 : vector<64x64xf32>
    %144 = arith.truncf %143 : vector<64x64xf32> to vector<64x64xbf16>
    %c256_86 = arith.constant 256 : index
    %c0_87 = arith.constant 0 : index
    %145 = vector.load %arg11[%c256_86, %c0_87] : memref<336x64xbf16, #tpu.memory_space<vmem>>, vector<64x64xbf16>
    tpu.vector_store %arg11[%c256_86, %c0_87], %144 {strides = array<i32>} : memref<336x64xbf16, #tpu.memory_space<vmem>>, vector<64x64xbf16>,
    %c379 = arith.constant 379 : index
    %c0_88 = arith.constant 0 : index
    %146 = vector.load %arg10[%c379, %c0_88] : memref<408x64xf32, #tpu.memory_space<vmem>>, vector<16x64xf32>
    %c0_89 = arith.constant 0 : index
    %c0_90 = arith.constant 0 : index
    %147 = vector.load %arg5[%c0_89, %c0_90] : memref<9x64xf32, #tpu.memory_space<vmem>>, vector<1x64xf32>
    %148 = vector.broadcast %147 : vector<1x64xf32> to vector<16x64xf32>
    %149 = arith.mulf %146, %148 : vector<16x64xf32>
    %c380 = arith.constant 380 : index
    %c0_91 = arith.constant 0 : index
    %150 = vector.load %arg10[%c380, %c0_91] : memref<408x64xf32, #tpu.memory_space<vmem>>, vector<16x64xf32>
    %c1_92 = arith.constant 1 : index
    %c0_93 = arith.constant 0 : index
    %151 = vector.load %arg5[%c1_92, %c0_93] : memref<9x64xf32, #tpu.memory_space<vmem>>, vector<1x64xf32>
    %152 = vector.broadcast %151 : vector<1x64xf32> to vector<16x64xf32>
    %153 = arith.mulf %150, %152 : vector<16x64xf32>
    %c381 = arith.constant 381 : index
    %c0_94 = arith.constant 0 : index
    %154 = vector.load %arg10[%c381, %c0_94] : memref<408x64xf32, #tpu.memory_space<vmem>>, vector<16x64xf32>
    %c2_95 = arith.constant 2 : index
    %c0_96 = arith.constant 0 : index
    %155 = vector.load %arg5[%c2_95, %c0_96] : memref<9x64xf32, #tpu.memory_space<vmem>>, vector<1x64xf32>
    %156 = vector.broadcast %155 : vector<1x64xf32> to vector<16x64xf32>
    %157 = arith.mulf %154, %156 : vector<16x64xf32>
    %c383 = arith.constant 383 : index
    %c0_97 = arith.constant 0 : index
    %158 = vector.load %arg10[%c383, %c0_97] : memref<408x64xf32, #tpu.memory_space<vmem>>, vector<16x64xf32>
    %c3_98 = arith.constant 3 : index
    %c0_99 = arith.constant 0 : index
    %159 = vector.load %arg5[%c3_98, %c0_99] : memref<9x64xf32, #tpu.memory_space<vmem>>, vector<1x64xf32>
    %160 = vector.broadcast %159 : vector<1x64xf32> to vector<16x64xf32>
    %161 = arith.mulf %158, %160 : vector<16x64xf32>
    %c384_100 = arith.constant 384 : index
    %c0_101 = arith.constant 0 : index
    %162 = vector.load %arg10[%c384_100, %c0_101] : memref<408x64xf32, #tpu.memory_space<vmem>>, vector<16x64xf32>
    %c4_102 = arith.constant 4 : index
    %c0_103 = arith.constant 0 : index
    %163 = vector.load %arg5[%c4_102, %c0_103] : memref<9x64xf32, #tpu.memory_space<vmem>>, vector<1x64xf32>
    %164 = vector.broadcast %163 : vector<1x64xf32> to vector<16x64xf32>
    %165 = arith.mulf %162, %164 : vector<16x64xf32>
    %c385 = arith.constant 385 : index
    %c0_104 = arith.constant 0 : index
    %166 = vector.load %arg10[%c385, %c0_104] : memref<408x64xf32, #tpu.memory_space<vmem>>, vector<16x64xf32>
    %c5_105 = arith.constant 5 : index
    %c0_106 = arith.constant 0 : index
    %167 = vector.load %arg5[%c5_105, %c0_106] : memref<9x64xf32, #tpu.memory_space<vmem>>, vector<1x64xf32>
    %168 = vector.broadcast %167 : vector<1x64xf32> to vector<16x64xf32>
    %169 = arith.mulf %166, %168 : vector<16x64xf32>
    %170 = arith.addf %149, %161 : vector<16x64xf32>
    %171 = arith.addf %153, %165 : vector<16x64xf32>
    %172 = arith.addf %157, %169 : vector<16x64xf32>
    %c387 = arith.constant 387 : index
    %c0_107 = arith.constant 0 : index
    %173 = vector.load %arg10[%c387, %c0_107] : memref<408x64xf32, #tpu.memory_space<vmem>>, vector<16x64xf32>
    %c6_108 = arith.constant 6 : index
    %c0_109 = arith.constant 0 : index
    %174 = vector.load %arg5[%c6_108, %c0_109] : memref<9x64xf32, #tpu.memory_space<vmem>>, vector<1x64xf32>
    %175 = vector.broadcast %174 : vector<1x64xf32> to vector<16x64xf32>
    %176 = arith.mulf %173, %175 : vector<16x64xf32>
    %c388 = arith.constant 388 : index
    %c0_110 = arith.constant 0 : index
    %177 = vector.load %arg10[%c388, %c0_110] : memref<408x64xf32, #tpu.memory_space<vmem>>, vector<16x64xf32>
    %c7_111 = arith.constant 7 : index
    %c0_112 = arith.constant 0 : index
    %178 = vector.load %arg5[%c7_111, %c0_112] : memref<9x64xf32, #tpu.memory_space<vmem>>, vector<1x64xf32>
    %179 = vector.broadcast %178 : vector<1x64xf32> to vector<16x64xf32>
    %180 = arith.mulf %177, %179 : vector<16x64xf32>
    %c389 = arith.constant 389 : index
    %c0_113 = arith.constant 0 : index
    %181 = vector.load %arg10[%c389, %c0_113] : memref<408x64xf32, #tpu.memory_space<vmem>>, vector<16x64xf32>
    %c8_114 = arith.constant 8 : index
    %c0_115 = arith.constant 0 : index
    %182 = vector.load %arg5[%c8_114, %c0_115] : memref<9x64xf32, #tpu.memory_space<vmem>>, vector<1x64xf32>
    %183 = vector.broadcast %182 : vector<1x64xf32> to vector<16x64xf32>
    %184 = arith.mulf %181, %183 : vector<16x64xf32>
    %185 = arith.addf %170, %176 : vector<16x64xf32>
    %186 = arith.addf %171, %180 : vector<16x64xf32>
    %187 = arith.addf %172, %184 : vector<16x64xf32>
    %c320 = arith.constant 320 : index
    %c0_116 = arith.constant 0 : index
    %188 = vector.load %arg1[%c320, %c0_116] : memref<336x2xf32, #tpu.memory_space<vmem>>, vector<16x1xf32>
    %c320_117 = arith.constant 320 : index
    %c1_118 = arith.constant 1 : index
    %189 = vector.load %arg1[%c320_117, %c1_118] : memref<336x2xf32, #tpu.memory_space<vmem>>, vector<16x1xf32>
    %190 = vector.broadcast %188 : vector<16x1xf32> to vector<16x64xf32>
    %191 = arith.mulf %185, %190 : vector<16x64xf32>
    %192 = arith.addf %186, %191 : vector<16x64xf32>
    %193 = vector.broadcast %189 : vector<16x1xf32> to vector<16x64xf32>
    %194 = arith.mulf %187, %193 : vector<16x64xf32>
    %195 = arith.addf %192, %194 : vector<16x64xf32>
    %c0_119 = arith.constant 0 : index
    %c0_120 = arith.constant 0 : index
    %196 = vector.load %arg6[%c0_119, %c0_120] : memref<1x64xf32, #tpu.memory_space<vmem>>, vector<1x64xf32>
    %197 = vector.broadcast %196 : vector<1x64xf32> to vector<16x64xf32>
    %198 = arith.addf %195, %197 : vector<16x64xf32>
    %cst_121 = arith.constant 5.000000e-01 : f32
    %199 = vector.broadcast %cst_121 : f32 to vector<16x64xf32>
    %200 = arith.mulf %199, %198 : vector<16x64xf32>
    %cst_122 = arith.constant 0.707106769 : f32
    %201 = vector.broadcast %cst_122 : f32 to vector<16x64xf32>
    %202 = arith.mulf %198, %201 : vector<16x64xf32>
    %203 = math.erf %202 : vector<16x64xf32>
    %cst_123 = arith.constant 1.000000e+00 : f32
    %204 = vector.broadcast %cst_123 : f32 to vector<16x64xf32>
    %205 = arith.addf %204, %203 : vector<16x64xf32>
    %206 = arith.mulf %200, %205 : vector<16x64xf32>
    %207 = arith.truncf %206 : vector<16x64xf32> to vector<16x64xbf16>
    %c320_124 = arith.constant 320 : index
    %c0_125 = arith.constant 0 : index
    %208 = vector.load %arg11[%c320_124, %c0_125] : memref<336x64xbf16, #tpu.memory_space<vmem>>, vector<16x64xbf16>
    tpu.vector_store %arg11[%c320_124, %c0_125], %207 {strides = array<i32>} : memref<336x64xbf16, #tpu.memory_space<vmem>>, vector<16x64xbf16>,
    %c0_126 = arith.constant 0 : index
    %c0_127 = arith.constant 0 : index
    %209 = vector.load %arg11[%c0_126, %c0_127] : memref<336x64xbf16, #tpu.memory_space<vmem>>, vector<336x64xbf16>
    %c0_128 = arith.constant 0 : index
    %c0_129 = arith.constant 0 : index
    %210 = vector.load %arg7[%c0_128, %c0_129] : memref<64x32xbf16, #tpu.memory_space<vmem>>, vector<64x32xbf16>
    %cst_130 = arith.constant dense<0.000000e+00> : vector<336x32xf32>
    %211 = tpu.matmul %209, %210, %cst_130 {dimension_numbers = #tpu.dot_dimension_numbers<[1], [0], [0], [1], [0, 0, 1, 1], [], []>} : vector<336x64xbf16>, vector<64x32xbf16>, vector<336x32xf32> -> vector<336x32xf32>
    %c0_131 = arith.constant 0 : index
    %c0_132 = arith.constant 0 : index
    %212 = vector.load %arg8[%c0_131, %c0_132] : memref<1x32xf32, #tpu.memory_space<vmem>>, vector<1x32xf32>
    %213 = vector.broadcast %212 : vector<1x32xf32> to vector<336x32xf32>
    %214 = arith.addf %211, %213 : vector<336x32xf32>
    %c0_133 = arith.constant 0 : index
    %c0_134 = arith.constant 0 : index
    %215 = vector.load %arg9[%c0_133, %c0_134] : memref<336x32xf32, #tpu.memory_space<vmem>>, vector<336x32xf32>
    tpu.vector_store %arg9[%c0_133, %c0_134], %214 {strides = array<i32>} : memref<336x32xf32, #tpu.memory_space<vmem>>, vector<336x32xf32>,
    return
  }
  func.func @transform_0(%arg0: i32) -> (i32, i32) {
    %c0_i32 = arith.constant 0 : i32
    %c0_i32_0 = arith.constant 0 : i32
    %c0_i32_1 = arith.constant 0 : i32
    return %c0_i32, %c0_i32_0 : i32, i32
  }
  func.func @transform_1(%arg0: i32) -> (i32, i32) {
    %c0_i32 = arith.constant 0 : i32
    %c0_i32_0 = arith.constant 0 : i32
    return %arg0, %c0_i32 : i32, i32
  }
  func.func @transform_2(%arg0: i32) -> (i32, i32) {
    %c0_i32 = arith.constant 0 : i32
    %c0_i32_0 = arith.constant 0 : i32
    %c0_i32_1 = arith.constant 0 : i32
    return %c0_i32, %c0_i32_0 : i32, i32
  }
  func.func @transform_3(%arg0: i32) -> (i32, i32) {
    %c0_i32 = arith.constant 0 : i32
    %c0_i32_0 = arith.constant 0 : i32
    %c0_i32_1 = arith.constant 0 : i32
    return %c0_i32, %c0_i32_0 : i32, i32
  }
  func.func @transform_4(%arg0: i32) -> (i32, i32) {
    %c0_i32 = arith.constant 0 : i32
    %c0_i32_0 = arith.constant 0 : i32
    %c0_i32_1 = arith.constant 0 : i32
    return %c0_i32, %c0_i32_0 : i32, i32
  }
  func.func @transform_5(%arg0: i32) -> (i32, i32) {
    %c0_i32 = arith.constant 0 : i32
    %c0_i32_0 = arith.constant 0 : i32
    %c0_i32_1 = arith.constant 0 : i32
    return %c0_i32, %c0_i32_0 : i32, i32
  }
  func.func @transform_6(%arg0: i32) -> (i32, i32) {
    %c0_i32 = arith.constant 0 : i32
    %c0_i32_0 = arith.constant 0 : i32
    %c0_i32_1 = arith.constant 0 : i32
    return %c0_i32, %c0_i32_0 : i32, i32
  }
  func.func @transform_7(%arg0: i32) -> (i32, i32) {
    %c0_i32 = arith.constant 0 : i32
    %c0_i32_0 = arith.constant 0 : i32
    %c0_i32_1 = arith.constant 0 : i32
    return %c0_i32, %c0_i32_0 : i32, i32
  }
  func.func @transform_8(%arg0: i32) -> (i32, i32) {
    %c0_i32 = arith.constant 0 : i32
    %c0_i32_0 = arith.constant 0 : i32
    return %arg0, %c0_i32 : i32, i32
  }
}

</mosaic_0001>

<bundles_post_ra>
// kernel: tpu_custom_call.1
= control target key start
LH: loop header
LB: loop body
LE: loop exit
PB: predicated region body
PF: predicated region fallthrough
CT: control target
= control target key end

     0   :  { %s5233_s27 = smov 0   ;;  %s9095_s0 = inlined_call_operand.vmem [shape: f32[336,2], index: 0, kind: input, shape index: {}]   ;;  %s9096_s1 = inlined_call_operand.vmem [shape: bf16[672,32], index: 1, kind: input, shape index: {}]   ;;  %s9097_s2 = inlined_call_operand.vmem [shape: bf16[32,64], index: 2, kind: input, shape index: {}]   ;;  %s9098_s3 = inlined_call_operand.vmem [shape: f32[1,64], index: 3, kind: input, shape index: {}]   ;;  %s9099_s4 = inlined_call_operand.vmem [shape: f32[9,64], index: 4, kind: input, shape index: {}]   ;;  %s9100_s5 = inlined_call_operand.vmem [shape: f32[1,64], index: 5, kind: input, shape index: {}]   ;;  %s9101_s6 = inlined_call_operand.vmem [shape: bf16[64,32], index: 6, kind: input, shape index: {}]   ;;  %s9102_s7 = inlined_call_operand.vmem [shape: f32[1,32], index: 7, kind: input, shape index: {}]   ;;  %s9103_s8 = inlined_call_operand.vmem [shape: f32[672,32], index: 8, kind: output, shape index: {}]  }
   0x1 LB: > { %s4577_s28 = sadd.s32 4294967295, %s5183_s27   ;;  %p4581_p0 = scmp.ge.s32.totalorder %s5183_s27, 1  ;;  %s5183_s27 = sphi %s5233_s27, %s18_s27  }
   0x2   : > { %p263_p1 = scmp.lt.s32.totalorder %s5183_s27, 3 }
   0x4   : > { %p264_p2 = pnand %p4581_p0, %p263_p1 }
   0x6   : > { %267 = sbr.rel (%p264_p2) target bundleno = 1145 (0x479), region = 52 }
   0xb   : > { %v5244_v0 = vld [vmem:[%s9095_s0 + $0x20] sm:$0xff]  ;;  %v1315_v1 = vld [vmem:[%s9095_s0 + $0x10] sm:$0xff]  ;;  %v4884_v2 = vld [vmem:[%s9097_s2 + $0x8] sm:$0xff]  ;;  %s297_s13 = smul.u32 42, %s4577_s28  ;;  %v9104_v3 = vmov 0   ;;  %v9106_v6 = vmov 1  }
   0xc   : > { %4928 = vset.pattern.permute.xlu2 %v9104_v3  ;;  %4927 = vset.pattern.permute.xlu1 %v9104_v3  ;;  %v1314_v4 = vld [vmem:[%s9095_s0 + $0x8] sm:$0xff]  ;;  %v4883_v5 = vld [vmem:[%s9097_s2] sm:$0xff]  ;;  %v1316_v8 = vld [vmem:[%s9095_s0 + $0x18] sm:$0xff]  ;;  %vm477_vm0 = vcmask 261120   ;;  %vm655_vm1 = vcmask 523264   ;;  %v5187_v43 = vmov 0.0  }
   0xd   : > { %1367 = vperm.xlu2 %4928, %v5244_v0   ;;  %1357 = vperm.xlu1 %4927, %v1315_v1   ;;  %p298_p3 = scmp.lt.s32.totalorder %s297_s13, 83  ;;  %v5267_v7 = vld [vmem:[%s9095_s0 + $0x28] sm:$0xff]  ;;  %v5286_v11 = vld [vmem:[%s9095_s0 + $0x40] sm:$0xff]  ;;  %v5291_v12 = vld [vmem:[%s9095_s0 + $0x38] sm:$0xff]  ;;  %657 = vst.msk [vmem:[#allocation2 + $0x8] sm:$0xff] %vm655_vm1, %v5187_v43  ;;  %vm3237_vm6 = vcmask 519168  }
   0xe   : > { %547 = vmatpush.bf16.msra.mxu0 %v4884_v2  ;;  %4930 = vset.pattern.permute.xlu0 %v9106_v6  ;;  %v1313_v13 = vld [vmem:[%s9095_s0] sm:$0xff]  ;;  %v5302_v14 = vld [vmem:[%s9095_s0 + $0x58] sm:$0xff]  ;;  %v5307_v15 = vld [vmem:[%s9095_s0 + $0x50] sm:$0xff]  ;;  %658 = vst.msk [vmem:[#allocation2 + $0x10] sm:$0xff] %vm655_vm1, %v5187_v43 }
   0xf   : > { %1574 = vperm.xlu0 %4930, %v1314_v4   ;;  %s9312_s13 = smov (!%p298_p3, %s297_s13), 83  ;;  %4910 = vmatpush.bf16.msra.mxu3 %v4884_v2  ;;  %v5318_v18 = vld [vmem:[%s9095_s0 + $0x70] sm:$0xff]  ;;  %v5323_v19 = vld [vmem:[%s9095_s0 + $0x68] sm:$0xff]  ;;  %v5333_v21 = vld [vmem:[%s9095_s0 + $0x80] sm:$0xff]  ;;  %656 = vst.msk [vmem:[#allocation2] sm:$0xff] %vm655_vm1, %v5187_v43 }
  0x10   : > { %s4582_s22 = sshll.u32 %s9312_s13, 2  ;;  %v1319_v20 = vld [vmem:[%s9095_s0 + $0x30] sm:$0xff]  ;;  %v1322_v24 = vld [vmem:[%s9095_s0 + $0x48] sm:$0xff]  ;;  %v1336_v26 = vld [vmem:[%s9095_s0 + $0xb8] sm:$0xff]  ;;  %659 = vst.msk [vmem:[#allocation2 + $0x118] sm:$0xff] %vm655_vm1, %v5187_v43  ;;  %s4583_s9 = sshll.u32 %s9312_s13, 3 }
  0x11   : > { %s5276_s25 = scalar_lea.vmem %s9096_s1, %s4582_s22  ;;  %v1335_v25 = vld [vmem:[%s9095_s0 + $0xb0] sm:$0xff]  ;;  %v5353_v27 = vld [vmem:[%s9095_s0 + $0x60] sm:$0xff]  ;;  %v5363_v30 = vld [vmem:[%s9095_s0 + $0x78] sm:$0xff]  ;;  %660 = vst.msk [vmem:[#allocation2 + $0x120] sm:$0xff] %vm655_vm1, %v5187_v43  ;;  %s8857_s15 = scalar_lea.vmem %s9103_s8, %s4583_s9 }
  0x12   : > { %548 = vmatpush.bf16.msra.mxu0 %v4883_v5  ;;  %v4862_v9 = vld [vmem:[%s5276_s25] sm:$0xff]  ;;  %v4873_v10 = vld [vmem:[%s5276_s25 + $0x58] sm:$0xff]  ;;  %v4863_v16 = vld [vmem:[%s5276_s25 + $0x8] sm:$0xff]  ;;  %661 = vst.msk [vmem:[#allocation2 + $0x128] sm:$0xff] %vm655_vm1, %v5187_v43 }
  0x13   : > { %4911 = vmatpush.bf16.msra.mxu3 %v4883_v5  ;;  %v4874_v17 = vld [vmem:[%s5276_s25 + $0x60] sm:$0xff]  ;;  %v4864_v22 = vld [vmem:[%s5276_s25 + $0x10] sm:$0xff]  ;;  %v4875_v23 = vld [vmem:[%s5276_s25 + $0x68] sm:$0xff]  ;;  %662 = vst.msk [vmem:[#allocation2 + $0x170] sm:$0xff] %vm655_vm1, %v5187_v43 }
  0x14   : > { %v4865_v28 = vld [vmem:[%s5276_s25 + $0x18] sm:$0xff]  ;;  %v4876_v29 = vld [vmem:[%s5276_s25 + $0x70] sm:$0xff]  ;;  %v1338_v31 = vld [vmem:[%s9095_s0 + $0xc8] sm:$0xff]  ;;  %663 = vst.msk [vmem:[#allocation2 + $0x178] sm:$0xff] %vm655_vm1, %v5187_v43 }
  0x15   : > { %1372 = vperm.xlu2 %4928, %v5267_v7   ;;  %1362 = vperm.xlu1 %4927, %v1316_v8   ;;  %v1337_v32 = vld [vmem:[%s9095_s0 + $0xc0] sm:$0xff]  ;;  %v4877_v34 = vld [vmem:[%s5276_s25 + $0x78] sm:$0xff]  ;;  %v1339_v35 = vld [vmem:[%s9095_s0 + $0xd0] sm:$0xff]  ;;  %664 = vst.msk [vmem:[#allocation2 + $0x190] sm:$0xff] %vm655_vm1, %v5187_v43 }
  0x16   : > { %4676 = vmatmul.msk.bf16.vlgmr.msra.gmra.mxu0 %vm477_vm0, %v4862_v9  ;;  %4687 = vmatmul.msk.bf16.vlgmr.msra.gmra.mxu3 %vm477_vm0, %v4873_v10  ;;  %v4866_v33 = vld [vmem:[%s5276_s25 + $0x20] sm:$0xff]  ;;  %v1340_v36 = vld [vmem:[%s9095_s0 + $0xd8] sm:$0xff]  ;;  %v4867_v37 = vld [vmem:[%s5276_s25 + $0x28] sm:$0xff] }
  0x17   : > { %1578 = vperm.xlu0 %4930, %v1315_v1   ;;  %v4878_v38 = vld [vmem:[%s5276_s25 + $0x80] sm:$0xff]  ;;  %v4868_v40 = vld [vmem:[%s5276_s25 + $0x30] sm:$0xff]  ;;  %v4879_v41 = vld [vmem:[%s5276_s25 + $0x88] sm:$0xff] }
  0x18   : > { %v1341_v39 = vld [vmem:[%s9095_s0 + $0xe0] sm:$0xff]  ;;  %v1343_v42 = vld [vmem:[%s9095_s0 + $0xf0] sm:$0xff]  ;;  %v1342_v44 = vld [vmem:[%s9095_s0 + $0xe8] sm:$0xff] }
  0x19   : > { %v4869_v47 = vld [vmem:[%s5276_s25 + $0x38] sm:$0xff]  ;;  %v4880_v48 = vld [vmem:[%s5276_s25 + $0x90] sm:$0xff]  ;;  %v3438_v49 = vld [vmem:[%s9095_s0 + $0x100] sm:$0xff] }
  0x1a   : > { %v1344_v52 = vld [vmem:[%s9095_s0 + $0xf8] sm:$0xff]  ;;  %v5450_v54 = vld [vmem:[%s9098_s3] ss:$0 sm:$0xff]  ;;  %v3440_v60 = vld [vmem:[%s9095_s0 + $0x110] sm:$0xff] }
  0x1b   : > { %v4870_v55 = vld [vmem:[%s5276_s25 + $0x40] sm:$0xff]  ;;  %v4881_v58 = vld [vmem:[%s5276_s25 + $0x98] sm:$0xff]  ;;  %v3439_v2 = vld [vmem:[%s9095_s0 + $0x108] sm:$0xff] }
  0x1c   : > { %v4871_v9 = vld [vmem:[%s5276_s25 + $0x48] sm:$0xff]  ;;  %v4872_v43 = vld [vmem:[%s5276_s25 + $0x50] sm:$0xff] }
  0x1d   : > { %1387 = vperm.xlu2 %4928, %v5286_v11   ;;  %1382 = vperm.xlu1 %4927, %v5291_v12  }
  0x1f   : > { %4934 = vset.pattern.permute.xlu0 %v9104_v3 }
  0x20   : > { %1347 = vperm.xlu0 %4934, %v1313_v13  }
  0x25   : > { %1402 = vperm.xlu2 %4928, %v5302_v14   ;;  %1397 = vperm.xlu1 %4927, %v5307_v15  }
  0x26   : > { %4677 = vmatmul.msk.bf16.gmra.mxu0 %vm477_vm0, %v4863_v16  ;;  %4688 = vmatmul.msk.bf16.gmra.mxu3 %vm477_vm0, %v4874_v17 }
  0x28   : > { %1352 = vperm.xlu0 %4934, %v1314_v4  }
  0x2d   : > { %1417 = vperm.xlu2 %4928, %v5318_v18   ;;  %1412 = vperm.xlu1 %4927, %v5323_v19  }
  0x30   : > { %1377 = vperm.xlu0 %4934, %v1319_v20  }
  0x35   : > { %4929 = vset.pattern.permute.xlu2 %v9106_v6  ;;  %1427 = vperm.xlu1 %4927, %v5333_v21  }
  0x36   : > { %1570 = vperm.xlu2 %4929, %v1313_v13   ;;  %4678 = vmatmul.msk.bf16.gmra.mxu0 %vm477_vm0, %v4864_v22  ;;  %v5495_v13 = vld [vmem:[%s9095_s0 + $0x120] sm:$0xff] }
  0x37   : > { %4689 = vmatmul.msk.bf16.gmra.mxu3 %vm477_vm0, %v4875_v23  ;;  %v5510_v22 = vld [vmem:[%s9099_s4] ss:$0 sm:$0xff]  ;;  %v5515_v23 = vld [vmem:[%s9099_s4 + $0x3] ss:$0 sm:$0xff] }
  0x38   : > { %1392 = vperm.xlu0 %4934, %v1322_v24  }
  0x3d   : > { %1457 = vperm.xlu1 %4927, %v1335_v25  }
  0x3e   : > { %4931 = vset.pattern.permute.xlu2 %v9104_v3 }
  0x3f   : > { %1462 = vperm.xlu2 %4931, %v1336_v26  }
  0x40   : > { %1407 = vperm.xlu0 %4934, %v5353_v27  }
  0x45   : > { %4932 = vset.pattern.permute.xlu1 %v9106_v6 }
  0x46   : > { %1658 = vperm.xlu1 %4932, %v1335_v25   ;;  %4679 = vmatmul.msk.bf16.gmra.mxu0 %vm477_vm0, %v4865_v28  ;;  %v707_v25 = vld [vmem:[#allocation2 + $0x7] sm:$0xff]  ;;  %v3441_v28 = vld [vmem:[%s9095_s0 + $0x118] sm:$0xff] }
  0x47   : > { %4933 = vset.pattern.permute.xlu2 %v9106_v6  ;;  %4690 = vmatmul.msk.bf16.gmra.mxu3 %vm477_vm0, %v4876_v29 }
  0x48   : > { %1662 = vperm.xlu2 %4933, %v1336_v26   ;;  %1422 = vperm.xlu0 %4934, %v5363_v30  }
  0x4e   : > { %1582 = vperm.xlu1 %4932, %v1316_v8  }
  0x50   : > { %4935 = vset.pattern.permute.xlu2 %v9104_v3  ;;  %1472 = vperm.xlu0 %4934, %v1338_v31  }
  0x51   : > { %1467 = vperm.xlu2 %4935, %v1337_v32  }
  0x56   : > { %1666 = vperm.xlu1 %4932, %v1337_v32   ;;  %4680 = vmatmul.msk.bf16.gmra.mxu0 %vm477_vm0, %v4866_v33  ;;  %v708_v33 = vld [vmem:[#allocation2 + $0xf] sm:$0xff] }
  0x57   : > { %4691 = vmatmul.msk.bf16.gmra.mxu3 %vm477_vm0, %v4877_v34  ;;  %v5545_v34 = vld [vmem:[%s9099_s4 + $0x2] ss:$0 sm:$0xff] }
  0x58   : > { %1477 = vperm.xlu0 %4934, %v1339_v35  }
  0x59   : > { %4936 = vset.pattern.permute.xlu2 %v9106_v6 }
  0x5a   : > { %1670 = vperm.xlu2 %4936, %v1338_v31   ;;  %v741_v31 = vmul.f32 %v5510_v22, %v707_v25 }
  0x5e   : > { %1586 = vperm.xlu1 %4932, %v5244_v0  }
  0x60   : > { %4938 = vset.pattern.permute.xlu0 %v9106_v6 }
  0x61   : > { %1678 = vperm.xlu0 %4938, %v1340_v36  }
  0x62   : > { %1590 = vperm.xlu2 %4936, %v5267_v7  }
  0x66   : > { %4937 = vset.pattern.permute.xlu1 %v9104_v3  ;;  %4681 = vmatmul.msk.bf16.gmra.mxu0 %vm477_vm0, %v4867_v37 }
  0x67   : > { %1482 = vperm.xlu1 %4937, %v1340_v36   ;;  %4692 = vmatmul.msk.bf16.gmra.mxu3 %vm477_vm0, %v4878_v38  ;;  %v5420_v45 = vpop.permute.xlu2 %1367  ;;  %v5555_v36 = vld [vmem:[%s9099_s4 + $0x5] ss:$0 sm:$0xff] }
  0x69   : > { %1682 = vperm.xlu0 %4938, %v1341_v39  }
  0x6a   : > { %1674 = vperm.xlu2 %4936, %v1339_v35   ;;  %v5550_v35 = vld [vmem:[%s9099_s4 + $0x4] ss:$0 sm:$0xff] }
  0x6f   : > { %4939 = vset.pattern.permute.xlu1 %v9106_v6  ;;  %v5438_v51 = vpop.permute.xlu2 %1372 }
  0x70   : > { %1594 = vperm.xlu1 %4939, %v1319_v20  }
  0x71   : > { %1606 = vperm.xlu0 %4938, %v1322_v24  }
  0x72   : > { %1598 = vperm.xlu2 %4936, %v5291_v12  }
  0x76   : > { %4682 = vmatmul.msk.bf16.gmra.mxu0 %vm477_vm0, %v4868_v40  ;;  %v839_v40 = vld [vmem:[#allocation2 + $0x9] sm:$0xff] }
  0x77   : > { %4693 = vmatmul.msk.bf16.gmra.mxu3 %vm477_vm0, %v4879_v41  ;;  %v5454_v56 = vpop.permute.xlu2 %1387 }
  0x78   : > { %4940 = vset.pattern.permute.xlu1 %v9104_v3  ;;  %9118 = vst [vmem:[#allocation5_spill] sm:$0xff] %v5454_v56 }
  0x79   : > { %1487 = vperm.xlu1 %4940, %v1341_v39   ;;  %1690 = vperm.xlu0 %4938, %v1343_v42  }
  0x7a   : > { %4941 = vset.pattern.permute.xlu2 %v9104_v3 }
  0x7b   : > { %1492 = vperm.xlu2 %4941, %v1342_v44  }
  0x7f   : > { %v5422_v46 = vpop.permute.xlu1 %1357  ;;  %v5476_v4 = vpop.permute.xlu2 %1402 }
  0x80   : > { %9120 = vst [vmem:[#allocation7_spill] sm:$0xff] %v5476_v4 }
  0x81   : > { %4942 = vset.pattern.permute.xlu1 %v9106_v6  ;;  %1614 = vperm.xlu0 %4938, %v5302_v14   ;;  %v5480_v5 = vpop.permute.xlu0 %1574 }
  0x82   : > { %1686 = vperm.xlu1 %4942, %v1342_v44  }
  0x83   : > { %4943 = vset.pattern.permute.xlu2 %v9106_v6 }
  0x84   : > { %1602 = vperm.xlu2 %4943, %v5286_v11  }
  0x86   : > { %4683 = vmatmul.msk.bf16.gmra.mxu0 %vm477_vm0, %v4869_v47  ;;  %v773_v47 = vld [vmem:[#allocation2 + $0x8] sm:$0xff] }
  0x87   : > { %v5435_v50 = vpop.permute.xlu1 %1362  ;;  %4694 = vmatmul.msk.bf16.gmra.mxu3 %vm477_vm0, %v4880_v48  ;;  %v5497_v14 = vpop.permute.xlu2 %1417 }
  0x88   : > { %9122 = vst [vmem:[#allocation9_spill] sm:$0xff] %v5497_v14 }
  0x89   : > { %3503 = vperm.xlu0 %4938, %v3438_v49  }
  0x8a   : > { %4944 = vset.pattern.permute.xlu1 %v9104_v3 }
  0x8b   : > { %1497 = vperm.xlu1 %4944, %v1343_v42  }
  0x8c   : > { %4945 = vset.pattern.permute.xlu2 %v9104_v3 }
  0x8d   : > { %1502 = vperm.xlu2 %4945, %v1344_v52  }
  0x8f   : > { %v5445_v53 = vpop.permute.xlu1 %1382 }
  0x90   : > { %9117 = vst [vmem:[#allocation4_spill] sm:$0xff] %v5445_v53  ;;  %v5557_v37 = vpop.permute.xlu2 %1570 }
  0x91   : > { %1622 = vperm.xlu0 %4938, %v5323_v19  }
  0x93   : > { %4946 = vset.pattern.permute.xlu1 %v9106_v6  ;;  %v550_v57 = vpop.f32.mrf.mxu0 }
  0x94   : > { %v551_v59 = vadd.f32 %v5450_v54, %v550_v57  ;;  %1694 = vperm.xlu1 %4946, %v1344_v52  }
  0x95   : > { %4947 = vset.pattern.permute.xlu2 %v9106_v6 }
  0x96   : > { %665 = vst.msk [vmem:[#allocation2 + $0x18] sm:$0xff] %vm655_vm1, %v551_v59  ;;  %1610 = vperm.xlu2 %4947, %v5307_v15   ;;  %4684 = vmatmul.msk.bf16.gmra.mxu0 %vm477_vm0, %v4870_v55  ;;  %v5501_v15 = vpop.permute.xlu0 %1578  ;;  %v742_v55 = vmul.f32 %v5510_v22, %v708_v33 }
  0x97   : > { %v5466_v61 = vpop.permute.xlu1 %1397  ;;  %4695 = vmatmul.msk.bf16.gmra.mxu3 %vm477_vm0, %v4881_v58 }
  0x98   : > { %9119 = vst [vmem:[#allocation6_spill] sm:$0xff] %v5466_v61 }
  0x99   : > { %3511 = vperm.xlu0 %4938, %v3440_v60   ;;  %v605_v62 = vpop.f32.mrf.mxu3 }
  0x9a   : > { %v606_v63 = vadd.f32 %v5450_v54, %v605_v62  ;;  %v5585_v62 = vld [vmem:[%s9099_s4 + $0x8] ss:$0 sm:$0xff] }
  0x9b   : > { %v552_v0 = vpop.f32.mrf.mxu0 }
  0x9c   : > { %v553_v1 = vadd.f32 %v5450_v54, %v552_v0  ;;  %4948 = vset.pattern.permute.xlu1 %v9104_v3  ;;  %687 = vst.msk [vmem:[#allocation2 + $0xc8] sm:$0xff] %vm655_vm1, %v606_v63  ;;  %v873_v0 = vmul.f32 %v5545_v34, %v839_v40 }
  0x9d   : > { %3448 = vperm.xlu1 %4948, %v3438_v49   ;;  %v5519_v26 = vld [vmem:[#allocation2 + $0x17] sm:$0xff] }
  0x9e   : > { %666 = vst.msk [vmem:[#allocation2 + $0x20] sm:$0xff] %vm655_vm1, %v553_v1  ;;  %4949 = vset.pattern.permute.xlu2 %v9104_v3  ;;  %v909_v32 = vmul.f32 %v5515_v23, %v5519_v26  ;;  %v5568_v48 = vld [vmem:[#allocation2 + $0x18] sm:$0xff]  ;;  %v1348_v49 = vpop.permute.xlu0 %1347 }
  0x9f   : > { %3453 = vperm.xlu2 %4949, %v3439_v2   ;;  %v5482_v7 = vpop.permute.xlu1 %1412 }
  0xa0   : > { %9121 = vst [vmem:[#allocation8_spill] sm:$0xff] %v5482_v7  ;;  %v1013_v57 = vadd.f32 %v909_v32, %v741_v31 }
  0xa1   : > { %1630 = vperm.xlu0 %4938, %v5363_v30   ;;  %v607_v8 = vpop.f32.mrf.mxu3  ;;  %v5536_v30 = vld [vmem:[%s9099_s4 + $0x1] ss:$0 sm:$0xff] }
  0xa2   : > { %v608_v10 = vadd.f32 %v5450_v54, %v607_v8  ;;  %v774_v8 = vld [vmem:[#allocation2 + $0x10] sm:$0xff] }
  0xa3   : > { %v555_v11 = vpop.f32.mrf.mxu0  ;;  %v808_v31 = vmul.f32 %v5536_v30, %v774_v8 }
  0xa4   : > { %v556_v12 = vadd.f32 %v5450_v54, %v555_v11  ;;  %688 = vst.msk [vmem:[#allocation2 + $0xd0] sm:$0xff] %vm655_vm1, %v608_v10  ;;  %v945_v10 = vmul.f32 %v5550_v35, %v5568_v48 }
  0xa5   : > { %4950 = vset.pattern.permute.xlu1 %v9106_v6  ;;  %v5560_v39 = vld [vmem:[#allocation2 + $0x1f] sm:$0xff] }
  0xa6   : > { %667 = vst.msk [vmem:[#allocation2 + $0x28] sm:$0xff] %vm655_vm1, %v556_v12  ;;  %3507 = vperm.xlu1 %4950, %v3439_v2   ;;  %4685 = vmatmul.msk.bf16.gmra.mxu0 %vm477_vm0, %v4871_v9  ;;  %v5562_v41 = vld [vmem:[#allocation2 + $0x19] sm:$0xff]  ;;  %v807_v9 = vmul.f32 %v5536_v30, %v773_v47 }
  0xa7   : > { %4951 = vset.pattern.permute.xlu2 %v9106_v6  ;;  %v5504_v17 = vpop.permute.xlu1 %1427  ;;  %v981_v1 = vmul.f32 %v5555_v36, %v5562_v41  ;;  %v776_v12 = vld [vmem:[#allocation2 + $0x20] sm:$0xff] }
  0xa8   : > { %1618 = vperm.xlu2 %4951, %v5353_v27   ;;  %9123 = vst [vmem:[#allocation10_spill] sm:$0xff] %v5504_v17  ;;  %v5524_v27 = vld [vmem:[%s9099_s4 + $0x6] ss:$0 sm:$0xff] }
  0xa9   : > { %3519 = vperm.xlu0 %4938, %v5495_v13   ;;  %v610_v16 = vpop.f32.mrf.mxu3  ;;  %v1077_v33 = vadd.f32 %v981_v1, %v873_v0 }
  0xaa   : > { %v611_v19 = vadd.f32 %v5450_v54, %v610_v16 }
  0xab   : > { %v557_v20 = vpop.f32.mrf.mxu0 }
  0xac   : > { %v558_v24 = vadd.f32 %v5450_v54, %v557_v20  ;;  %689 = vst.msk [vmem:[#allocation2 + $0xd8] sm:$0xff] %vm655_vm1, %v611_v19  ;;  %v5605_v19 = vld [vmem:[%s9095_s0 + $0x138] sm:$0xff] }
  0xad   : > { %v5531_v29 = vld [vmem:[#allocation2 + $0x27] sm:$0xff] }
  0xae   : > { %668 = vst.msk [vmem:[#allocation2 + $0x30] sm:$0xff] %vm655_vm1, %v558_v24  ;;  %4952 = vset.pattern.permute.xlu1 %v9104_v3  ;;  %v1113_v42 = vmul.f32 %v5524_v27, %v5531_v29  ;;  %v5587_v63 = vld [vmem:[#allocation2 + $0x28] sm:$0xff] }
  0xaf   : > { %3458 = vperm.xlu1 %4952, %v3440_v60   ;;  %v5577_v59 = vpop.permute.xlu1 %1457  ;;  %v910_v60 = vmul.f32 %v5515_v23, %v5560_v39  ;;  %v842_v20 = vld [vmem:[#allocation2 + $0x21] sm:$0xff] }
  0xb0   : > { %4953 = vset.pattern.permute.xlu2 %v9104_v3  ;;  %9124 = vst [vmem:[#allocation11_spill] sm:$0xff] %v5577_v59  ;;  %v1217_v11 = vadd.f32 %v1113_v42, %v1013_v57  ;;  %v840_v42 = vld [vmem:[#allocation2 + $0x11] sm:$0xff] }
  0xb1   : > { %3463 = vperm.xlu2 %4953, %v3441_v28   ;;  %1634 = vperm.xlu0 %4938, %v5333_v21   ;;  %v612_v38 = vpop.f32.mrf.mxu3  ;;  %v5574_v21 = vld [vmem:[%s9099_s4 + $0x7] ss:$0 sm:$0xff]  ;;  %v1014_v32 = vadd.f32 %v910_v60, %v742_v55 }
  0xb2   : > { %v613_v44 = vadd.f32 %v5450_v54, %v612_v38  ;;  %v1149_v25 = vmul.f32 %v5574_v21, %v5587_v63  ;;  %v1505_v47 = vmul.f32 %v1348_v49, %v1217_v11  ;;  %v5634_v11 = vld [vmem:[%s9100_s5] ss:$0 sm:$0xff] }
  0xb3   : > { %v560_v52 = vpop.f32.mrf.mxu0 }
  0xb4   : > { %v561_v58 = vadd.f32 %v5450_v54, %v560_v52  ;;  %690 = vst.msk [vmem:[#allocation2 + $0xe0] sm:$0xff] %vm655_vm1, %v613_v44  ;;  %v1045_v44 = vadd.f32 %v945_v10, %v807_v9  ;;  %v982_v52 = vmul.f32 %v5555_v36, %v842_v20  ;;  %v874_v9 = vmul.f32 %v5545_v34, %v840_v42  ;;  %v1353_v10 = vpop.permute.xlu0 %1352 }
  0xb5   : > { %v5592_v2 = vld [vmem:[#allocation2 + $0x2f] sm:$0xff] }
  0xb6   : > { %669 = vst.msk [vmem:[#allocation2 + $0x38] sm:$0xff] %vm655_vm1, %v561_v58  ;;  %4686 = vmatmul.msk.bf16.gmra.mxu0 %vm477_vm0, %v4872_v43  ;;  %v5599_v16 = vld [vmem:[#allocation2 + $0x29] sm:$0xff]  ;;  %v1114_v24 = vmul.f32 %v5524_v27, %v5592_v2  ;;  %v946_v43 = vmul.f32 %v5550_v35, %v776_v12  ;;  %v5622_v58 = vpop.permute.xlu2 %1462  ;;  %v1249_v1 = vadd.f32 %v1149_v25, %v1045_v44 }
  0xb7   : > { %4954 = vset.pattern.permute.xlu1 %v9106_v6  ;;  %v1185_v38 = vmul.f32 %v5585_v62, %v5599_v16  ;;  %v5616_v40 = vld [vmem:[#allocation2 + $0x30] sm:$0xff]  ;;  %9125 = vst [vmem:[#allocation12_spill] sm:$0xff] %v5622_v58 }
  0xb8   : > { %3515 = vperm.xlu1 %4954, %v3441_v28   ;;  %v1218_v55 = vadd.f32 %v1114_v24, %v1014_v32  ;;  %v1537_v25 = vadd.f32 %v1505_v47, %v1249_v1  ;;  %v5639_v32 = vpop.permute.xlu1 %1658  ;;  %v5650_v47 = vld [vmem:[%s9095_s0 + $0x90] sm:$0xff] }
  0xb9   : > { %4955 = vset.pattern.permute.xlu2 %v9106_v6  ;;  %4959 = vset.pattern.permute.xlu0 %v9104_v3  ;;  %v1281_v57 = vadd.f32 %v1185_v38, %v1077_v33  ;;  %9126 = vst [vmem:[#allocation13_spill] sm:$0xff] %v5639_v32  ;;  %v1046_v33 = vadd.f32 %v946_v43, %v808_v31 }
  0xba   : > { %1626 = vperm.xlu2 %4955, %v5318_v18   ;;  %3483 = vperm.xlu0 %4959, %v5605_v19   ;;  %v615_v28 = vpop.f32.mrf.mxu3  ;;  %v1150_v18 = vmul.f32 %v5574_v21, %v5616_v40  ;;  %v1078_v38 = vadd.f32 %v982_v52, %v874_v9  ;;  %v1506_v42 = vmul.f32 %v1353_v10, %v1218_v55 }
  0xbb   : > { %v562_v60 = vpop.f32.mrf.mxu0  ;;  %v616_v0 = vadd.f32 %v5450_v54, %v615_v28  ;;  %v1697_v49 = vmul.f32 %v5557_v37, %v1281_v57  ;;  %v3443_v28 = vld [vmem:[%s9095_s0 + $0x128] sm:$0xff]  ;;  %v743_v31 = vmul.f32 %v5510_v22, %v5519_v26  ;;  %v809_v43 = vmul.f32 %v5536_v30, %v5568_v48 }
  0xbc   : > { %v563_v8 = vadd.f32 %v5450_v54, %v562_v60  ;;  %v1250_v57 = vadd.f32 %v1150_v18, %v1046_v33  ;;  %v744_v55 = vmul.f32 %v5510_v22, %v5560_v39  ;;  %v810_v26 = vmul.f32 %v5536_v30, %v776_v12 }
  0xbd   : > { %691 = vst.msk [vmem:[#allocation2 + $0xe8] sm:$0xff] %vm655_vm1, %v616_v0  ;;  %v5636_v24 = vld [vmem:[#allocation2 + $0x31] sm:$0xff]  ;;  %v1729_v44 = vadd.f32 %v1697_v49, %v1537_v25  ;;  %v875_v48 = vmul.f32 %v5545_v34, %v5562_v41  ;;  %v912_v39 = vmul.f32 %v5515_v23, %v5592_v2  ;;  %v5678_v49 = vmul.f32 %v5510_v22, %v5531_v29 }
  0xbe   : > { %670 = vst.msk [vmem:[#allocation2 + $0x40] sm:$0xff] %vm655_vm1, %v563_v8  ;;  %v1186_v37 = vmul.f32 %v5585_v62, %v5636_v24  ;;  %v1538_v0 = vadd.f32 %v1506_v42, %v1250_v57  ;;  %v876_v8 = vmul.f32 %v5545_v34, %v842_v20  ;;  %v5680_v12 = vpop.permute.xlu2 %1662  ;;  %v746_v41 = vmul.f32 %v5510_v22, %v5592_v2  ;;  %v5736_v32 = vld [vmem:[#allocation2 + $0x38] sm:$0xff] }
  0xbf   : > { %v5658_v52 = vadd.f32 %v5634_v11, %v1729_v44  ;;  %9128 = vst [vmem:[#allocation15_spill] sm:$0xff] %v5680_v12  ;;  %v911_v25 = vmul.f32 %v5515_v23, %v5531_v29  ;;  %v947_v33 = vmul.f32 %v5550_v35, %v5587_v63  ;;  %v948_v2 = vmul.f32 %v5550_v35, %v5616_v40  ;;  %v1330_v12 = vld [vmem:[%s9095_s0 + $0x88] sm:$0xff] }
  0xc0   : > { %4956 = vset.pattern.permute.xlu1 %v9104_v3  ;;  %v1282_v60 = vadd.f32 %v1186_v37, %v1078_v38  ;;  %v812_v37 = vmul.f32 %v5536_v30, %v5616_v40  ;;  %v1016_v40 = vadd.f32 %v912_v39, %v744_v55  ;;  %v984_v55 = vmul.f32 %v5555_v36, %v5636_v24 }
  0xc1   : > { %3468 = vperm.xlu1 %4956, %v5495_v13   ;;  %9127 = vst [vmem:[#allocation14_spill] sm:$0xff] %v5658_v52  ;;  %v5671_v9 = vmul.f32 0.70710677, %v5658_v52  ;;  %v878_v17 = vmul.f32 %v5545_v34, %v5636_v24 }
  0xc2   : > { %4957 = vset.pattern.permute.xlu2 %v9104_v3  ;;  %4963 = vset.pattern.permute.xlu0 %v9106_v6  ;;  %v1698_v1 = vmul.f32 %v5480_v5, %v1282_v60  ;;  %v617_v44 = vpop.f32.mrf.mxu3  ;;  %9132 = vst [vmem:[#allocation18_spill] sm:$0xff] %v5736_v32 }
  0xc3   : > { %3473 = vperm.xlu2 %4957, %v3443_v28   ;;  %v565_v13 = vpop.f32.mrf.mxu0  ;;  %1642 = vperm.xlu0 %4963, %v5650_v47   ;;  %v1861_v38 = vmul.f32 %v5671_v9, %v5671_v9  ;;  %v618_v4 = vadd.f32 %v5450_v54, %v617_v44 }
  0xc4   : > { %v566_v18 = vadd.f32 %v5450_v54, %v565_v13  ;;  %v1730_v5 = vadd.f32 %v1698_v1, %v1538_v0  ;;  %v5708_v0 = vld [vmem:[#allocation2 + $0x37] sm:$0xff]  ;;  %v811_v1 = vmul.f32 %v5536_v30, %v5587_v63  ;;  %v983_v13 = vmul.f32 %v5555_v36, %v5599_v16 }
  0xc5   : > { %v5682_v20 = vld [vmem:[#allocation2 + $0x3f] sm:$0xff]  ;;  %9129 = vst [vmem:[#allocation16_spill] sm:$0xff] %v5708_v0  ;;  %v5726_v59 = vmin.f32 %v1861_v38, 16.0  ;;  %v9131_v63 = vmov 1   ;;  %v5740_v38 = vmul.f32 %v5545_v34, %v5599_v16  ;;  %v1115_v58 = vmul.f32 %v5524_v27, %v5708_v0 }
  0xc6   : > { %v5686_v10 = vld [vmem:[#allocation2 + $0x40] sm:$0xff]  ;;  %671 = vst.msk [vmem:[#allocation2 + $0x48] sm:$0xff] %vm655_vm1, %v566_v18  ;;  %v914_v42 = vmul.f32 %v5515_v23, %v5682_v20  ;;  %v1116_v57 = vmul.f32 %v5524_v27, %v5682_v20  ;;  %v5706_v60 = vadd.f32 %v5634_v11, %v1730_v5  ;;  %v1583_v18 = vpop.permute.xlu1 %1582  ;;  %v5724_v5 = vld [vmem:[%s9095_s0 + $0x148] sm:$0xff] }
  0xc7   : > { %v950_v29 = vmul.f32 %v5550_v35, %v5686_v10  ;;  %9130 = vst [vmem:[#allocation17_spill] sm:$0xff] %v5724_v5  ;;  %v1863_v24 = vmul.f32 2.1237322e-06, %v5726_v59 }
  0xc8   : > { %v5714_v3 = vadd.f32 %v914_v42, %v746_v41  ;;  %v5732_v39 = vmul.f32 0.70710677, %v5706_v60  ;;  %v1015_v41 = vadd.f32 %v911_v25, %v743_v31  ;;  %v1048_v42 = vadd.f32 %v948_v2, %v810_v26  ;;  %v5752_v25 = vld [vmem:[#allocation2 + $0x39] sm:$0xff]  ;;  %692 = vst.msk [vmem:[#allocation2 + $0xf0] sm:$0xff] %vm655_vm1, %v618_v4 }
  0xc9   : > { %v5716_v6 = vadd.f32 %v950_v29, %v812_v37  ;;  %4958 = vset.pattern.permute.xlu1 %v9131_v63  ;;  %v5734_v37 = vadd.f32 %v947_v33, %v809_v43  ;;  %v1220_v29 = vadd.f32 %v1116_v57, %v1016_v40  ;;  %v1152_v26 = vmul.f32 %v5574_v21, %v5686_v10 }
  0xca   : > { %3523 = vperm.xlu1 %4958, %v3443_v28   ;;  %v1901_v31 = vmul.f32 %v5732_v39, %v5732_v39  ;;  %v1079_v28 = vadd.f32 %v983_v13, %v875_v48  ;;  %v913_v33 = vmul.f32 %v5515_v23, %v5708_v0  ;;  %v1080_v57 = vadd.f32 %v984_v55, %v876_v8  ;;  %v5771_v8 = vpop.permute.xlu2 %1467 }
  0xcb   : > { %1432 = vperm.xlu2 %4957, %v1330_v12   ;;  %v567_v43 = vpop.f32.mrf.mxu0  ;;  %4014 = vperm.xlu0 %4963, %v5724_v5   ;;  %v949_v48 = vmul.f32 %v5550_v35, %v5736_v32  ;;  %v1151_v13 = vmul.f32 %v5574_v21, %v5736_v32  ;;  %v1508_v61 = vmul.f32 %v5435_v50, %v1220_v29  ;;  %v1864_v29 = vadd.f32 0.00028619796, %v1863_v24 }
  0xcc   : > { %v568_v16 = vadd.f32 %v5450_v54, %v567_v43  ;;  %v5759_v40 = vmin.f32 %v1901_v31, 16.0  ;;  %v1219_v7 = vadd.f32 %v1115_v58, %v1015_v41  ;;  %9134 = vst [vmem:[#allocation20_spill] sm:$0xff] %v5771_v8  ;;  %v1187_v52 = vmul.f32 %v5585_v62, %v5752_v25  ;;  %v3444_v58 = vld [vmem:[%s9095_s0 + $0x130] sm:$0xff]  ;;  %v620_v41 = vpop.f32.mrf.mxu3 }
  0xcd   : > { %v5757_v2 = vld [vmem:[#allocation2 + $0x41] sm:$0xff]  ;;  %v621_v44 = vadd.f32 %v5450_v54, %v620_v41  ;;  %v1017_v0 = vadd.f32 %v913_v33, %v5678_v49 }
  0xce   : > { %9133 = vst [vmem:[#allocation19_spill] sm:$0xff] %v5757_v2  ;;  %v986_v43 = vmul.f32 %v5555_v36, %v5757_v2  ;;  %v1188_v14 = vmul.f32 %v5585_v62, %v5757_v2  ;;  %v1903_v55 = vmul.f32 2.1237322e-06, %v5759_v40  ;;  %v1914_v31 = vmul.f32 3.8918573e-05, %v5759_v40  ;;  %v5776_v56 = vld [vmem:[#allocation2 + $0x47] sm:$0xff] }
  0xcf   : > { %672 = vst.msk [vmem:[#allocation2 + $0x50] sm:$0xff] %vm655_vm1, %v568_v16  ;;  %v1252_v2 = vadd.f32 %v1152_v26, %v1048_v42  ;;  %v1117_v42 = vmul.f32 %v5524_v27, %v5776_v56  ;;  %v1507_v4 = vmul.f32 %v5422_v46, %v1219_v7 }
  0xd0   : > { %v5780_v32 = vadd.f32 %v986_v43, %v878_v17  ;;  %v1284_v50 = vadd.f32 %v1188_v14, %v1080_v57  ;;  %v1904_v16 = vadd.f32 0.00028619796, %v1903_v55  ;;  %v1915_v8 = vadd.f32 0.001143296, %v1914_v31  ;;  %v5788_v17 = vpop.permute.xlu1 %1666  ;;  %693 = vst.msk [vmem:[#allocation2 + $0xf8] sm:$0xff] %vm655_vm1, %v621_v44 }
  0xd1   : > { %v1540_v53 = vadd.f32 %v1508_v61, %v1252_v2  ;;  %v1049_v14 = vadd.f32 %v949_v48, %v811_v1  ;;  %v1283_v1 = vadd.f32 %v1187_v52, %v1079_v28  ;;  %v1865_v55 = vmul.f32 %v1864_v29, %v5726_v59 }
  0xd2   : > { %v1700_v5 = vmul.f32 %v1583_v18, %v1284_v50  ;;  %1638 = vperm.xlu1 %4958, %v1330_v12   ;;  %v1905_v26 = vmul.f32 %v1904_v16, %v5759_v40  ;;  %v1916_v24 = vmul.f32 %v1915_v8, %v5759_v40  ;;  %v5797_v18 = vld [vmem:[#allocation2 + $0x48] sm:$0xff]  ;;  %v985_v12 = vmul.f32 %v5555_v36, %v5752_v25  ;;  %v5833_v44 = vpop.permute.xlu2 %1670 }
  0xd3   : > { %3478 = vperm.xlu2 %4957, %v3444_v58   ;;  %v570_v57 = vpop.f32.mrf.mxu0  ;;  %v1251_v8 = vadd.f32 %v1151_v13, %v5734_v37  ;;  %v1221_v7 = vadd.f32 %v1117_v42, %v1017_v0  ;;  %v1874_v52 = vmul.f32 3.8918573e-05, %v5726_v59  ;;  %v1153_v29 = vmul.f32 %v5574_v21, %v5797_v18  ;;  %9135 = vst [vmem:[#allocation21_spill] sm:$0xff] %v5833_v44 }
  0xd4   : > { %v1732_v49 = vadd.f32 %v1700_v5, %v1540_v53  ;;  %v571_v61 = vadd.f32 %v5450_v54, %v570_v57  ;;  %v1906_v33 = vadd.f32 0.0036580483, %v1905_v26  ;;  %v1917_v2 = vadd.f32 0.014752088, %v1916_v24  ;;  %v5817_v5 = vld [vmem:[%s9095_s0 + $0xa0] sm:$0xff] }
  0xd5   : > { %v1539_v50 = vadd.f32 %v1507_v4, %v1251_v8  ;;  %1650 = vperm.xlu0 %4963, %v5817_v5   ;;  %v1081_v41 = vadd.f32 %v985_v12, %v5740_v38  ;;  %v1699_v16 = vmul.f32 %v5501_v15, %v1283_v1  ;;  %v1866_v57 = vadd.f32 0.0036580483, %v1865_v55 }
  0xd6   : > { %v5801_v48 = vld [vmem:[#allocation2 + $0x4f] sm:$0xff]  ;;  %v5808_v46 = vadd.f32 %v5634_v11, %v1732_v49  ;;  %673 = vst.msk [vmem:[#allocation2 + $0x58] sm:$0xff] %vm655_vm1, %v571_v61  ;;  %v1907_v37 = vmul.f32 %v1906_v33, %v5759_v40  ;;  %v1918_v28 = vmul.f32 %v1917_v2, %v5759_v40  ;;  %v1509_v38 = vmul.f32 %v5420_v45, %v1221_v7 }
  0xd7   : > { %v5803_v43 = vld [vmem:[#allocation2 + $0x50] sm:$0xff]  ;;  %v1118_v53 = vmul.f32 %v5524_v27, %v5801_v48  ;;  %v1875_v61 = vadd.f32 0.001143296, %v1874_v52  ;;  %v1253_v8 = vadd.f32 %v1153_v29, %v1049_v14 }
  0xd8   : > { %v1154_v13 = vmul.f32 %v5574_v21, %v5803_v43  ;;  %v5823_v31 = vld [vmem:[#allocation2 + $0x49] sm:$0xff]  ;;  %v5827_v0 = vmul.f32 0.70710677, %v5808_v46  ;;  %v1908_v42 = vadd.f32 0.05243302, %v1907_v37  ;;  %v1587_v2 = vpop.permute.xlu1 %1586 }
  0xd9   : > { %v1919_v26 = vadd.f32 0.112945676, %v1918_v28  ;;  %v1222_v24 = vadd.f32 %v1118_v53, %v5714_v3  ;;  %v1189_v49 = vmul.f32 %v5585_v62, %v5823_v31  ;;  %v1731_v53 = vadd.f32 %v1699_v16, %v1539_v50 }
  0xda   : > { %v1981_v4 = vmul.f32 %v5827_v0, %v5827_v0  ;;  %3527 = vperm.xlu1 %4958, %v3444_v58   ;;  %v1909_v12 = vmul.f32 %v1908_v42, %v5759_v40  ;;  %v1254_v1 = vadd.f32 %v1154_v13, %v5716_v6  ;;  %v1867_v6 = vmul.f32 %v1866_v57, %v5726_v59 }
  0xdb   : > { %v1920_v15 = vmul.f32 %v1919_v26, %v5759_v40  ;;  %v1510_v33 = vmul.f32 %v5438_v51, %v1222_v24  ;;  %4960 = vset.pattern.permute.xlu2 %v9131_v63  ;;  %v1285_v55 = vadd.f32 %v1189_v49, %v1081_v41  ;;  %v572_v37 = vpop.f32.mrf.mxu0  ;;  %v1541_v13 = vadd.f32 %v1509_v38, %v1253_v8 }
  0xdc   : > { %v5846_v3 = vmin.f32 %v1981_v4, 16.0  ;;  %3531 = vperm.xlu2 %4960, %v5605_v19   ;;  %v1910_v45 = vadd.f32 0.18741608, %v1909_v12  ;;  %v1876_v42 = vmul.f32 %v1875_v61, %v5726_v59  ;;  %v5860_v26 = vadd.f32 %v5634_v11, %v1731_v53 }
  0xdd   : > { %v1921_v58 = vadd.f32 0.4994258, %v1920_v15  ;;  %v1542_v7 = vadd.f32 %v1510_v33, %v1254_v1  ;;  %v5849_v52 = vld [vmem:[#allocation2 + $0x51] sm:$0xff]  ;;  %v1701_v41 = vmul.f32 %v1587_v2, %v1285_v55  ;;  %v1868_v49 = vadd.f32 0.05243302, %v1867_v6  ;;  %v1591_v1 = vpop.permute.xlu2 %1590 }
  0xde   : > { %v1983_v51 = vmul.f32 2.1237322e-06, %v5846_v3  ;;  %v1994_v28 = vmul.f32 3.8918573e-05, %v5846_v3  ;;  %v1911_v14 = vmul.f32 %v1910_v45, %v5759_v40  ;;  %v1190_v19 = vmul.f32 %v5585_v62, %v5849_v52 }
  0xdf   : > { %v1922_v50 = vmul.f32 %v1921_v58, %v5759_v40  ;;  %v1733_v4 = vadd.f32 %v1701_v41, %v1541_v13  ;;  %v1877_v40 = vadd.f32 0.014752088, %v1876_v42  ;;  %v9136_v12 = vmov 0  }
  0xe0   : > { %v1984_v29 = vadd.f32 0.00028619796, %v1983_v51  ;;  %v1995_v16 = vadd.f32 0.001143296, %v1994_v28  ;;  %v1286_v57 = vadd.f32 %v1190_v19, %v5780_v32  ;;  %v1912_v15 = vadd.f32 1.1283791, %v1911_v14 }
  0xe1   : > { %v5862_v24 = vadd.f32 1.0, %v1922_v50  ;;  %v5871_v32 = vmul.f32 0.70710677, %v5860_v26  ;;  %v5876_v55 = vmul.f32 %v5510_v22, %v5682_v20  ;;  %v5879_v53 = vadd.f32 %v5634_v11, %v1733_v4  ;;  %v1332_v14 = vld [vmem:[%s9095_s0 + $0x98] sm:$0xff] }
  0xe2   : > { %v1985_v38 = vmul.f32 %v1984_v29, %v5846_v3  ;;  %v1996_v61 = vmul.f32 %v1995_v16, %v5846_v3  ;;  %4961 = vset.pattern.permute.xlu1 %v9136_v12  ;;  %v1702_v8 = vmul.f32 %v1591_v1, %v1286_v57  ;;  %v1869_v45 = vmul.f32 %v1868_v49, %v5726_v59 }
  0xe3   : > { %5001 = vrcp.f32 %v5862_v24  ;;  %1437 = vperm.xlu1 %4961, %v5650_v47   ;;  %v1878_v58 = vmul.f32 %v1877_v40, %v5726_v59  ;;  %v5885_v47 = vmul.f32 %v5536_v30, %v5686_v10  ;;  %v575_v13 = vpop.f32.mrf.mxu0  ;;  %v5892_v20 = vmul.f32 %v1912_v15, %v5732_v39  ;;  %v622_v15 = vpop.f32.mrf.mxu3 }
  0xe4   : > { %v1986_v33 = vadd.f32 0.0036580483, %v1985_v38  ;;  %v1997_v2 = vadd.f32 0.014752088, %v1996_v61  ;;  %4962 = vset.pattern.permute.xlu2 %v9136_v12  ;;  %v5889_v28 = vadd.f32 %v1702_v8, %v1542_v7  ;;  %v5896_v11 = vmul.f32 %v5515_v23, %v5801_v48  ;;  %v5924_v8 = vld [vmem:[#allocation2 + $0xd9] sm:$0xff] }
  0xe5   : > { %v5900_v42 = vmul.f32 %v5550_v35, %v5803_v43  ;;  %v1879_v10 = vadd.f32 0.112945676, %v1878_v58  ;;  %v1941_v19 = vmul.f32 %v5871_v32, %v5871_v32  ;;  %v573_v39 = vadd.f32 %v5450_v54, %v572_v37  ;;  %1442 = vperm.xlu2 %4962, %v1332_v14   ;;  %v863_v58 = vld [vmem:[#allocation2 + $0xc9] sm:$0xff] }
  0xe6   : > { %v1987_v6 = vmul.f32 %v1986_v33, %v5846_v3  ;;  %v1998_v51 = vmul.f32 %v1997_v2, %v5846_v3  ;;  %v5909_v48 = vmul.f32 0.70710677, %v5879_v53  ;;  %v1870_v29 = vadd.f32 0.18741608, %v1869_v45 }
  0xe7   : > { %v1880_v43 = vmul.f32 %v1879_v10, %v5726_v59  ;;  %v576_v16 = vadd.f32 %v5450_v54, %v575_v13  ;;  %v1933_v4 = vand.u32 2147483647, %v5862_v24  ;;  %674 = vst.msk [vmem:[#allocation2 + $0x60] sm:$0xff] %vm655_vm1, %v573_v39  ;;  %vm1929_vm2 = vweird.f32 %v5862_v24 }
  0xe8   : > { %v1988_v50 = vadd.f32 0.05243302, %v1987_v6  ;;  %v1999_v7 = vadd.f32 0.112945676, %v1998_v51  ;;  %v1935_v37 = vand.u32 2147483648, %v5862_v24  ;;  %v5920_v40 = vmin.f32 %v1941_v19, 16.0 }
  0xe9   : > { %v5002_v41 = vpop.eup %5001  ;;  %v1881_v61 = vadd.f32 0.4994258, %v1880_v43  ;;  %675 = vst.msk [vmem:[#allocation2 + $0x68] sm:$0xff] %vm655_vm1, %v576_v16  ;;  %v623_v45 = vadd.f32 %v5450_v54, %v622_v15  ;;  %v1005_v6 = vmul.f32 %v5555_v36, %v5924_v8  ;;  %v1871_v51 = vmul.f32 %v1870_v29, %v5726_v59  ;;  %v5934_v19 = vld [vmem:[#allocation2 + $0xe9] sm:$0xff] }
  0xea   : > { %v1925_v57 = vmul.f32 %v5002_v41, %v5862_v24  ;;  %v1989_v49 = vmul.f32 %v1988_v50, %v5846_v3  ;;  %v2000_v38 = vmul.f32 %v1999_v7, %v5846_v3  ;;  %vm1930_vm3 = vweird.f32 %v5002_v41 }
  0xeb   : > { %4964 = vset.pattern.permute.xlu1 %v9131_v63  ;;  %v2021_v13 = vmul.f32 %v5909_v48, %v5909_v48  ;;  %v897_v54 = vmul.f32 %v5545_v34, %v863_v58  ;;  %694 = vst.msk [vmem:[#allocation2 + $0x100] sm:$0xff] %vm655_vm1, %v623_v45  ;;  %v1882_v39 = vmul.f32 %v1881_v61, %v5726_v59  ;;  %v1943_v29 = vmul.f32 2.1237322e-06, %v5920_v40  ;;  %vm1931_vm5 = vmor %vm1929_vm2, %vm1930_vm3 }
  0xec   : > { %v1926_v1 = vsub.f32 1.0, %v1925_v57  ;;  %v1990_v33 = vadd.f32 0.18741608, %v1989_v49  ;;  %v2001_v2 = vadd.f32 0.4994258, %v2000_v38  ;;  %1646 = vperm.xlu1 %4964, %v1332_v14   ;;  %v1209_v14 = vmul.f32 %v5585_v62, %v5934_v19 }
  0xed   : > { %v1954_v43 = vmul.f32 3.8918573e-05, %v5920_v40  ;;  %vm1934_vm4 = vcmp.eq.f32.partialorder %v1933_v4, 8.507059e+37  ;;  %v1936_v49 = vor.u32 1.1754944e-38, %v1935_v37  ;;  %v1872_v15 = vadd.f32 1.1283791, %v1871_v51 }
  0xee   : > { %v1927_v10 = vmul.f32 %v5002_v41, %v1926_v1  ;;  %v1991_v50 = vmul.f32 %v1990_v33, %v5846_v3  ;;  %v2002_v7 = vmul.f32 %v2001_v2, %v5846_v3  ;;  %v1101_v3 = vadd.f32 %v1005_v6, %v897_v54  ;;  %v5950_v33 = vpop.permute.xlu0 %1377 }
  0xef   : > { %v5948_v1 = vadd.f32 1.0, %v1882_v39  ;;  %v1944_v61 = vadd.f32 0.00028619796, %v1943_v29  ;;  %v1955_v2 = vadd.f32 0.001143296, %v1954_v43  ;;  %v1798_v4 = vmul.f32 0.5, %v5706_v60 }
  0xf0   : > { %v1928_v16 = vadd.f32 %v5002_v41, %v1927_v10  ;;  %v5943_v57 = vadd.f32 1.0, %v2002_v7  ;;  %v1992_v38 = vadd.f32 1.1283791, %v1991_v50  ;;  %v1305_v58 = vadd.f32 %v1209_v14, %v1101_v3  ;;  %v9138_v50 = vld [vmem:[#allocation17_spill] sm:$0xff] }
  0xf1   : > { %v5954_v6 = vmin.f32 %v2021_v13, 16.0  ;;  %v1020_v51 = vadd.f32 %v5896_v11, %v5876_v55  ;;  %v1052_v60 = vadd.f32 %v5900_v42, %v5885_v47  ;;  %v1945_v7 = vmul.f32 %v1944_v61, %v5920_v40 }
  0xf2   : > { %v1932_v59 = vsel %vm1931_vm5, %v5002_v41, %v1928_v16  ;;  %5003 = vrcp.f32 %v5943_v57  ;;  %v2015_v37 = vand.u32 2147483648, %v5943_v57  ;;  %v718_v41 = vld [vmem:[#allocation2 + $0x5f] sm:$0xff]  ;;  %v5963_v10 = vmul.f32 %v1992_v38, %v5827_v0 }
  0xf3   : > { %v1937_v45 = vsel %vm1934_vm4, %v1936_v49, %v1932_v59  ;;  %5005 = vrcp.f32 %v5948_v1  ;;  %v5968_v13 = vmul.f32 %v5788_v17, %v1305_v58  ;;  %v2013_v11 = vand.u32 2147483647, %v5943_v57  ;;  %v784_v0 = vld [vmem:[#allocation2 + $0x60] sm:$0xff] }
  0xf4   : > { %v1938_v24 = vmul.f32 %v1937_v45, %v5892_v20  ;;  %4965 = vset.pattern.permute.xlu1 %v9136_v12  ;;  %v5971_v20 = vmul.f32 %v1872_v15, %v5671_v9  ;;  %v1956_v54 = vmul.f32 %v1955_v2, %v5920_v40  ;;  %vm2009_vm7 = vweird.f32 %v5943_v57 }
  0xf5   : > { %9137 = vst [vmem:[#allocation22_spill] sm:$0xff] %v5968_v13  ;;  %4002 = vperm.xlu1 %4965, %v9138_v50   ;;  %v1893_v47 = vand.u32 2147483647, %v5948_v1  ;;  %v2023_v17 = vmul.f32 2.1237322e-06, %v5954_v6  ;;  %v1120_v9 = vmul.f32 %v5524_v27, %v718_v41  ;;  %v2016_v39 = vor.u32 1.1754944e-38, %v2015_v37 }
  0xf6   : > { %v4698_v55 = vclamps-f32 %v1938_v24, 1.0  ;;  %v2034_v42 = vmul.f32 3.8918573e-05, %v5954_v6  ;;  %v1946_v43 = vadd.f32 0.0036580483, %v1945_v7  ;;  %vm1889_vm8 = vweird.f32 %v5948_v1  ;;  %v5990_v50 = vpop.permute.xlu0 %1392 }
  0xf7   : > { %v1957_v16 = vadd.f32 0.014752088, %v1956_v54  ;;  %v2024_v49 = vadd.f32 0.00028619796, %v2023_v17  ;;  %v1156_v15 = vmul.f32 %v5574_v21, %v784_v0  ;;  %v1224_v27 = vadd.f32 %v1120_v9, %v1020_v51  ;;  %9139 = vst [vmem:[#allocation17_spill] sm:$0xff] %v5990_v50 }
  0xf8   : > { %v5004_v14 = vpop.eup %5003  ;;  %v3142_v29 = vadd.f32 1.0, %v4698_v55  ;;  %v2035_v38 = vadd.f32 0.001143296, %v2034_v42  ;;  %v1947_v2 = vmul.f32 %v1946_v43, %v5920_v40  ;;  %v1895_v37 = vand.u32 2147483648, %v5948_v1 }
  0xf9   : > { %v2005_v3 = vmul.f32 %v5004_v14, %v5943_v57  ;;  %v5006_v59 = vpop.eup %5005  ;;  %v1958_v45 = vmul.f32 %v1957_v16, %v5920_v40  ;;  %v2025_v41 = vmul.f32 %v2024_v49, %v5954_v6  ;;  %vm2010_vm9 = vweird.f32 %v5004_v14 }
  0xfa   : > { %v3174_v61 = vmul.f32 %v3142_v29, %v1798_v4  ;;  %v1885_v24 = vmul.f32 %v5006_v59, %v5948_v1  ;;  %v1948_v7 = vadd.f32 0.05243302, %v1947_v2  ;;  %v2036_v21 = vmul.f32 %v2035_v38, %v5954_v6  ;;  %v9140_v29 = vld [vmem:[#allocation4_spill] sm:$0xff]  ;;  %vm2011_vm11 = vmor %vm2009_vm7, %vm2010_vm9 }
  0xfb   : > { %v2006_v58 = vsub.f32 1.0, %v2005_v3  ;;  %v1959_v54 = vadd.f32 0.112945676, %v1958_v45  ;;  %v2026_v17 = vadd.f32 0.0036580483, %v2025_v41  ;;  %v1256_v9 = vadd.f32 %v1156_v15, %v1052_v60 }
  0xfc   : > { %v3206_v55 = vpack.c.bf16 %v3174_v61, %v3174_v61  ;;  %v1886_v0 = vsub.f32 1.0, %v1885_v24  ;;  %v2037_v42 = vadd.f32 0.014752088, %v2036_v21  ;;  %v1512_v43 = vmul.f32 %v9140_v29, %v1224_v27  ;;  %v9144_v29 = vld [vmem:[#allocation19_spill] sm:$0xff] }
  0xfd   : > { %v2007_v4 = vmul.f32 %v5004_v14, %v2006_v58  ;;  %1447 = vperm.xlu1 %4965, %v5817_v5   ;;  %v1960_v51 = vmul.f32 %v1959_v54, %v5920_v40  ;;  %vm1890_vm10 = vweird.f32 %v5006_v59  ;;  %v2027_v49 = vmul.f32 %v2026_v17, %v5954_v6 }
  0xfe   : > { %3239 = vst.msk [vmem:[#allocation3 + $0x4] sm:$0xf] %vm3237_vm6, %v3206_v55  ;;  %v1887_v3 = vmul.f32 %v5006_v59, %v1886_v0  ;;  %v1949_v38 = vmul.f32 %v1948_v7, %v5920_v40  ;;  %v2038_v5 = vmul.f32 %v2037_v42, %v5954_v6  ;;  %v6002_v2 = vadd.f32 %v1512_v43, %v1256_v9  ;;  %vm1891_vm13 = vmor %vm1889_vm8, %vm1890_vm10  ;;  %v9143_v9 = vld [vmem:[#allocation18_spill] sm:$0xff] }
  0xff   : > { %v2008_v16 = vadd.f32 %v5004_v14, %v2007_v4  ;;  %v1961_v61 = vadd.f32 0.4994258, %v1960_v51  ;;  %vm2014_vm12 = vcmp.eq.f32.partialorder %v2013_v11, 8.507059e+37  ;;  %v2028_v15 = vadd.f32 0.05243302, %v2027_v49  ;;  %v9142_v51 = vld [vmem:[#allocation16_spill] sm:$0xff] }
 0x100   : > { %v1888_v60 = vadd.f32 %v5006_v59, %v1887_v3  ;;  %v1896_v58 = vor.u32 1.1754944e-38, %v1895_v37  ;;  %v2039_v57 = vadd.f32 0.112945676, %v2038_v5  ;;  %vm1894_vm14 = vcmp.eq.f32.partialorder %v1893_v47, 8.507059e+37  ;;  %v6014_v37 = vpop.permute.xlu0 %1407  ;;  %v6029_v3 = vpop.permute.xlu2 %1674 }
 0x101   : > { %v2012_v45 = vsel %vm2011_vm11, %v5004_v14, %v2008_v16  ;;  %v1962_v24 = vmul.f32 %v1961_v61, %v5920_v40  ;;  %v2029_v7 = vmul.f32 %v2028_v15, %v5954_v6  ;;  %v1950_v21 = vadd.f32 0.18741608, %v1949_v38  ;;  %9141 = vst [vmem:[#allocation4_spill] sm:$0xff] %v6014_v37 }
 0x102   : > { %v2017_v27 = vsel %vm2014_vm12, %v2016_v39, %v2012_v45  ;;  %v1892_v55 = vsel %vm1891_vm13, %v5006_v59, %v1888_v60  ;;  %v2040_v11 = vmul.f32 %v2039_v57, %v5954_v6  ;;  %v6021_v42 = vmul.f32 %v5510_v22, %v9142_v51 }
 0x103   : > { %v2018_v41 = vmul.f32 %v2017_v27, %v5963_v10  ;;  %v1897_v54 = vsel %vm1894_vm14, %v1896_v58, %v1892_v55  ;;  %v6009_v14 = vadd.f32 1.0, %v1962_v24  ;;  %v1800_v10 = vmul.f32 0.5, %v5808_v46  ;;  %v9145_v46 = vld [vmem:[#allocation14_spill] sm:$0xff]  ;;  %v734_v24 = vld [vmem:[#allocation2 + $0xdf] sm:$0xff] }
 0x104   : > { %v1898_v1 = vmul.f32 %v1897_v54, %v5971_v20  ;;  %v2030_v4 = vadd.f32 0.18741608, %v2029_v7  ;;  %v1951_v0 = vmul.f32 %v1950_v21, %v5920_v40  ;;  %v2041_v17 = vadd.f32 0.4994258, %v2040_v11  ;;  %v6059_v54 = vld [vmem:[#allocation2 + $0xef] sm:$0xff]  ;;  %v800_v21 = vld [vmem:[#allocation2 + $0xe0] sm:$0xff] }
 0x105   : > { %v4700_v39 = vclamps-f32 %v2018_v41, 1.0  ;;  %4968 = vset.pattern.permute.xlu1 %v9131_v63  ;;  %5007 = vrcp.f32 %v6009_v14  ;;  %v6025_v20 = vmul.f32 %v5536_v30, %v9143_v9  ;;  %v880_v43 = vmul.f32 %v5545_v34, %v9144_v29 }
 0x106   : > { %v4697_v59 = vclamps-f32 %v1898_v1, 1.0  ;;  %v1797_v49 = vmul.f32 0.5, %v9145_v46  ;;  %v988_v40 = vmul.f32 %v5555_v36, %v5849_v52  ;;  %v6036_v61 = vmul.f32 %v5510_v22, %v5776_v56  ;;  %v717_v46 = vld [vmem:[#allocation2 + $0x57] sm:$0xff] }
 0x107   : > { %v3144_v47 = vadd.f32 1.0, %v4700_v39  ;;  %v6040_v5 = vmul.f32 %v5536_v30, %v5797_v18  ;;  %v2042_v45 = vmul.f32 %v2041_v17, %v5954_v6  ;;  %v6045_v15 = vmul.f32 %v5545_v34, %v5823_v31  ;;  %v625_v17 = vpop.f32.mrf.mxu3 }
 0x108   : > { %v3141_v38 = vadd.f32 1.0, %v4697_v59  ;;  %v2031_v27 = vmul.f32 %v2030_v4, %v5954_v6  ;;  %v6052_v57 = vmul.f32 %v5545_v34, %v5924_v8  ;;  %v6055_v41 = vmul.f32 0.5, %v5860_v26  ;;  %v850_v26 = vld [vmem:[#allocation2 + $0x61] sm:$0xff]  ;;  %v6080_v51 = vpop.permute.xlu0 %1422 }
 0x109   : > { %v3176_v16 = vmul.f32 %v3144_v47, %v1800_v10  ;;  %v1952_v55 = vadd.f32 1.1283791, %v1951_v0  ;;  %v6057_v7 = vadd.f32 1.0, %v2042_v45  ;;  %v6064_v6 = vmul.f32 %v5555_v36, %v5934_v19  ;;  %v6073_v36 = vld [vmem:[#allocation2 + $0xf0] sm:$0xff]  ;;  %9146 = vst [vmem:[#allocation16_spill] sm:$0xff] %v6080_v51 }
 0x10a   : > { %v3173_v58 = vmul.f32 %v3141_v38, %v1797_v49  ;;  %v1973_v34 = vand.u32 2147483647, %v6009_v14  ;;  %v1084_v39 = vadd.f32 %v988_v40, %v880_v43  ;;  %v1975_v1 = vand.u32 2147483648, %v6009_v14  ;;  %v6090_v43 = vld [vmem:[%s9098_s3] ss:$0 sm:$0xff]  ;;  %v6101_v38 = vpop.permute.xlu1 %1482 }
 0x10b   : > { %v3208_v60 = vpack.c.bf16 %v3176_v16, %v3176_v16  ;;  %v6048_v52 = vpop.eup %5007  ;;  %5009 = vrcp.f32 %v6057_v7  ;;  %v768_v10 = vmul.f32 %v5510_v22, %v734_v24  ;;  %v2032_v59 = vadd.f32 1.1283791, %v2031_v27  ;;  %v6084_v22 = vld [vmem:[#allocation2 + $0xff] sm:$0xff] }
 0x10c   : > { %v1965_v11 = vmul.f32 %v6048_v52, %v6009_v14  ;;  %v3205_v8 = vpack.c.bf16 %v3173_v58, %v3173_v58  ;;  %v6076_v4 = vmul.f32 %v5536_v30, %v800_v21  ;;  %v936_v0 = vmul.f32 %v5515_v23, %v6059_v54  ;;  %v1599_v58 = vpop.permute.xlu2 %1598 }
 0x10d   : > { %3241 = vst.msk [vmem:[#allocation3 + $0xc] sm:$0xf] %vm3237_vm6, %v3208_v60  ;;  %v1953_v9 = vmul.f32 %v1952_v55, %v5871_v32  ;;  %vm1969_vm15 = vweird.f32 %v6009_v14  ;;  %v1192_v29 = vmul.f32 %v5585_v62, %v850_v26  ;;  %v626_v30 = vadd.f32 %v6090_v43, %v625_v17  ;;  %v6117_v55 = vld [vmem:[%s9099_s4 + $0x6] ss:$0 sm:$0xff]  ;;  %v6157_v17 = vld [vmem:[%s9099_s4 + $0x5] ss:$0 sm:$0xff] }
 0x10e   : > { %v1966_v47 = vsub.f32 1.0, %v1965_v11  ;;  %3238 = vst.msk [vmem:[#allocation3] sm:$0xf] %vm3237_vm6, %v3205_v8  ;;  %vm1970_vm2 = vweird.f32 %v6048_v52  ;;  %vm6095_vm3 = vcmp.eq.f32.partialorder %v1973_v34, 8.507059e+37  ;;  %v2053_v32 = vand.u32 2147483647, %v6057_v7 }
 0x10f   : > { %v1976_v49 = vor.u32 1.1754944e-38, %v1975_v1  ;;  %v2055_v62 = vand.u32 2147483648, %v6057_v7  ;;  %v6105_v40 = vmul.f32 %v5550_v35, %v6073_v36  ;;  %v1288_v45 = vadd.f32 %v1192_v29, %v1084_v39  ;;  %695 = vst.msk [vmem:[#allocation2 + $0x108] sm:$0xff] %vm655_vm1, %v626_v30  ;;  %vm1971_vm4 = vmor %vm1969_vm15, %vm1970_vm2  ;;  %v849_v11 = vld [vmem:[#allocation2 + $0x59] sm:$0xff]  ;;  %v6131_v34 = vld [vmem:[%s9099_s4 + $0x3] ss:$0 sm:$0xff] }
 0x110   : > { %v1967_v23 = vmul.f32 %v6048_v52, %v1966_v47  ;;  %v6110_v27 = vmul.f32 %v2032_v59, %v5909_v48  ;;  %v6112_v24 = vadd.f32 %v936_v0, %v768_v10  ;;  %v6121_v35 = vmul.f32 %v6117_v55, %v6084_v22  ;;  %v783_v10 = vld [vmem:[#allocation2 + $0x58] sm:$0xff]  ;;  %v6145_v47 = vld [vmem:[%s9099_s4 + $0x4] ss:$0 sm:$0xff] }
 0x111   : > { %v5010_v21 = vpop.eup %5009  ;;  %vm2049_vm5 = vweird.f32 %v6057_v7  ;;  %v1704_v48 = vmul.f32 %v1599_v58, %v1288_v45  ;;  %v915_v8 = vmul.f32 %v6131_v34, %v5776_v56  ;;  %v917_v26 = vmul.f32 %v6131_v34, %v717_v46 }
 0x112   : > { %v1968_v60 = vadd.f32 %v6048_v52, %v1967_v23  ;;  %v2045_v1 = vmul.f32 %v5010_v21, %v6057_v7  ;;  %vm6138_vm7 = vcmp.eq.f32.partialorder %v2053_v32, 8.507059e+37  ;;  %v951_v59 = vmul.f32 %v6145_v47, %v5797_v18  ;;  %v719_v32 = vld [vmem:[#allocation2 + $0x67] sm:$0xff]  ;;  %v6164_v18 = vld [vmem:[%s9099_s4 + $0x2] ss:$0 sm:$0xff] }
 0x113   : > { %v2056_v0 = vor.u32 1.1754944e-38, %v2055_v62  ;;  %v987_v29 = vmul.f32 %v6157_v17, %v5823_v31  ;;  %v989_v16 = vmul.f32 %v6157_v17, %v849_v11  ;;  %vm2050_vm8 = vweird.f32 %v5010_v21  ;;  %v785_v62 = vld [vmem:[#allocation2 + $0x68] sm:$0xff] }
 0x114   : > { %v1972_v39 = vsel %vm1971_vm4, %v6048_v52, %v1968_v60  ;;  %v6152_v52 = vadd.f32 %v1704_v48, %v6002_v2  ;;  %v2046_v23 = vsub.f32 1.0, %v2045_v1  ;;  %v879_v2 = vmul.f32 %v6164_v18, %v5752_v25  ;;  %v3993_v25 = vld [vmem:[%s9095_s0 + $0x140] sm:$0xff]  ;;  %v6176_v1 = vpop.permute.xlu0 %1472  ;;  %vm2051_vm9 = vmor %vm2049_vm5, %vm2050_vm8 }
 0x115   : > { %v1977_v56 = vsel %vm6095_vm3, %v1976_v49, %v1972_v39  ;;  %v577_v49 = vpop.f32.mrf.mxu0  ;;  %v953_v45 = vmul.f32 %v6145_v47, %v783_v10  ;;  %v1019_v31 = vadd.f32 %v915_v8, %v6021_v42  ;;  %v1051_v48 = vadd.f32 %v951_v59, %v6025_v20  ;;  %9151 = vst [vmem:[#allocation18_spill] sm:$0xff] %v6176_v1  ;;  %v9152_v1 = vld [vmem:[#allocation5_spill] sm:$0xff] }
 0x116   : > { %v1978_v30 = vmul.f32 %v1977_v56, %v1953_v9  ;;  %v1021_v9 = vadd.f32 %v917_v26, %v6036_v61  ;;  %v2047_v58 = vmul.f32 %v5010_v21, %v2046_v23  ;;  %v1083_v39 = vadd.f32 %v987_v29, %v879_v2  ;;  %v6186_v61 = vld [vmem:[%s9099_s4 + $0x7] ss:$0 sm:$0xff]  ;;  %3997 = vperm.xlu2 %4962, %v3993_v25   ;;  %v1595_v29 = vpop.permute.xlu1 %1594 }
 0x117   : > { %v6179_v56 = vadd.f32 %v989_v16, %v6045_v15  ;;  %v1119_v44 = vmul.f32 %v6117_v55, %v717_v46  ;;  %v1121_v42 = vmul.f32 %v6117_v55, %v719_v32  ;;  %v1155_v20 = vmul.f32 %v6186_v61, %v783_v10  ;;  %v6193_v15 = vld [vmem:[%s9099_s4 + $0x8] ss:$0 sm:$0xff] }
 0x118   : > { %v4699_v60 = vclamps-f32 %v1978_v30, 1.0  ;;  %v2048_v8 = vadd.f32 %v5010_v21, %v2047_v58  ;;  %v1157_v59 = vmul.f32 %v6186_v61, %v785_v62  ;;  %v1191_v46 = vmul.f32 %v6193_v15, %v849_v11  ;;  %v6202_v62 = vld [vmem:[#allocation2 + $0x100] sm:$0xff] }
 0x119   : > { %v1053_v30 = vadd.f32 %v953_v45, %v6040_v5  ;;  %v1223_v10 = vadd.f32 %v1119_v44, %v1019_v31  ;;  %v1225_v23 = vadd.f32 %v1121_v42, %v1021_v9  ;;  %v578_v32 = vadd.f32 %v6090_v43, %v577_v49 }
 0x11a   : > { %v3143_v26 = vadd.f32 1.0, %v4699_v60  ;;  %v2052_v2 = vsel %vm2051_vm9, %v5010_v21, %v2048_v8  ;;  %v1255_v60 = vadd.f32 %v1155_v20, %v1051_v48  ;;  %v1287_v58 = vadd.f32 %v1191_v46, %v1083_v39  ;;  %v6212_v21 = vpop.permute.xlu2 %1492  ;;  %v733_v48 = vld [vmem:[#allocation2 + $0xd7] sm:$0xff]  ;;  %v6226_v39 = vld [vmem:[#allocation2 + $0xe7] sm:$0xff] }
 0x11b   : > { %v2057_v11 = vsel %vm6138_vm7, %v2056_v0, %v2052_v2  ;;  %v1257_v13 = vadd.f32 %v1157_v59, %v1053_v30  ;;  %v1511_v7 = vmul.f32 %v5950_v33, %v1223_v10  ;;  %v1513_v37 = vmul.f32 %v9152_v1, %v1225_v23  ;;  %676 = vst.msk [vmem:[#allocation2 + $0x70] sm:$0xff] %vm655_vm1, %v578_v32  ;;  %v6233_v1 = vld [vmem:[%s9099_s4] ss:$0 sm:$0xff]  ;;  %v799_v59 = vld [vmem:[#allocation2 + $0xd8] sm:$0xff]  ;;  %v6250_v46 = vld [vmem:[#allocation2 + $0xe8] sm:$0xff] }
 0x11c   : > { %v3175_v16 = vmul.f32 %v3143_v26, %v6055_v41  ;;  %v2058_v44 = vmul.f32 %v2057_v11, %v6110_v27  ;;  %v1072_v41 = vadd.f32 %v6105_v40, %v6076_v4  ;;  %v1703_v49 = vmul.f32 %v1595_v29, %v1287_v58  ;;  %v4909_v27 = vld [vmem:[%s9101_s6 + $0x18] sm:$0xff]  ;;  %v1478_v20 = vpop.permute.xlu0 %1477  ;;  %v4908_v23 = vld [vmem:[%s9101_s6 + $0x10] sm:$0xff]  ;;  %v866_v32 = vld [vmem:[#allocation2 + $0xe1] sm:$0xff] }
 0x11d   : > { %v580_v45 = vpop.f32.mrf.mxu0  ;;  %v1176_v14 = vmul.f32 %v6186_v61, %v6202_v62  ;;  %v1543_v0 = vadd.f32 %v1511_v7, %v1255_v60  ;;  %v6216_v31 = vadd.f32 %v1513_v37, %v1257_v13  ;;  %v1244_v4 = vadd.f32 %v6121_v35, %v6112_v24  ;;  %4369 = vmatpush.bf16.msra.mxu1 %v4909_v27  ;;  %v6248_v26 = vld [vmem:[#allocation2 + $0xf7] sm:$0xff] }
 0x11e   : > { %v3207_v5 = vpack.c.bf16 %v3175_v16, %v3175_v16  ;;  %v581_v33 = vadd.f32 %v6090_v43, %v580_v45  ;;  %v4701_v9 = vclamps-f32 %v2058_v44, 1.0  ;;  %4966 = vset.pattern.permute.xlu2 %v9131_v63  ;;  %v1801_v13 = vmul.f32 0.5, %v5879_v53  ;;  %v6243_v53 = vld [vmem:[%s9100_s5] ss:$0 sm:$0xff]  ;;  %4912 = vmatpush.bf16.msra.mxu2 %v4909_v27  ;;  %v6270_v11 = vld [vmem:[#allocation2 + $0xf8] sm:$0xff] }
 0x11f   : > { %v1735_v40 = vadd.f32 %v1703_v49, %v1543_v0  ;;  %v767_v42 = vmul.f32 %v6233_v1, %v733_v48  ;;  %v935_v24 = vmul.f32 %v6131_v34, %v6226_v39  ;;  %4010 = vperm.xlu2 %4966, %v3993_v25   ;;  %v1103_v35 = vadd.f32 %v6064_v6, %v6052_v57  ;;  %v6255_v57 = vld [vmem:[%s9099_s4 + $0x1] ss:$0 sm:$0xff]  ;;  %v6268_v58 = vld [vmem:[#allocation2 + $0xf9] sm:$0xff]  ;;  %v6274_v44 = vld [vmem:[#allocation2 + $0xf1] sm:$0xff] }
 0x120   : > { %3240 = vst.msk [vmem:[#allocation3 + $0x8] sm:$0xf] %vm3237_vm6, %v3207_v5  ;;  %v3145_v37 = vadd.f32 1.0, %v4701_v9  ;;  %v1276_v63 = vadd.f32 %v1176_v14, %v1072_v41  ;;  %v833_v6 = vmul.f32 %v6255_v57, %v799_v59  ;;  %v971_v30 = vmul.f32 %v6145_v47, %v6250_v46  ;;  %v4882_v14 = vld [vmem:[%s5276_s25 + $0xa0] sm:$0xff] }
 0x121   : > { %677 = vst.msk [vmem:[#allocation2 + $0x78] sm:$0xff] %vm655_vm1, %v581_v33  ;;  %v6246_v8 = vadd.f32 %v6243_v53, %v1735_v40  ;;  %v1039_v10 = vadd.f32 %v935_v24, %v767_v42  ;;  %v1532_v2 = vmul.f32 %v6101_v38, %v1244_v4  ;;  %v1139_v7 = vmul.f32 %v6117_v55, %v6248_v26  ;;  %v6285_v4 = vld [vmem:[#allocation2 + $0x101] sm:$0xff] }
 0x122   : > { %v3177_v25 = vmul.f32 %v3145_v37, %v1801_v13  ;;  %v851_v29 = vld [vmem:[#allocation2 + $0x69] sm:$0xff]  ;;  %v1211_v41 = vmul.f32 %v6193_v15, %v6268_v58  ;;  %v1071_v49 = vadd.f32 %v971_v30, %v833_v6  ;;  %v1175_v38 = vmul.f32 %v6186_v61, %v6270_v11  ;;  %4370 = vmatpush.bf16.msra.mxu1 %v4908_v23  ;;  %v1603_v40 = vpop.permute.xlu2 %1602 }
 0x123   : > { %v6265_v16 = vmul.f32 0.70710677, %v6246_v8  ;;  %v1193_v60 = vmul.f32 %v6193_v15, %v851_v29  ;;  %v1243_v9 = vadd.f32 %v1139_v7, %v1039_v10  ;;  %4913 = vmatpush.bf16.msra.mxu2 %v4908_v23  ;;  %v900_v37 = vmul.f32 %v6164_v18, %v866_v32  ;;  %4696 = vmatmul.msk.bf16.gmra.mxu3 %vm477_vm0, %v4882_v14  ;;  %v1334_v30 = vld [vmem:[%s9095_s0 + $0xa8] sm:$0xff] }
 0x124   : > { %v3209_v5 = vpack.c.bf16 %v3177_v25, %v3177_v25  ;;  %v1307_v48 = vadd.f32 %v1211_v41, %v1103_v35  ;;  %v1275_v13 = vadd.f32 %v1175_v38, %v1071_v49  ;;  %v1008_v42 = vmul.f32 %v6157_v17, %v6274_v44  ;;  %1654 = vperm.xlu1 %4968, %v1334_v30   ;;  %v1679_v7 = vpop.permute.xlu0 %1678  ;;  %v627_v49 = vpop.f32.mrf.mxu3 }
 0x125   : > { %v582_v45 = vpop.f32.mrf.mxu0  ;;  %v2101_v0 = vmul.f32 %v6265_v16, %v6265_v16  ;;  %v1289_v33 = vadd.f32 %v1193_v60, %v6179_v56  ;;  %v4907_v56 = vld [vmem:[%s9101_s6 + $0x8] sm:$0xff]  ;;  %v1531_v25 = vmul.f32 %v1478_v20, %v1243_v9  ;;  %v1212_v6 = vmul.f32 %v6193_v15, %v6285_v4 }
 0x126   : > { %v583_v27 = vadd.f32 %v6090_v43, %v582_v45  ;;  %3242 = vst.msk [vmem:[#allocation3 + $0x10] sm:$0xf] %vm3237_vm6, %v3209_v5  ;;  %v1723_v35 = vmul.f32 %v6029_v3, %v1307_v48  ;;  %v1104_v29 = vadd.f32 %v1008_v42, %v900_v37  ;;  %4371 = vmatpush.bf16.msra.mxu1 %v4907_v56 }
 0x127   : > { %v6294_v24 = vmin.f32 %v2101_v0, 16.0  ;;  %v1705_v59 = vmul.f32 %v1603_v40, %v1289_v33  ;;  %4967 = vset.pattern.permute.xlu2 %v9136_v12  ;;  %v1563_v32 = vadd.f32 %v1531_v25, %v1275_v13  ;;  %v1564_v3 = vadd.f32 %v1532_v2, %v1276_v63  ;;  %v4906_v12 = vld [vmem:[%s9101_s6] sm:$0xff]  ;;  %4914 = vmatpush.bf16.msra.mxu2 %v4907_v56  ;;  %v4885_v13 = vld [vmem:[#allocation3] sm:$0xff] }
 0x128   : > { %678 = vst.msk [vmem:[#allocation2 + $0x80] sm:$0xff] %vm655_vm1, %v583_v27  ;;  %1452 = vperm.xlu2 %4967, %v1334_v30   ;;  %v1308_v60 = vadd.f32 %v1212_v6, %v1104_v29  ;;  %v628_v45 = vadd.f32 %v6090_v43, %v627_v49  ;;  %v901_v29 = vmul.f32 %v6164_v18, %v5934_v19 }
 0x129   : > { %v2103_v10 = vmul.f32 2.1237322e-06, %v6294_v24  ;;  %v2114_v20 = vmul.f32 3.8918573e-05, %v6294_v24  ;;  %v6308_v23 = vadd.f32 %v1705_v59, %v6216_v31  ;;  %v1755_v38 = vadd.f32 %v1723_v35, %v1563_v32 }
 0x12a   : > { %v1724_v14 = vmul.f32 %v1679_v7, %v1308_v60  ;;  %4372 = vmatpush.bf16.msra.mxu1 %v4906_v12  ;;  %696 = vst.msk [vmem:[#allocation2 + $0x110] sm:$0xff] %vm655_vm1, %v628_v45  ;;  %v6337_v6 = vmul.f32 %v6233_v1, %v6059_v54  ;;  %v6341_v30 = vmul.f32 %v6131_v34, %v6084_v22 }
 0x12b   : > { %9153 = vst [vmem:[#allocation19_spill] sm:$0xff] %v6308_v23  ;;  %v2104_v5 = vadd.f32 0.00028619796, %v2103_v10  ;;  %v2115_v41 = vadd.f32 0.001143296, %v2114_v20  ;;  %v6317_v2 = vadd.f32 %v6243_v53, %v1755_v38  ;;  %4915 = vmatpush.bf16.msra.mxu2 %v4906_v12  ;;  %v6344_v10 = vmul.f32 0.5, %v6246_v8 }
 0x12c   : > { %v1756_v9 = vadd.f32 %v1724_v14, %v1564_v3  ;;  %v769_v3 = vmul.f32 %v6233_v1, %v6226_v39  ;;  %v6357_v54 = vadd.f32 %v6243_v53, %v5889_v28  ;;  %v937_v39 = vmul.f32 %v6131_v34, %v6248_v26  ;;  %v1110_v14 = vld [vmem:[#allocation2 + $0x11f] sm:$0xff] }
 0x12d   : > { %v585_v31 = vpop.f32.mrf.mxu0  ;;  %v2105_v0 = vmul.f32 %v2104_v5, %v6294_v24  ;;  %v2116_v63 = vmul.f32 %v2115_v41, %v6294_v24  ;;  %v6322_v48 = vmul.f32 0.70710677, %v6317_v2  ;;  %4839 = vmatmul.msk.bf16.vlgmr.msra.gmra.mxu1 %vm655_vm1, %v4885_v13  ;;  %v835_v41 = vmul.f32 %v6255_v57, %v6250_v46 }
 0x12e   : > { %v586_v33 = vadd.f32 %v6090_v43, %v585_v31  ;;  %v6330_v59 = vadd.f32 %v6243_v53, %v1756_v9  ;;  %v772_v49 = vmul.f32 %v6233_v1, %v6084_v22  ;;  %v838_v38 = vmul.f32 %v6255_v57, %v6202_v62  ;;  %v1146_v31 = vld [vmem:[#allocation2 + $0x120] sm:$0xff] }
 0x12f   : > { %v2106_v27 = vadd.f32 0.0036580483, %v2105_v0  ;;  %v2117_v40 = vadd.f32 0.014752088, %v2116_v63  ;;  %v2901_v56 = vmul.f32 %v6322_v48, %v6322_v48  ;;  %v1144_v63 = vmul.f32 %v6117_v55, %v1110_v14  ;;  %v6375_v9 = vld [vmem:[#allocation2 + $0x107] sm:$0xff] }
 0x130   : > { %679 = vst.msk [vmem:[#allocation2 + $0x88] sm:$0xff] %vm655_vm1, %v586_v33  ;;  %v6353_v19 = vmul.f32 0.70710677, %v6330_v59  ;;  %v973_v22 = vmul.f32 %v6145_v47, %v6270_v11  ;;  %v1009_v13 = vmul.f32 %v6157_v17, %v6268_v58  ;;  %v902_v23 = vmul.f32 %v6164_v18, %v6274_v44 }
 0x131   : > { %v2107_v37 = vmul.f32 %v2106_v27, %v6294_v24  ;;  %v2118_v42 = vmul.f32 %v2117_v40, %v6294_v24  ;;  %v6350_v60 = vmin.f32 %v2901_v56, 16.0  ;;  %v906_v8 = vld [vmem:[#allocation2 + $0x10f] sm:$0xff]  ;;  %v903_v40 = vmul.f32 %v6164_v18, %v6268_v58 }
 0x132   : > { %v6359_v5 = vld [vmem:[#allocation2 + $0x110] sm:$0xff]  ;;  %v940_v28 = vmul.f32 %v6131_v34, %v906_v8  ;;  %v1073_v14 = vadd.f32 %v973_v22, %v835_v41 }
 0x133   : > { %v2108_v25 = vadd.f32 0.05243302, %v2107_v37  ;;  %v2119_v35 = vadd.f32 0.112945676, %v2118_v42  ;;  %v976_v45 = vmul.f32 %v6145_v47, %v6359_v5  ;;  %v977_v33 = vld [vmem:[#allocation2 + $0x109] sm:$0xff]  ;;  %v1181_v42 = vld [vmem:[#allocation2 + $0x119] sm:$0xff] }
 0x134   : > { %v1044_v27 = vadd.f32 %v940_v28, %v772_v49  ;;  %v1011_v37 = vmul.f32 %v6157_v17, %v977_v33  ;;  %v1141_v49 = vmul.f32 %v6117_v55, %v6375_v9  ;;  %v1215_v28 = vmul.f32 %v6193_v15, %v1181_v42  ;;  %v6430_v44 = vld [vmem:[#allocation2 + $0x111] sm:$0xff] }
 0x135   : > { %v2109_v20 = vmul.f32 %v2108_v25, %v6294_v24  ;;  %v2120_v32 = vmul.f32 %v2119_v35, %v6294_v24  ;;  %v1076_v25 = vadd.f32 %v976_v45, %v838_v38  ;;  %v1180_v35 = vmul.f32 %v6186_v61, %v1146_v31 }
 0x136   : > { %v1107_v58 = vadd.f32 %v1011_v37, %v903_v40  ;;  %v2914_v38 = vmul.f32 3.8918573e-05, %v6350_v60  ;;  %v2941_v45 = vmul.f32 %v6353_v19, %v6353_v19  ;;  %v6398_v31 = vmul.f32 0.70710677, %v6357_v54  ;;  %v1488_v40 = vpop.permute.xlu1 %1487 }
 0x137   : > { %v2110_v12 = vadd.f32 0.18741608, %v2109_v20  ;;  %v2121_v7 = vadd.f32 0.4994258, %v2120_v32  ;;  %v1248_v20 = vadd.f32 %v1144_v63, %v1044_v27  ;;  %v1213_v32 = vmul.f32 %v6193_v15, %v977_v33 }
 0x138   : > { %v1142_v63 = vmul.f32 %v6117_v55, %v906_v8  ;;  %v6404_v33 = vadd.f32 %v1180_v35, %v1076_v25  ;;  %v6412_v37 = vadd.f32 %v1215_v28, %v1107_v58  ;;  %v2915_v25 = vadd.f32 0.001143296, %v2914_v38 }
 0x139   : > { %v2111_v0 = vmul.f32 %v2110_v12, %v6294_v24  ;;  %v2122_v46 = vmul.f32 %v2121_v7, %v6294_v24  ;;  %v6388_v12 = vld [vmem:[#allocation2 + $0x108] sm:$0xff]  ;;  %v1041_v7 = vadd.f32 %v937_v39, %v769_v3  ;;  %v1503_v39 = vpop.permute.xlu2 %1502  ;;  %v836_v35 = vmul.f32 %v6255_v57, %v6073_v36 }
 0x13a   : > { %v1177_v41 = vmul.f32 %v6186_v61, %v6388_v12  ;;  %v6410_v27 = vmul.f32 %v1503_v39, %v1248_v20  ;;  %v2916_v28 = vmul.f32 %v2915_v25, %v6350_v60 }
 0x13b   : > { %v2112_v56 = vadd.f32 1.1283791, %v2111_v0  ;;  %v6384_v24 = vadd.f32 1.0, %v2122_v46  ;;  %v1683_v0 = vpop.permute.xlu0 %1682  ;;  %v1105_v46 = vadd.f32 %v1009_v13, %v901_v29  ;;  %v1245_v13 = vadd.f32 %v1141_v49, %v1041_v7 }
 0x13c   : > { %v974_v7 = vmul.f32 %v6145_v47, %v6202_v62  ;;  %v1042_v62 = vadd.f32 %v6341_v30, %v6337_v6 }
 0x13d   : > { %5011 = vrcp.f32 %v6384_v24  ;;  %v6401_v3 = vmul.f32 %v2112_v56, %v6265_v16  ;;  %v2133_v29 = vand.u32 2147483647, %v6384_v24  ;;  %v2135_v22 = vand.u32 2147483648, %v6384_v24 }
 0x13e   : > { %v1277_v16 = vadd.f32 %v1177_v41, %v1073_v14  ;;  %v1309_v42 = vadd.f32 %v1213_v32, %v1105_v46  ;;  %v2903_v56 = vmul.f32 2.1237322e-06, %v6350_v60  ;;  %vm2129_vm10 = vweird.f32 %v6384_v24 }
 0x13f   : > { %v1533_v8 = vmul.f32 %v1488_v40, %v1245_v13  ;;  %v1010_v32 = vmul.f32 %v6157_v17, %v6285_v4  ;;  %vm6425_vm12 = vcmp.eq.f32.partialorder %v2133_v29, 8.507059e+37  ;;  %v1074_v46 = vadd.f32 %v974_v7, %v836_v35 }
 0x140   : > { %v1725_v39 = vmul.f32 %v1683_v0, %v1309_v42  ;;  %v2904_v50 = vadd.f32 0.00028619796, %v2903_v56  ;;  %v6433_v0 = vpop.f32.mrf.mxu3  ;;  %v2917_v29 = vadd.f32 0.014752088, %v2916_v28  ;;  %v1178_v13 = vmul.f32 %v6186_v61, %v6359_v5 }
 0x141   : > { %v1565_v36 = vadd.f32 %v1533_v8, %v1277_v16  ;;  %v1106_v38 = vadd.f32 %v1010_v32, %v902_v23  ;;  %v1214_v42 = vmul.f32 %v6193_v15, %v6430_v44  ;;  %v1246_v56 = vadd.f32 %v1142_v63, %v1042_v62 }
 0x142   : > { %v2905_v14 = vmul.f32 %v2904_v50, %v6350_v60  ;;  %v6441_v8 = vmin.f32 %v2941_v45, 16.0  ;;  %v2918_v23 = vmul.f32 %v2917_v29, %v6350_v60  ;;  %v1278_v30 = vadd.f32 %v1178_v13, %v1074_v46 }
 0x143   : > { %v5012_v20 = vpop.eup %5011  ;;  %v1757_v40 = vadd.f32 %v1725_v39, %v1565_v36  ;;  %v6443_v25 = vpop.permute.xlu0 %1606  ;;  %v1310_v39 = vadd.f32 %v1214_v42, %v1106_v38  ;;  %v1534_v5 = vmul.f32 %v6212_v21, %v1246_v56 }
 0x144   : > { %v2125_v49 = vmul.f32 %v5012_v20, %v6384_v24  ;;  %vm2130_vm11 = vweird.f32 %v5012_v20  ;;  %v2906_v16 = vadd.f32 0.0036580483, %v2905_v14  ;;  %9156 = vst [vmem:[#allocation14_spill] sm:$0xff] %v6443_v25  ;;  %v2943_v7 = vmul.f32 2.1237322e-06, %v6441_v8  ;;  %v1687_v36 = vpop.permute.xlu1 %1686 }
 0x145   : > { %v1793_v6 = vadd.f32 %v6243_v53, %v1757_v40  ;;  %v2919_v45 = vadd.f32 0.112945676, %v2918_v23  ;;  %vm2131_vm13 = vmor %vm2129_vm10, %vm2130_vm11  ;;  %v1566_v14 = vadd.f32 %v1534_v5, %v1278_v30  ;;  %v1726_v62 = vmul.f32 %v1687_v36, %v1310_v39 }
 0x146   : > { %v2126_v41 = vsub.f32 1.0, %v2125_v49  ;;  %v2907_v35 = vmul.f32 %v2906_v16, %v6350_v60  ;;  %v2136_v49 = vor.u32 1.1754944e-38, %v2135_v22  ;;  %v2944_v46 = vadd.f32 0.00028619796, %v2943_v7 }
 0x147   : > { %v6450_v63 = vmul.f32 0.70710677, %v1793_v6  ;;  %v2920_v38 = vmul.f32 %v2919_v45, %v6350_v60  ;;  %v2954_v22 = vmul.f32 3.8918573e-05, %v6441_v8  ;;  %v1758_v13 = vadd.f32 %v1726_v62, %v1566_v14 }
 0x148   : > { %v2127_v50 = vmul.f32 %v5012_v20, %v2126_v41  ;;  %v2908_v28 = vadd.f32 0.05243302, %v2907_v35  ;;  %v2945_v24 = vmul.f32 %v2944_v46, %v6441_v8  ;;  %v632_v35 = vpop.f32.mrf.mxu3 }
 0x149   : > { %v2981_v21 = vmul.f32 %v6450_v63, %v6450_v63  ;;  %v2921_v42 = vadd.f32 0.4994258, %v2920_v38  ;;  %v6471_v30 = vadd.f32 %v6243_v53, %v1758_v13 }
 0x14a   : > { %v2128_v32 = vadd.f32 %v5012_v20, %v2127_v50  ;;  %v2909_v29 = vmul.f32 %v2908_v28, %v6350_v60  ;;  %v6468_v50 = vadd.f32 %v6410_v27, %v6404_v33  ;;  %v2946_v58 = vadd.f32 0.0036580483, %v2945_v24 }
 0x14b   : > { %v6464_v56 = vmin.f32 %v2981_v21, 16.0  ;;  %v2922_v5 = vmul.f32 %v2921_v42, %v6350_v60  ;;  %v1691_v36 = vpop.permute.xlu0 %1690 }
 0x14c   : > { %v2132_v41 = vsel %vm2131_vm13, %v5012_v20, %v2128_v32  ;;  %v2955_v20 = vadd.f32 0.001143296, %v2954_v22  ;;  %v2910_v23 = vadd.f32 0.18741608, %v2909_v29  ;;  %v2947_v33 = vmul.f32 %v2946_v58, %v6441_v8  ;;  %v4886_v29 = vld [vmem:[#allocation3 + $0x8] sm:$0xff] }
 0x14d   : > { %v2137_v40 = vsel %vm6425_vm12, %v2136_v49, %v2132_v41  ;;  %v2983_v7 = vmul.f32 2.1237322e-06, %v6464_v56  ;;  %v6478_v49 = vmul.f32 0.70710677, %v6471_v30  ;;  %v6482_v28 = vadd.f32 1.0, %v2922_v5  ;;  %4840 = vmatmul.msk.bf16.gmra.mxu1 %vm655_vm1, %v4886_v29  ;;  %v6509_v5 = vpop.f32.mrf.mxu0 }
 0x14e   : > { %v2138_v16 = vmul.f32 %v2137_v40, %v6401_v3  ;;  %v2994_v3 = vmul.f32 3.8918573e-05, %v6464_v56  ;;  %v2911_v32 = vmul.f32 %v2910_v23, %v6350_v60  ;;  %v2956_v27 = vmul.f32 %v2955_v20, %v6441_v8 }
 0x14f   : > { %v2984_v14 = vadd.f32 0.00028619796, %v2983_v7  ;;  %v6485_v46 = vmul.f32 %v1691_v36, %v6412_v37  ;;  %v6488_v41 = vmul.f32 0.5, %v6317_v2  ;;  %v2948_v60 = vadd.f32 0.05243302, %v2947_v33 }
 0x150   : > { %v4703_v39 = vclamps-f32 %v2138_v16, 1.0  ;;  %v2995_v62 = vadd.f32 0.001143296, %v2994_v3  ;;  %v2957_v38 = vadd.f32 0.014752088, %v2956_v27  ;;  %v6491_v22 = vmul.f32 0.5, %v1793_v6  ;;  %v6520_v27 = vpop.f32.mrf.mxu3 }
 0x151   : > { %5013 = vrcp.f32 %v6482_v28  ;;  %v3021_v40 = vmul.f32 %v6478_v49, %v6478_v49  ;;  %v2912_v13 = vadd.f32 1.1283791, %v2911_v32  ;;  %v2985_v24 = vmul.f32 %v2984_v14, %v6464_v56 }
 0x152   : > { %v3147_v45 = vadd.f32 1.0, %v4703_v39  ;;  %v2996_v37 = vmul.f32 %v2995_v62, %v6464_v56  ;;  %v6500_v2 = vmul.f32 %v6233_v1, %v6248_v26  ;;  %v631_v6 = vadd.f32 %v6090_v43, %v6433_v0 }
 0x153   : > { %v2949_v42 = vmul.f32 %v2948_v60, %v6441_v8  ;;  %v2935_v20 = vand.u32 2147483648, %v6482_v28  ;;  %v2986_v23 = vadd.f32 0.0036580483, %v2985_v24  ;;  %v2958_v39 = vmul.f32 %v2957_v38, %v6441_v8 }
 0x154   : > { %v3179_v21 = vmul.f32 %v3147_v45, %v6344_v10  ;;  %v2933_v10 = vand.u32 2147483647, %v6482_v28  ;;  %v2997_v58 = vadd.f32 0.014752088, %v2996_v37  ;;  %vm2929_vm14 = vweird.f32 %v6482_v28  ;;  %697 = vst.msk [vmem:[#allocation2 + $0x130] sm:$0xff] %vm655_vm1, %v631_v6 }
 0x155   : > { %v2950_v1 = vadd.f32 0.18741608, %v2949_v42  ;;  %v6513_v26 = vmin.f32 %v3021_v40, 16.0  ;;  %v633_v0 = vadd.f32 %v6090_v43, %v632_v35  ;;  %v2913_v7 = vmul.f32 %v2912_v13, %v6322_v48 }
 0x156   : > { %v3211_v16 = vpack.c.bf16 %v3179_v21, %v3179_v21  ;;  %v2987_v3 = vmul.f32 %v2986_v23, %v6464_v56  ;;  %v2998_v32 = vmul.f32 %v2997_v58, %v6464_v56  ;;  %v2959_v33 = vadd.f32 0.112945676, %v2958_v39 }
 0x157   : > { %v5014_v45 = vpop.eup %5013  ;;  %vm6522_vm15 = vcmp.eq.f32.partialorder %v2933_v10, 8.507059e+37  ;;  %v2951_v14 = vmul.f32 %v2950_v1, %v6441_v8  ;;  %v3023_v35 = vmul.f32 2.1237322e-06, %v6513_v26  ;;  %v3034_v48 = vmul.f32 3.8918573e-05, %v6513_v26  ;;  %698 = vst.msk [vmem:[#allocation2 + $0x138] sm:$0xff] %vm655_vm1, %v633_v0 }
 0x158   : > { %3244 = vst.msk [vmem:[#allocation3 + $0x18] sm:$0xf] %vm3237_vm6, %v3211_v16  ;;  %v2925_v62 = vmul.f32 %v5014_v45, %v6482_v28  ;;  %v2936_v60 = vor.u32 1.1754944e-38, %v2935_v20  ;;  %v2988_v38 = vadd.f32 0.05243302, %v2987_v3  ;;  %vm2930_vm2 = vweird.f32 %v5014_v45  ;;  %v1145_v28 = vld [vmem:[#allocation2 + $0x118] sm:$0xff] }
 0x159   : > { %v2999_v21 = vadd.f32 0.112945676, %v2998_v32  ;;  %v2960_v40 = vmul.f32 %v2959_v33, %v6441_v8  ;;  %v3024_v29 = vadd.f32 0.00028619796, %v3023_v35  ;;  %v3035_v13 = vadd.f32 0.001143296, %v3034_v48  ;;  %vm6543_vm3 = vmor %vm2929_vm14, %vm2930_vm2 }
 0x15a   : > { %v2926_v24 = vsub.f32 1.0, %v2925_v62  ;;  %v2989_v37 = vmul.f32 %v2988_v38, %v6464_v56  ;;  %v2952_v10 = vadd.f32 1.1283791, %v2951_v14  ;;  %v939_v20 = vmul.f32 %v6131_v34, %v6375_v9  ;;  %v1109_v9 = vld [vmem:[#allocation2 + $0x117] sm:$0xff]  ;;  %v6557_v62 = vpop.f32.mrf.mxu0 }
 0x15b   : > { %v3000_v16 = vmul.f32 %v2999_v21, %v6464_v56  ;;  %v2961_v6 = vadd.f32 0.4994258, %v2960_v40  ;;  %v3025_v42 = vmul.f32 %v3024_v29, %v6513_v26  ;;  %v3036_v23 = vmul.f32 %v3035_v13, %v6513_v26  ;;  %v637_v29 = vpop.f32.mrf.mxu3 }
 0x15c   : > { %v2927_v58 = vmul.f32 %v5014_v45, %v2926_v24  ;;  %v2990_v39 = vadd.f32 0.18741608, %v2989_v37  ;;  %v837_v0 = vmul.f32 %v6255_v57, %v6270_v11  ;;  %v975_v34 = vmul.f32 %v6145_v47, %v6388_v12 }
 0x15d   : > { %v3001_v1 = vadd.f32 0.4994258, %v3000_v16  ;;  %v2962_v32 = vmul.f32 %v2961_v6, %v6441_v8  ;;  %v3026_v33 = vadd.f32 0.0036580483, %v3025_v42  ;;  %v3037_v14 = vadd.f32 0.014752088, %v3036_v23 }
 0x15e   : > { %v2928_v35 = vadd.f32 %v5014_v45, %v2927_v58  ;;  %v6552_v57 = vmul.f32 0.5, %v6330_v59  ;;  %v6555_v11 = vmul.f32 %v2952_v10, %v6353_v19  ;;  %v2991_v8 = vmul.f32 %v2990_v39, %v6464_v56 }
 0x15f   : > { %v3002_v48 = vmul.f32 %v3001_v1, %v6464_v56  ;;  %v6560_v38 = vadd.f32 1.0, %v2962_v32  ;;  %v3027_v21 = vmul.f32 %v3026_v33, %v6513_v26  ;;  %v1043_v47 = vadd.f32 %v939_v20, %v6500_v2 }
 0x160   : > { %v2932_v12 = vsel %vm6543_vm3, %v5014_v45, %v2928_v35  ;;  %v3038_v59 = vmul.f32 %v3037_v14, %v6513_v26  ;;  %v1143_v19 = vmul.f32 %v6117_v55, %v1109_v9  ;;  %v1075_v56 = vadd.f32 %v975_v34, %v837_v0 }
 0x161   : > { %v6566_v40 = vadd.f32 1.0, %v3002_v48  ;;  %v2937_v13 = vsel %vm6522_vm15, %v2936_v60, %v2932_v12  ;;  %5015 = vrcp.f32 %v6560_v38  ;;  %v1179_v24 = vmul.f32 %v6186_v61, %v1145_v28 }
 0x162   : > { %v2938_v37 = vmul.f32 %v2937_v13, %v2913_v7  ;;  %v6576_v2 = vmul.f32 0.5, %v6471_v30  ;;  %v2973_v45 = vand.u32 2147483647, %v6560_v38  ;;  %v2992_v16 = vadd.f32 1.1283791, %v2991_v8  ;;  %v1498_v30 = vpop.permute.xlu1 %1497  ;;  %v1182_v8 = vld [vmem:[#allocation2 + $0x121] sm:$0xff] }
 0x163   : > { %5017 = vrcp.f32 %v6566_v40  ;;  %vm3009_vm4 = vweird.f32 %v6566_v40  ;;  %vm2969_vm5 = vweird.f32 %v6560_v38  ;;  %v2975_v55 = vand.u32 2147483648, %v6560_v38 }
 0x164   : > { %v4723_v36 = vclamps-f32 %v2938_v37, 1.0  ;;  %v3028_v60 = vadd.f32 0.05243302, %v3027_v21  ;;  %v3039_v10 = vadd.f32 0.112945676, %v3038_v59  ;;  %v1247_v6 = vadd.f32 %v1143_v19, %v1043_v47  ;;  %v592_v21 = vpop.f32.mrf.mxu0 }
 0x165   : > { %v3013_v61 = vand.u32 2147483647, %v6566_v40  ;;  %v3015_v7 = vand.u32 2147483648, %v6566_v40  ;;  %v6584_v42 = vor.u32 1.1754944e-38, %v2975_v55  ;;  %v1279_v23 = vadd.f32 %v1179_v24, %v1075_v56 }
 0x166   : > { %v3167_v20 = vadd.f32 1.0, %v4723_v36  ;;  %vm6586_vm7 = vcmp.eq.f32.partialorder %v2973_v45, 8.507059e+37  ;;  %v3029_v39 = vmul.f32 %v3028_v60, %v6513_v26  ;;  %v3040_v1 = vmul.f32 %v3039_v10, %v6513_v26 }
 0x167   : > { %v1535_v0 = vmul.f32 %v1498_v30, %v1247_v6  ;;  %v5016_v3 = vpop.eup %5015  ;;  %v636_v32 = vadd.f32 %v6090_v43, %v6520_v27  ;;  %v588_v33 = vadd.f32 %v6090_v43, %v6509_v5  ;;  %v904_v14 = vmul.f32 %v6164_v18, %v6285_v4 }
 0x168   : > { %v1012_v34 = vmul.f32 %v6157_v17, %v6430_v44  ;;  %v3199_v35 = vmul.f32 %v3167_v20, %v6488_v41  ;;  %v2965_v48 = vmul.f32 %v5016_v3, %v6560_v38  ;;  %vm2970_vm8 = vweird.f32 %v5016_v3  ;;  %v640_v41 = vpop.f32.mrf.mxu3 }
 0x169   : > { %v5018_v9 = vpop.eup %5017  ;;  %v3030_v28 = vadd.f32 0.18741608, %v3029_v39  ;;  %v3041_v47 = vadd.f32 0.4994258, %v3040_v1  ;;  %v1567_v5 = vadd.f32 %v1535_v0, %v1279_v23  ;;  %699 = vst.msk [vmem:[#allocation2 + $0x140] sm:$0xff] %vm655_vm1, %v636_v32  ;;  %v1216_v13 = vmul.f32 %v6193_v15, %v1182_v8  ;;  %vm6616_vm10 = vmor %vm2969_vm5, %vm2970_vm8  ;;  %v3270_v32 = vld [vmem:[#allocation2 + $0x127] sm:$0xff] }
 0x16a   : > { %v3005_v27 = vmul.f32 %v5018_v9, %v6566_v40  ;;  %vm3010_vm9 = vweird.f32 %v5018_v9  ;;  %v3231_v18 = vpack.c.bf16 %v3199_v35, %v3199_v35  ;;  %v2966_v4 = vsub.f32 1.0, %v2965_v48  ;;  %680 = vst.msk [vmem:[#allocation2 + $0x90] sm:$0xff] %vm655_vm1, %v588_v33  ;;  %v6661_v0 = vld [vmem:[%s9099_s4] ss:$0 sm:$0xff]  ;;  %v3271_v33 = vld [vmem:[#allocation2 + $0x12f] sm:$0xff] }
 0x16b   : > { %v3031_v17 = vmul.f32 %v3030_v28, %v6513_v26  ;;  %v1108_v44 = vadd.f32 %v1012_v34, %v904_v14  ;;  %v3042_v59 = vmul.f32 %v3041_v47, %v6513_v26  ;;  %v1759_v19 = vadd.f32 %v6485_v46, %v1567_v5  ;;  %vm6628_vm11 = vmor %vm3009_vm4, %vm3010_vm9  ;;  %v6681_v48 = vld [vmem:[%s9099_s4 + $0x1] ss:$0 sm:$0xff] }
 0x16c   : > { %v3006_v12 = vsub.f32 1.0, %v3005_v27  ;;  %3264 = vst.msk [vmem:[#allocation3 + $0x68] sm:$0xf] %vm3237_vm6, %v3231_v18  ;;  %v2967_v56 = vmul.f32 %v5016_v3, %v2966_v4  ;;  %v638_v37 = vadd.f32 %v6090_v43, %v637_v29  ;;  %v591_v45 = vadd.f32 %v6090_v43, %v6557_v62  ;;  %v595_v14 = vpop.f32.mrf.mxu0  ;;  %v6693_v27 = vld [vmem:[%s9099_s4 + $0x2] ss:$0 sm:$0xff] }
 0x16d   : > { %v3032_v24 = vadd.f32 1.1283791, %v3031_v17  ;;  %v6620_v46 = vadd.f32 1.0, %v3042_v59  ;;  %v6623_v15 = vadd.f32 %v6243_v53, %v1759_v19  ;;  %v1312_v26 = vadd.f32 %v1216_v13, %v1108_v44  ;;  %v6705_v44 = vld [vmem:[%s9099_s4 + $0x4] ss:$0 sm:$0xff] }
 0x16e   : > { %v3007_v55 = vmul.f32 %v5018_v9, %v3006_v12  ;;  %v3016_v62 = vor.u32 1.1754944e-38, %v3015_v7  ;;  %v2968_v60 = vadd.f32 %v5016_v3, %v2967_v56  ;;  %700 = vst.msk [vmem:[#allocation2 + $0x148] sm:$0xff] %vm655_vm1, %v638_v37  ;;  %v641_v38 = vadd.f32 %v6090_v43, %v640_v41  ;;  %v6710_v41 = vld [vmem:[%s9099_s4 + $0x5] ss:$0 sm:$0xff]  ;;  %v3288_v12 = vld [vmem:[#allocation2 + $0x128] sm:$0xff]  ;;  %v6721_v37 = vld [vmem:[#allocation2 + $0x130] sm:$0xff] }
 0x16f   : > { %v593_v10 = vadd.f32 %v6090_v43, %v592_v21  ;;  %v2993_v6 = vmul.f32 %v2992_v16, %v6450_v63  ;;  %vm6636_vm12 = vcmp.eq.f32.partialorder %v3013_v61, 8.507059e+37  ;;  %5019 = vrcp.f32 %v6620_v46  ;;  %681 = vst.msk [vmem:[#allocation2 + $0x98] sm:$0xff] %vm655_vm1, %v591_v45  ;;  %v1695_v63 = vpop.permute.xlu1 %1694  ;;  %v6715_v59 = vld [vmem:[%s9098_s3] ss:$0 sm:$0xff]  ;;  %v3306_v45 = vld [vmem:[#allocation2 + $0x129] sm:$0xff] }
 0x170   : > { %v3008_v30 = vadd.f32 %v5018_v9, %v3007_v55  ;;  %v2972_v40 = vsel %vm6616_vm10, %v5016_v3, %v2968_v60  ;;  %v3053_v7 = vand.u32 2147483647, %v6620_v46  ;;  %v3055_v20 = vand.u32 2147483648, %v6620_v46  ;;  %701 = vst.msk [vmem:[#allocation2 + $0x150] sm:$0xff] %vm655_vm1, %v641_v38  ;;  %v6666_v3 = vld [vmem:[%s9099_s4 + $0x3] ss:$0 sm:$0xff]  ;;  %v642_v5 = vpop.f32.mrf.mxu3  ;;  %v6730_v60 = vpop.permute.xlu0 %1614 }
 0x171   : > { %v6647_v43 = vmul.f32 0.70710677, %v6623_v15  ;;  %v2977_v61 = vsel %vm6586_vm7, %v6584_v42, %v2972_v40  ;;  %v6656_v39 = vmul.f32 %v3032_v24, %v6478_v49  ;;  %v1728_v1 = vmul.f32 %v1695_v63, %v1312_v26  ;;  %682 = vst.msk [vmem:[#allocation2 + $0xa0] sm:$0xff] %vm655_vm1, %v593_v10  ;;  %v6745_v63 = vld [vmem:[%s9099_s4 + $0x7] ss:$0 sm:$0xff] }
 0x172   : > { %v3012_v16 = vsel %vm6628_vm11, %v5018_v9, %v3008_v30  ;;  %v2978_v42 = vmul.f32 %v2977_v61, %v6555_v11  ;;  %vm3049_vm13 = vweird.f32 %v6620_v46  ;;  %v6675_v9 = vor.u32 1.1754944e-38, %v3055_v20  ;;  %9171 = vst [vmem:[#allocation5_spill] sm:$0xff] %v6730_v60  ;;  %v6736_v30 = vld [vmem:[%s9099_s4 + $0x6] ss:$0 sm:$0xff] }
 0x173   : > { %v3017_v58 = vsel %vm6636_vm12, %v3016_v62, %v3012_v16  ;;  %v3061_v49 = vmul.f32 %v6647_v43, %v6647_v43  ;;  %v1760_v35 = vadd.f32 %v1728_v1, %v6468_v50  ;;  %v3280_v11 = vmul.f32 %v6661_v0, %v3270_v32  ;;  %v6728_v62 = vld [vmem:[#allocation2 + $0x131] sm:$0xff] }
 0x174   : > { %v3018_v34 = vmul.f32 %v3017_v58, %v2993_v6  ;;  %v4724_v28 = vclamps-f32 %v2978_v42, 1.0  ;;  %vm6684_vm14 = vcmp.eq.f32.partialorder %v3053_v7, 8.507059e+37  ;;  %v6696_v50 = vmul.f32 %v6661_v0, %v3271_v33 }
 0x175   : > { %v6688_v21 = vmin.f32 %v3061_v49, 16.0  ;;  %v3327_v47 = vmul.f32 %v6666_v3, %v3271_v33  ;;  %v5020_v18 = vpop.eup %5019  ;;  %v6700_v17 = vadd.f32 %v6243_v53, %v1760_v35  ;;  %v643_v19 = vadd.f32 %v6715_v59, %v642_v5  ;;  %v6772_v5 = vld [vmem:[#allocation2 + $0x138] sm:$0xff]  ;;  %v6802_v49 = vld [vmem:[%s9100_s5] ss:$0 sm:$0xff] }
 0x176   : > { %v4725_v4 = vclamps-f32 %v3018_v34, 1.0  ;;  %v596_v53 = vadd.f32 %v6715_v59, %v595_v14  ;;  %v3045_v13 = vmul.f32 %v5020_v18, %v6620_v46  ;;  %vm3050_vm15 = vweird.f32 %v5020_v18  ;;  %v6769_v14 = vld [vmem:[#allocation2 + $0x137] sm:$0xff] }
 0x177   : > { %v3168_v56 = vadd.f32 1.0, %v4724_v28  ;;  %v3063_v24 = vmul.f32 2.1237322e-06, %v6688_v21  ;;  %v3074_v36 = vmul.f32 3.8918573e-05, %v6688_v21  ;;  %v3298_v29 = vmul.f32 %v6681_v48, %v3288_v12  ;;  %702 = vst.msk [vmem:[#allocation2 + $0x158] sm:$0xff] %vm655_vm1, %v643_v19  ;;  %vm6762_vm2 = vmor %vm3049_vm13, %vm3050_vm15 }
 0x178   : > { %v3169_v55 = vadd.f32 1.0, %v4725_v4  ;;  %v6725_v26 = vmul.f32 0.70710677, %v6700_v17  ;;  %v3046_v38 = vsub.f32 1.0, %v3045_v13  ;;  %v3316_v23 = vmul.f32 %v6693_v27, %v3306_v45  ;;  %683 = vst.msk [vmem:[#allocation2 + $0xa8] sm:$0xff] %vm655_vm1, %v596_v53  ;;  %v6774_v4 = vld [vmem:[#allocation2 + $0x139] sm:$0xff] }
 0x179   : > { %v3200_v10 = vmul.f32 %v3168_v56, %v6552_v57  ;;  %v3064_v6 = vadd.f32 0.00028619796, %v3063_v24  ;;  %v3075_v7 = vadd.f32 0.001143296, %v3074_v36  ;;  %v3338_v57 = vmul.f32 %v6705_v44, %v6721_v37 }
 0x17a   : > { %v3201_v40 = vmul.f32 %v3169_v55, %v6491_v22  ;;  %v3101_v20 = vmul.f32 %v6725_v26, %v6725_v26  ;;  %v3047_v16 = vmul.f32 %v5020_v18, %v3046_v38  ;;  %v6754_v22 = vld [vmem:[%s9099_s4 + $0x8] ss:$0 sm:$0xff]  ;;  %v3349_v58 = vmul.f32 %v6710_v41, %v6728_v62 }
 0x17b   : > { %v3232_v61 = vpack.c.bf16 %v3200_v10, %v3200_v10  ;;  %v3065_v1 = vmul.f32 %v3064_v6, %v6688_v21  ;;  %v3076_v32 = vmul.f32 %v3075_v7, %v6688_v21  ;;  %v3357_v34 = vadd.f32 %v3327_v47, %v3280_v11 }
 0x17c   : > { %v3233_v42 = vpack.c.bf16 %v3201_v40, %v3201_v40  ;;  %v6767_v33 = vmin.f32 %v3101_v20, 16.0  ;;  %v3048_v35 = vadd.f32 %v5020_v18, %v3047_v16  ;;  %v3365_v46 = vadd.f32 %v3338_v57, %v3298_v29 }
 0x17d   : > { %3265 = vst.msk [vmem:[#allocation3 + $0x6c] sm:$0xf] %vm3237_vm6, %v3232_v61  ;;  %v3066_v28 = vadd.f32 0.0036580483, %v3065_v1  ;;  %v3373_v12 = vadd.f32 %v3349_v58, %v3316_v23  ;;  %v3077_v19 = vadd.f32 0.014752088, %v3076_v32  ;;  %v3384_v13 = vmul.f32 %v6736_v30, %v6769_v14  ;;  %v3504_v1 = vpop.permute.xlu0 %3503 }
 0x17e   : > { %3266 = vst.msk [vmem:[#allocation3 + $0x70] sm:$0xf] %vm3237_vm6, %v3233_v42  ;;  %v3103_v53 = vmul.f32 2.1237322e-06, %v6767_v33  ;;  %v3395_v11 = vmul.f32 %v6745_v63, %v6772_v5  ;;  %v3052_v47 = vsel %vm6762_vm2, %v5020_v18, %v3048_v35  ;;  %v3114_v24 = vmul.f32 3.8918573e-05, %v6767_v33  ;;  %v3449_v18 = vpop.permute.xlu1 %3448 }
 0x17f   : > { %v3067_v56 = vmul.f32 %v3066_v28, %v6688_v21  ;;  %v3406_v45 = vmul.f32 %v6754_v22, %v6774_v4  ;;  %v3057_v55 = vsel %vm6684_vm14, %v6675_v9, %v3052_v47  ;;  %v3078_v36 = vmul.f32 %v3077_v19, %v6688_v21  ;;  %v6809_v47 = vpop.permute.xlu2 %1610 }
 0x180   : > { %v3104_v29 = vadd.f32 0.00028619796, %v3103_v53  ;;  %v3414_v38 = vadd.f32 %v3384_v13, %v3357_v34  ;;  %v3058_v10 = vmul.f32 %v3057_v55, %v6656_v39  ;;  %v3115_v23 = vadd.f32 0.001143296, %v3114_v24  ;;  %9174 = vst [vmem:[#allocation23_spill] sm:$0xff] %v6809_v47 }
 0x181   : > { %v3068_v6 = vadd.f32 0.05243302, %v3067_v56  ;;  %v3422_v40 = vadd.f32 %v3395_v11, %v3365_v46  ;;  %v3079_v7 = vadd.f32 0.112945676, %v3078_v36  ;;  %v3430_v57 = vadd.f32 %v3406_v45, %v3373_v12 }
 0x182   : > { %v3105_v20 = vmul.f32 %v3104_v29, %v6767_v33  ;;  %v3486_v16 = vmul.f32 %v3449_v18, %v3414_v38  ;;  %v4726_v61 = vclamps-f32 %v3058_v10, 1.0  ;;  %v3116_v9 = vmul.f32 %v3115_v23, %v6767_v33 }
 0x183   : > { %v3069_v8 = vmul.f32 %v3068_v6, %v6688_v21  ;;  %v3328_v58 = vmul.f32 %v6666_v3, %v6769_v14  ;;  %v3080_v39 = vmul.f32 %v3079_v7, %v6688_v21  ;;  %v3534_v34 = vmul.f32 %v3504_v1, %v3430_v57  ;;  %v6832_v7 = vld [vmem:[#allocation2 + $0x141] sm:$0xff] }
 0x184   : > { %v3106_v42 = vadd.f32 0.0036580483, %v3105_v20  ;;  %v3494_v32 = vadd.f32 %v3486_v16, %v3422_v40  ;;  %v3170_v35 = vadd.f32 1.0, %v4726_v61  ;;  %v3117_v46 = vadd.f32 0.014752088, %v3116_v9  ;;  %v6838_v1 = vld [vmem:[#allocation2 + $0x13f] sm:$0xff] }
 0x185   : > { %v3070_v28 = vadd.f32 0.18741608, %v3069_v8  ;;  %v3299_v12 = vmul.f32 %v6681_v48, %v6721_v37  ;;  %v3081_v19 = vadd.f32 0.4994258, %v3080_v39  ;;  %v3317_v11 = vmul.f32 %v6693_v27, %v6728_v62 }
 0x186   : > { %v3107_v53 = vmul.f32 %v3106_v42, %v6767_v33  ;;  %v3542_v13 = vadd.f32 %v3534_v34, %v3494_v32  ;;  %v3202_v56 = vmul.f32 %v3170_v35, %v6576_v2  ;;  %v3118_v45 = vmul.f32 %v3117_v46, %v6767_v33  ;;  %v6842_v32 = vld [vmem:[#allocation2 + $0x140] sm:$0xff] }
 0x187   : > { %v3071_v24 = vmul.f32 %v3070_v28, %v6688_v21  ;;  %v3339_v55 = vmul.f32 %v6705_v44, %v6772_v5  ;;  %v3082_v37 = vmul.f32 %v3081_v19, %v6688_v21  ;;  %v3350_v62 = vmul.f32 %v6710_v41, %v6774_v4 }
 0x188   : > { %v3108_v36 = vadd.f32 0.05243302, %v3107_v53  ;;  %v6818_v29 = vadd.f32 %v6802_v49, %v3542_v13  ;;  %v3234_v38 = vpack.c.bf16 %v3202_v56, %v3202_v56  ;;  %v3119_v10 = vadd.f32 0.112945676, %v3118_v45  ;;  %v3454_v56 = vpop.permute.xlu2 %3453 }
 0x189   : > { %v6822_v6 = vadd.f32 1.0, %v3082_v37  ;;  %v2061_v18 = vmul.f32 %v6398_v31, %v6398_v31  ;;  %v3072_v21 = vadd.f32 1.1283791, %v3071_v24  ;;  %v3358_v20 = vadd.f32 %v3328_v58, %v6696_v50 }
 0x18a   : > { %v3109_v2 = vmul.f32 %v3108_v36, %v6767_v33  ;;  %v6826_v23 = vmul.f32 0.70710677, %v6818_v29  ;;  %3267 = vst.msk [vmem:[#allocation3 + $0x74] sm:$0xf] %vm3237_vm6, %v3234_v38  ;;  %v3120_v40 = vmul.f32 %v3119_v10, %v6767_v33  ;;  %v3366_v57 = vadd.f32 %v3339_v55, %v3299_v12 }
 0x18b   : > { %5021 = vrcp.f32 %v6822_v6  ;;  %v3093_v16 = vand.u32 2147483647, %v6822_v6  ;;  %v3095_v61 = vand.u32 2147483648, %v6822_v6  ;;  %v3374_v8 = vadd.f32 %v3350_v62, %v3317_v11 }
 0x18c   : > { %v3110_v9 = vadd.f32 0.18741608, %v3109_v2  ;;  %v3121_v39 = vadd.f32 0.4994258, %v3120_v40  ;;  %v3578_v42 = vmul.f32 %v6826_v23, %v6826_v23  ;;  %v3385_v50 = vmul.f32 %v6736_v30, %v6838_v1 }
 0x18d   : > { %v6847_v58 = vmul.f32 0.5, %v6623_v15  ;;  %v3351_v34 = vmul.f32 %v6710_v41, %v6832_v7  ;;  %v3396_v35 = vmul.f32 %v6745_v63, %v6842_v32  ;;  %v6853_v28 = vmin.f32 %v2061_v18, 16.0  ;;  %v3508_v18 = vpop.permute.xlu1 %3507 }
 0x18e   : > { %v3111_v46 = vmul.f32 %v3110_v9, %v6767_v33  ;;  %v3122_v12 = vmul.f32 %v3121_v39, %v6767_v33  ;;  %v6857_v19 = vmin.f32 %v3578_v42, 16.0  ;;  %v3407_v53 = vmul.f32 %v6754_v22, %v6832_v7 }
 0x18f   : > { %v6862_v15 = vmul.f32 %v3072_v21, %v6647_v43  ;;  %vm3089_vm3 = vweird.f32 %v6822_v6  ;;  %v3096_v13 = vor.u32 1.1754944e-38, %v3095_v61  ;;  %v3415_v11 = vadd.f32 %v3385_v50, %v3358_v20 }
 0x190   : > { %vm6865_vm4 = vcmp.eq.f32.partialorder %v3093_v16, 8.507059e+37  ;;  %v6869_v45 = vadd.f32 1.0, %v3122_v12  ;;  %v3580_v33 = vmul.f32 2.1237322e-06, %v6857_v19  ;;  %v3423_v55 = vadd.f32 %v3396_v35, %v3366_v57  ;;  %v6893_v12 = vld [vmem:[#allocation2 + $0x147] sm:$0xff] }
 0x191   : > { %v3431_v37 = vadd.f32 %v3407_v53, %v3374_v8  ;;  %v5022_v36 = vpop.eup %5021  ;;  %v3112_v62 = vadd.f32 1.1283791, %v3111_v46  ;;  %v3591_v43 = vmul.f32 3.8918573e-05, %v6857_v19  ;;  %v3487_v38 = vmul.f32 %v3454_v56, %v3415_v11 }
 0x192   : > { %v3282_v10 = vmul.f32 %v6661_v0, %v6769_v14  ;;  %v3085_v2 = vmul.f32 %v5022_v36, %v6822_v6  ;;  %5023 = vrcp.f32 %v6869_v45  ;;  %v3300_v21 = vmul.f32 %v6681_v48, %v6772_v5  ;;  %v6884_v14 = vpop.permute.xlu0 %1622  ;;  %v6913_v6 = vld [vmem:[#allocation2 + $0x148] sm:$0xff] }
 0x193   : > { %v3318_v40 = vmul.f32 %v6693_v27, %v6774_v4  ;;  %vm3090_vm5 = vweird.f32 %v5022_v36  ;;  %v3133_v20 = vand.u32 2147483647, %v6869_v45  ;;  %v3581_v57 = vadd.f32 0.00028619796, %v3580_v33  ;;  %9177 = vst [vmem:[#allocation24_spill] sm:$0xff] %v6884_v14  ;;  %v7153_v14 = vld [vmem:[#allocation2 + $0x151] sm:$0xff] }
 0x194   : > { %v3329_v16 = vmul.f32 %v6666_v3, %v6838_v1  ;;  %v3086_v61 = vsub.f32 1.0, %v3085_v2  ;;  %v3592_v8 = vadd.f32 0.001143296, %v3591_v43  ;;  %v3495_v9 = vadd.f32 %v3487_v38, %v3423_v55  ;;  %vm6900_vm8 = vmor %vm3089_vm3, %vm3090_vm5 }
 0x195   : > { %v3535_v39 = vmul.f32 %v3508_v18, %v3431_v37  ;;  %v6887_v42 = vmul.f32 %v3112_v62, %v6725_v26  ;;  %vm3129_vm7 = vweird.f32 %v6869_v45  ;;  %v3135_v5 = vand.u32 2147483648, %v6869_v45 }
 0x196   : > { %v3582_v4 = vmul.f32 %v3581_v57, %v6857_v19  ;;  %v3087_v50 = vmul.f32 %v5022_v36, %v3086_v61  ;;  %v3593_v35 = vmul.f32 %v3592_v8, %v6857_v19  ;;  %v3340_v53 = vmul.f32 %v6705_v44, %v6842_v32  ;;  %v6917_v61 = vld [vmem:[#allocation2 + $0x149] sm:$0xff] }
 0x197   : > { %v3543_v46 = vadd.f32 %v3535_v39, %v3495_v9  ;;  %vm6904_vm9 = vcmp.eq.f32.partialorder %v3133_v20, 8.507059e+37  ;;  %v3359_v33 = vadd.f32 %v3329_v16, %v3282_v10  ;;  %v3375_v55 = vadd.f32 %v3351_v34, %v3318_v40 }
 0x198   : > { %v3583_v56 = vadd.f32 0.0036580483, %v3582_v4  ;;  %v3386_v37 = vmul.f32 %v6736_v30, %v6893_v12  ;;  %v5024_v62 = vpop.eup %5023  ;;  %v3088_v43 = vadd.f32 %v5022_v36, %v3087_v50  ;;  %v3594_v38 = vadd.f32 0.014752088, %v3593_v35 }
 0x199   : > { %v6911_v2 = vadd.f32 %v6802_v49, %v3543_v46  ;;  %v3367_v18 = vadd.f32 %v3340_v53, %v3300_v21  ;;  %v3125_v20 = vmul.f32 %v5024_v62, %v6869_v45  ;;  %vm3130_vm10 = vweird.f32 %v5024_v62  ;;  %v3459_v46 = vpop.permute.xlu1 %3458 }
 0x19a   : > { %v3584_v57 = vmul.f32 %v3583_v56, %v6857_v19  ;;  %v3397_v34 = vmul.f32 %v6745_v63, %v6913_v6  ;;  %v3092_v10 = vsel %vm6900_vm8, %v5022_v36, %v3088_v43  ;;  %v3595_v40 = vmul.f32 %v3594_v38, %v6857_v19  ;;  %vm6938_vm11 = vmor %vm3129_vm7, %vm3130_vm10  ;;  %v3512_v24 = vpop.permute.xlu0 %3511 }
 0x19b   : > { %v6925_v16 = vmul.f32 0.70710677, %v6911_v2  ;;  %v3408_v21 = vmul.f32 %v6754_v22, %v6917_v61  ;;  %v3097_v8 = vsel %vm6865_vm4, %v3096_v13, %v3092_v10  ;;  %v3126_v9 = vsub.f32 1.0, %v3125_v20 }
 0x19c   : > { %v3585_v39 = vadd.f32 0.05243302, %v3584_v57  ;;  %v3416_v4 = vadd.f32 %v3386_v37, %v3359_v33  ;;  %v3098_v50 = vmul.f32 %v3097_v8, %v6862_v15  ;;  %v3596_v35 = vadd.f32 0.112945676, %v3595_v40 }
 0x19d   : > { %v3618_v36 = vmul.f32 %v6925_v16, %v6925_v16  ;;  %v3424_v53 = vadd.f32 %v3397_v34, %v3367_v18  ;;  %v3127_v26 = vmul.f32 %v5024_v62, %v3126_v9  ;;  %v3432_v43 = vadd.f32 %v3408_v21, %v3375_v55 }
 0x19e   : > { %v3586_v56 = vmul.f32 %v3585_v39, %v6857_v19  ;;  %v3488_v38 = vmul.f32 %v3459_v46, %v3416_v4  ;;  %v4727_v47 = vclamps-f32 %v3098_v50, 1.0  ;;  %v3136_v15 = vor.u32 1.1754944e-38, %v3135_v5 }
 0x19f   : > { %v3597_v33 = vmul.f32 %v3596_v35, %v6857_v19  ;;  %v6943_v37 = vmin.f32 %v3618_v36, 16.0  ;;  %v3128_v18 = vadd.f32 %v5024_v62, %v3127_v26  ;;  %v3536_v57 = vmul.f32 %v3512_v24, %v3432_v43 }
 0x1a0   : > { %v3496_v20 = vadd.f32 %v3488_v38, %v3424_v53  ;;  %v2063_v55 = vmul.f32 2.1237322e-06, %v6853_v28  ;;  %v3171_v34 = vadd.f32 1.0, %v4727_v47  ;;  %v3587_v21 = vadd.f32 0.18741608, %v3586_v56 }
 0x1a1   : > { %v3598_v10 = vadd.f32 0.4994258, %v3597_v33  ;;  %v3620_v40 = vmul.f32 2.1237322e-06, %v6943_v37  ;;  %v3132_v45 = vsel %vm6938_vm11, %v5024_v62, %v3128_v18  ;;  %v3631_v5 = vmul.f32 3.8918573e-05, %v6943_v37 }
 0x1a2   : > { %v3203_v8 = vmul.f32 %v3171_v34, %v6847_v58  ;;  %v3137_v9 = vsel %vm6904_vm9, %v3136_v15, %v3132_v45  ;;  %v3544_v35 = vadd.f32 %v3536_v57, %v3496_v20  ;;  %v2064_v62 = vadd.f32 0.00028619796, %v2063_v55 }
 0x1a3   : > { %v3599_v39 = vmul.f32 %v3598_v10, %v6857_v19  ;;  %v3621_v4 = vadd.f32 0.00028619796, %v3620_v40  ;;  %v3138_v50 = vmul.f32 %v3137_v9, %v6887_v42  ;;  %v3632_v47 = vadd.f32 0.001143296, %v3631_v5  ;;  %v5097_v42 = vld [vmem:[%s9100_s5] ss:$0 sm:$0xff] }
 0x1a4   : > { %v3235_v36 = vpack.c.bf16 %v3203_v8, %v3203_v8  ;;  %v1828_v26 = vmul.f32 0.5, %v6700_v17  ;;  %v6959_v11 = vadd.f32 %v6802_v49, %v3544_v35  ;;  %v3588_v43 = vmul.f32 %v3587_v21, %v6857_v19 }
 0x1a5   : > { %v3600_v46 = vadd.f32 1.0, %v3599_v39  ;;  %v3622_v53 = vmul.f32 %v3621_v4, %v6943_v37  ;;  %v4728_v56 = vclamps-f32 %v3138_v50, 1.0  ;;  %v3633_v58 = vmul.f32 %v3632_v47, %v6943_v37 }
 0x1a6   : > { %3268 = vst.msk [vmem:[#allocation3 + $0x78] sm:$0xf] %vm3237_vm6, %v3235_v36  ;;  %v6967_v38 = vadd.f32 %v5097_v42, %v6152_v52  ;;  %v2065_v24 = vmul.f32 %v2064_v62, %v6853_v28  ;;  %v6971_v33 = vmul.f32 0.70710677, %v6959_v11  ;;  %v2074_v18 = vmul.f32 3.8918573e-05, %v6853_v28 }
 0x1a7   : > { %5025 = vrcp.f32 %v3600_v46  ;;  %v3172_v13 = vadd.f32 1.0, %v4728_v56  ;;  %v3623_v17 = vadd.f32 0.0036580483, %v3622_v53  ;;  %v3634_v15 = vadd.f32 0.014752088, %v3633_v58 }
 0x1a8   : > { %v2066_v55 = vadd.f32 0.0036580483, %v2065_v24  ;;  %v3589_v34 = vadd.f32 1.1283791, %v3588_v43  ;;  %v3658_v52 = vmul.f32 %v6971_v33, %v6971_v33  ;;  %v2075_v10 = vadd.f32 0.001143296, %v2074_v18 }
 0x1a9   : > { %v3204_v20 = vmul.f32 %v3172_v13, %v1828_v26  ;;  %v3624_v19 = vmul.f32 %v3623_v17, %v6943_v37  ;;  %v3635_v57 = vmul.f32 %v3634_v15, %v6943_v37  ;;  %v6979_v40 = vmul.f32 0.70710677, %v6967_v38 }
 0x1aa   : > { %v2067_v8 = vmul.f32 %v2066_v55, %v6853_v28  ;;  %v3610_v39 = vand.u32 2147483647, %v3600_v46  ;;  %v3612_v4 = vand.u32 2147483648, %v3600_v46  ;;  %v6982_v50 = vmin.f32 %v3658_v52, 16.0 }
 0x1ab   : > { %v3236_v45 = vpack.c.bf16 %v3204_v20, %v3204_v20  ;;  %v3625_v21 = vadd.f32 0.05243302, %v3624_v19  ;;  %v3636_v5 = vadd.f32 0.112945676, %v3635_v57  ;;  %v2141_v47 = vmul.f32 %v6979_v40, %v6979_v40 }
 0x1ac   : > { %v2076_v62 = vmul.f32 %v2075_v10, %v6853_v28  ;;  %vm3606_vm12 = vweird.f32 %v3600_v46  ;;  %v3660_v26 = vmul.f32 2.1237322e-06, %v6982_v50  ;;  %v3671_v56 = vmul.f32 3.8918573e-05, %v6982_v50 }
 0x1ad   : > { %v5026_v9 = vpop.eup %5025  ;;  %3269 = vst.msk [vmem:[#allocation3 + $0x7c] sm:$0xf] %vm3237_vm6, %v3236_v45  ;;  %v3626_v36 = vmul.f32 %v3625_v21, %v6943_v37  ;;  %v3637_v53 = vmul.f32 %v3636_v5, %v6943_v37  ;;  %v2068_v58 = vadd.f32 0.05243302, %v2067_v8  ;;  %v6992_v13 = vmin.f32 %v2141_v47, 16.0  ;;  %v5099_v47 = vld [vmem:[#allocation2 + $0xd9] sm:$0xff] }
 0x1ae   : > { %v3602_v35 = vmul.f32 %v5026_v9, %v3600_v46  ;;  %vm3607_vm13 = vweird.f32 %v5026_v9  ;;  %v3590_v17 = vmul.f32 %v3589_v34, %v6826_v23  ;;  %v3613_v15 = vor.u32 1.1754944e-38, %v3612_v4  ;;  %v7015_v4 = vld [vmem:[%s9099_s4 + $0x8] ss:$0 sm:$0xff] }
 0x1af   : > { %v3638_v42 = vadd.f32 0.4994258, %v3637_v53  ;;  %v3661_v24 = vadd.f32 0.00028619796, %v3660_v26  ;;  %v3672_v18 = vadd.f32 0.001143296, %v3671_v56  ;;  %vm6997_vm14 = vmor %vm3606_vm12, %vm3607_vm13  ;;  %v2069_v21 = vmul.f32 %v2068_v58, %v6853_v28 }
 0x1b0   : > { %v3603_v43 = vsub.f32 1.0, %v3602_v35  ;;  %v3627_v19 = vadd.f32 0.18741608, %v3626_v36  ;;  %v2077_v55 = vadd.f32 0.014752088, %v2076_v62  ;;  %vm7005_vm15 = vcmp.eq.f32.partialorder %v3610_v39, 8.507059e+37 }
 0x1b1   : > { %v3639_v57 = vmul.f32 %v3638_v42, %v6943_v37  ;;  %v3662_v10 = vmul.f32 %v3661_v24, %v6982_v50  ;;  %v3673_v45 = vmul.f32 %v3672_v18, %v6982_v50  ;;  %v2143_v23 = vmul.f32 2.1237322e-06, %v6992_v13  ;;  %9188 = vst [vmem:[#allocation25_spill] sm:$0xff] %v7015_v4  ;;  %v7023_v39 = vld [vmem:[%s9099_s4 + $0x5] ss:$0 sm:$0xff]  ;;  %v5101_v26 = vld [vmem:[#allocation2 + $0xc9] sm:$0xff] }
 0x1b2   : > { %v3604_v20 = vmul.f32 %v5026_v9, %v3603_v43  ;;  %v2078_v46 = vmul.f32 %v2077_v55, %v6853_v28  ;;  %v7018_v35 = vmul.f32 %v5099_v47, %v7015_v4  ;;  %v7026_v56 = vmul.f32 %v5101_v26, %v7023_v39  ;;  %v7031_v58 = vld [vmem:[%s9099_s4] ss:$0 sm:$0xff]  ;;  %v5103_v43 = vld [vmem:[#allocation2 + $0x57] sm:$0xff] }
 0x1b3   : > { %v7009_v8 = vadd.f32 1.0, %v3639_v57  ;;  %v3663_v36 = vadd.f32 0.0036580483, %v3662_v10  ;;  %v3674_v53 = vadd.f32 0.014752088, %v3673_v45  ;;  %v7034_v42 = vmul.f32 %v5103_v43, %v7031_v58  ;;  %v5105_v45 = vld [vmem:[#allocation2 + $0xdf] sm:$0xff] }
 0x1b4   : > { %v3605_v34 = vadd.f32 %v5026_v9, %v3604_v20  ;;  %9189 = vst [vmem:[#allocation26_spill] sm:$0xff] %v7018_v35  ;;  %v2144_v62 = vadd.f32 0.00028619796, %v2143_v23  ;;  %v3628_v20 = vmul.f32 %v3627_v19, %v6943_v37  ;;  %v2070_v55 = vadd.f32 0.18741608, %v2069_v21 }
 0x1b5   : > { %9190 = vst [vmem:[#allocation27_spill] sm:$0xff] %v7026_v56  ;;  %5027 = vrcp.f32 %v7009_v8  ;;  %v3664_v57 = vmul.f32 %v3663_v36, %v6982_v50  ;;  %v7046_v10 = vld [vmem:[%s9099_s4 + $0x3] ss:$0 sm:$0xff]  ;;  %v3675_v52 = vmul.f32 %v3674_v53, %v6982_v50  ;;  %v7055_v37 = vld [vmem:[%s9099_s4 + $0x4] ss:$0 sm:$0xff]  ;;  %v3562_v47 = vmul.f32 0.5, %v6818_v29 }
 0x1b6   : > { %9191 = vst [vmem:[#allocation28_spill] sm:$0xff] %v7034_v42  ;;  %v3609_v24 = vsel %vm6997_vm14, %v5026_v9, %v3605_v34  ;;  %v7049_v23 = vmul.f32 %v5105_v45, %v7046_v10  ;;  %v2079_v34 = vadd.f32 0.112945676, %v2078_v46  ;;  %v7063_v21 = vld [vmem:[%s9099_s4 + $0x6] ss:$0 sm:$0xff]  ;;  %v2145_v46 = vmul.f32 %v2144_v62, %v6992_v13 }
 0x1b7   : > { %v3614_v18 = vsel %vm7005_vm15, %v3613_v15, %v3609_v24  ;;  %v5107_v15 = vld [vmem:[#allocation2 + $0xe0] sm:$0xff]  ;;  %v7066_v5 = vmul.f32 %v7063_v21, %v5105_v45  ;;  %v3676_v53 = vadd.f32 0.112945676, %v3675_v52  ;;  %v3629_v43 = vadd.f32 1.1283791, %v3628_v20  ;;  %v7078_v20 = vpop.permute.xlu2 %1618 }
 0x1b8   : > { %9192 = vst [vmem:[#allocation29_spill] sm:$0xff] %v7049_v23  ;;  %v3615_v9 = vmul.f32 %v3614_v18, %v3590_v17  ;;  %v7058_v19 = vmul.f32 %v5107_v15, %v7055_v37  ;;  %v3665_v17 = vadd.f32 0.05243302, %v3664_v57  ;;  %v2080_v26 = vmul.f32 %v2079_v34, %v6853_v28 }
 0x1b9   : > { %9194 = vst [vmem:[#allocation31_spill] sm:$0xff] %v7066_v5  ;;  %v2071_v18 = vmul.f32 %v2070_v55, %v6853_v28  ;;  %v2146_v35 = vadd.f32 0.0036580483, %v2145_v46  ;;  %v3677_v45 = vmul.f32 %v3676_v53, %v6982_v50  ;;  %v2154_v57 = vmul.f32 3.8918573e-05, %v6992_v13 }
 0x1ba   : > { %9193 = vst [vmem:[#allocation30_spill] sm:$0xff] %v7058_v19  ;;  %v4729_v36 = vclamps-f32 %v3615_v9, 1.0  ;;  %v3666_v24 = vmul.f32 %v3665_v17, %v6982_v50  ;;  %v2081_v5 = vadd.f32 0.4994258, %v2080_v26  ;;  %vm3646_vm2 = vweird.f32 %v7009_v8 }
 0x1bb   : > { %v5028_v56 = vpop.eup %5027  ;;  %v2147_v9 = vmul.f32 %v2146_v35, %v6992_v13  ;;  %9195 = vst [vmem:[#allocation32_spill] sm:$0xff] %v7078_v20  ;;  %v3652_v55 = vand.u32 2147483648, %v7009_v8  ;;  %v3678_v34 = vadd.f32 0.4994258, %v3677_v45  ;;  %v2072_v53 = vadd.f32 1.1283791, %v2071_v18 }
 0x1bc   : > { %v3898_v19 = vadd.f32 1.0, %v4729_v36  ;;  %v3642_v62 = vmul.f32 %v5028_v56, %v7009_v8  ;;  %v3667_v29 = vadd.f32 0.18741608, %v3666_v24  ;;  %v2082_v17 = vmul.f32 %v2081_v5, %v6853_v28  ;;  %v5109_v35 = vld [vmem:[#allocation2 + $0xef] sm:$0xff]  ;;  %v7093_v28 = vld [vmem:[%s9099_s4 + $0x7] ss:$0 sm:$0xff] }
 0x1bd   : > { %vm3647_vm3 = vweird.f32 %v5028_v56  ;;  %v3650_v36 = vand.u32 2147483647, %v7009_v8  ;;  %v3679_v23 = vmul.f32 %v3678_v34, %v6982_v50  ;;  %v2155_v24 = vadd.f32 0.001143296, %v2154_v57  ;;  %9197 = vst [vmem:[#allocation34_spill] sm:$0xff] %v7093_v28 }
 0x1be   : > { %v3906_v52 = vmul.f32 %v3898_v19, %v3562_v47  ;;  %v3643_v46 = vsub.f32 1.0, %v3642_v62  ;;  %v7084_v42 = vadd.f32 1.0, %v2082_v17  ;;  %v7087_v20 = vmul.f32 %v5109_v35, %v7063_v21  ;;  %vm7102_vm4 = vmor %vm3646_vm2, %vm3647_vm3 }
 0x1bf   : > { %v3668_v47 = vmul.f32 %v3667_v29, %v6982_v50  ;;  %v2148_v45 = vadd.f32 0.05243302, %v2147_v9  ;;  %v7096_v5 = vmul.f32 %v7093_v28, %v5107_v15  ;;  %v3653_v57 = vor.u32 1.1754944e-38, %v3652_v55  ;;  %v3464_v35 = vpop.permute.xlu2 %3463 }
 0x1c0   : > { %v3914_v26 = vpack.c.bf16 %v3906_v52, %v3906_v52  ;;  %9196 = vst [vmem:[#allocation33_spill] sm:$0xff] %v7087_v20  ;;  %v3644_v19 = vmul.f32 %v5028_v56, %v3643_v46  ;;  %v7106_v50 = vadd.f32 1.0, %v3679_v23  ;;  %5029 = vrcp.f32 %v7084_v42 }
 0x1c1   : > { %9198 = vst [vmem:[#allocation35_spill] sm:$0xff] %v7096_v5  ;;  %v3630_v62 = vmul.f32 %v3629_v43, %v6925_v16  ;;  %vm3651_vm5 = vcmp.eq.f32.partialorder %v3650_v36, 8.507059e+37  ;;  %v3330_v15 = vmul.f32 %v6666_v3, %v6893_v12  ;;  %v3563_v9 = vmul.f32 0.5, %v6911_v2  ;;  %v597_v36 = vpop.f32.mrf.mxu0 }
 0x1c2   : > { %3922 = vst.msk [vmem:[#allocation3 + $0x80] sm:$0xf] %vm3237_vm6, %v3914_v26  ;;  %v3645_v29 = vadd.f32 %v5028_v56, %v3644_v19  ;;  %5031 = vrcp.f32 %v7106_v50  ;;  %v7115_v8 = vmul.f32 %v2072_v53, %v6398_v31  ;;  %v2156_v52 = vmul.f32 %v2155_v24, %v6992_v13  ;;  %v645_v31 = vpop.f32.mrf.mxu3 }
 0x1c3   : > { %v3669_v55 = vadd.f32 1.1283791, %v3668_v47  ;;  %v2093_v16 = vand.u32 2147483647, %v7084_v42  ;;  %v7122_v43 = vmul.f32 %v2148_v45, %v6992_v13  ;;  %vm3686_vm7 = vweird.f32 %v7106_v50 }
 0x1c4   : > { %v3649_v23 = vsel %vm7102_vm4, %v5028_v56, %v3645_v29  ;;  %vm2089_vm8 = vweird.f32 %v7084_v42  ;;  %v2095_v2 = vand.u32 2147483648, %v7084_v42  ;;  %v3283_v17 = vmul.f32 %v6661_v0, %v6838_v1 }
 0x1c5   : > { %v3654_v34 = vsel %vm3651_vm5, %v3653_v57, %v3649_v23  ;;  %v646_v56 = vadd.f32 %v6715_v59, %v645_v31  ;;  %v3301_v53 = vmul.f32 %v6681_v48, %v6842_v32  ;;  %v3319_v26 = vmul.f32 %v6693_v27, %v6832_v7  ;;  %v7143_v7 = vld [vmem:[#allocation2 + $0x14f] sm:$0xff] }
 0x1c6   : > { %v3655_v46 = vmul.f32 %v3654_v34, %v3630_v62  ;;  %v5030_v24 = vpop.eup %5029  ;;  %v3690_v19 = vand.u32 2147483647, %v7106_v50  ;;  %v598_v47 = vadd.f32 %v6715_v59, %v597_v36  ;;  %v3341_v45 = vmul.f32 %v6705_v44, %v6913_v6  ;;  %v7145_v62 = vld [vmem:[#allocation2 + $0x150] sm:$0xff] }
 0x1c7   : > { %v3352_v1 = vmul.f32 %v6710_v41, %v6917_v61  ;;  %v3692_v57 = vand.u32 2147483648, %v7106_v50  ;;  %v2085_v32 = vmul.f32 %v5030_v24, %v7084_v42  ;;  %703 = vst.msk [vmem:[#allocation2 + $0x160] sm:$0xff] %vm655_vm1, %v646_v56  ;;  %v3360_v29 = vadd.f32 %v3330_v15, %v3283_v17 }
 0x1c8   : > { %v4730_v18 = vclamps-f32 %v3655_v46, 1.0  ;;  %v5032_v23 = vpop.eup %5031  ;;  %684 = vst.msk [vmem:[#allocation2 + $0xb0] sm:$0xff] %vm655_vm1, %v598_v47  ;;  %v3368_v34 = vadd.f32 %v3341_v45, %v3301_v53  ;;  %v3387_v36 = vmul.f32 %v6736_v30, %v7143_v7  ;;  %v3398_v46 = vmul.f32 %v6745_v63, %v7145_v62 }
 0x1c9   : > { %v3376_v31 = vadd.f32 %v3352_v1, %v3319_v26  ;;  %v3682_v20 = vmul.f32 %v5032_v23, %v7106_v50  ;;  %v2086_v56 = vsub.f32 1.0, %v2085_v32  ;;  %vm2090_vm9 = vweird.f32 %v5030_v24 }
 0x1ca   : > { %v3899_v5 = vadd.f32 1.0, %v4730_v18  ;;  %vm3687_vm10 = vweird.f32 %v5032_v23  ;;  %v3409_v15 = vmul.f32 %v6754_v22, %v7153_v14  ;;  %v3417_v17 = vadd.f32 %v3387_v36, %v3360_v29  ;;  %vm7165_vm12 = vmor %vm2089_vm8, %vm2090_vm9  ;;  %v7180_v36 = vpop.permute.xlu2 %1626  ;;  %v5112_v18 = vld [vmem:[#allocation2 + $0x5f] sm:$0xff] }
 0x1cb   : > { %v3425_v53 = vadd.f32 %v3398_v46, %v3368_v34  ;;  %v3683_v47 = vsub.f32 1.0, %v3682_v20  ;;  %v2087_v45 = vmul.f32 %v5030_v24, %v2086_v56  ;;  %v2157_v1 = vadd.f32 0.014752088, %v2156_v52  ;;  %v3516_v20 = vpop.permute.xlu1 %3515  ;;  %vm7173_vm13 = vmor %vm3686_vm7, %vm3687_vm10  ;;  %v647_v34 = vpop.f32.mrf.mxu3  ;;  %9207 = vst [vmem:[#allocation36_spill] sm:$0xff] %v7180_v36 }
 0x1cc   : > { %v3907_v26 = vmul.f32 %v3899_v5, %v3563_v9  ;;  %v3670_v60 = vmul.f32 %v3669_v55, %v6971_v33  ;;  %vm7158_vm11 = vcmp.eq.f32.partialorder %v2093_v16, 8.507059e+37  ;;  %v3433_v32 = vadd.f32 %v3409_v15, %v3376_v31  ;;  %v7198_v15 = vld [vmem:[#allocation2 + $0x6f] sm:$0xff] }
 0x1cd   : > { %v3489_v25 = vmul.f32 %v3464_v35, %v3417_v17  ;;  %v3684_v51 = vmul.f32 %v5032_v23, %v3683_v47  ;;  %v2088_v28 = vadd.f32 %v5030_v24, %v2087_v45  ;;  %v2158_v5 = vmul.f32 %v2157_v1, %v6992_v13  ;;  %v5111_v17 = vld [vmem:[#allocation2 + $0x4f] sm:$0xff]  ;;  %v7204_v47 = vpop.permute.xlu0 %1630 }
 0x1ce   : > { %v3915_v4 = vpack.c.bf16 %v3907_v26, %v3907_v26  ;;  %v3693_v9 = vor.u32 1.1754944e-38, %v3692_v57  ;;  %v2096_v52 = vor.u32 1.1754944e-38, %v2095_v2  ;;  %v3537_v16 = vmul.f32 %v3516_v20, %v3433_v32  ;;  %9208 = vst [vmem:[#allocation37_spill] sm:$0xff] %v7204_v47 }
 0x1cf   : > { %v3497_v55 = vadd.f32 %v3489_v25, %v3425_v53  ;;  %v3685_v42 = vadd.f32 %v5032_v23, %v3684_v51  ;;  %vm3691_vm14 = vcmp.eq.f32.partialorder %v3690_v19, 8.507059e+37  ;;  %v2092_v35 = vsel %vm7165_vm12, %v5030_v24, %v2088_v28 }
 0x1d0   : > { %3923 = vst.msk [vmem:[#allocation3 + $0x84] sm:$0xf] %vm3237_vm6, %v3915_v4  ;;  %v2159_v31 = vadd.f32 0.112945676, %v2158_v5  ;;  %v1802_v50 = vmul.f32 0.5, %v6357_v54  ;;  %v2097_v46 = vsel %vm7158_vm11, %v2096_v52, %v2092_v35  ;;  %v648_v25 = vadd.f32 %v6715_v59, %v647_v34  ;;  %v600_v54 = vpop.f32.mrf.mxu0  ;;  %v7229_v34 = vld [vmem:[#allocation2 + $0x157] sm:$0xff] }
 0x1d1   : > { %v3545_v57 = vadd.f32 %v3537_v16, %v3497_v55  ;;  %v3689_v4 = vsel %vm7173_vm13, %v5032_v23, %v3685_v42  ;;  %v2098_v51 = vmul.f32 %v2097_v46, %v7115_v8  ;;  %v7190_v2 = vmul.f32 0.5, %v6967_v38  ;;  %v722_v46 = vld [vmem:[#allocation2 + $0x7f] sm:$0xff] }
 0x1d2   : > { %v2160_v28 = vmul.f32 %v2159_v31, %v6992_v13  ;;  %v3694_v24 = vsel %vm3691_vm14, %v3693_v9, %v3689_v4  ;;  %704 = vst.msk [vmem:[#allocation2 + $0x168] sm:$0xff] %vm655_vm1, %v648_v25  ;;  %v2150_v56 = vadd.f32 0.18741608, %v7122_v43  ;;  %v7201_v23 = vmul.f32 %v5111_v17, %v7031_v58 }
 0x1d3   : > { %v7194_v19 = vadd.f32 %v6802_v49, %v3545_v57  ;;  %v3695_v8 = vmul.f32 %v3694_v24, %v3670_v60  ;;  %v4702_v38 = vclamps-f32 %v2098_v51, 1.0  ;;  %v601_v53 = vadd.f32 %v6715_v59, %v600_v54  ;;  %v7239_v57 = vpop.permute.xlu2 %3473 }
 0x1d4   : > { %v2161_v26 = vadd.f32 0.4994258, %v2160_v28  ;;  %v3564_v45 = vmul.f32 0.5, %v6959_v11  ;;  %v752_v43 = vmul.f32 %v5112_v18, %v7031_v58  ;;  %v918_v32 = vmul.f32 %v5112_v18, %v7046_v10 }
 0x1d5   : > { %v7208_v1 = vmul.f32 0.70710677, %v7194_v19  ;;  %v4731_v29 = vclamps-f32 %v3695_v8, 1.0  ;;  %v3146_v20 = vadd.f32 1.0, %v4702_v38  ;;  %685 = vst.msk [vmem:[#allocation2 + $0xb8] sm:$0xff] %vm655_vm1, %v601_v53  ;;  %v920_v59 = vmul.f32 %v7046_v10, %v7198_v15 }
 0x1d6   : > { %v2162_v60 = vmul.f32 %v2161_v26, %v6992_v13  ;;  %v3353_v11 = vmul.f32 %v6710_v41, %v7153_v14  ;;  %v3284_v33 = vmul.f32 %v6661_v0, %v6893_v12  ;;  %v3331_v9 = vmul.f32 %v6666_v3, %v7143_v7 }
 0x1d7   : > { %v3698_v5 = vmul.f32 %v7208_v1, %v7208_v1  ;;  %v3900_v52 = vadd.f32 1.0, %v4731_v29  ;;  %v3178_v55 = vmul.f32 %v3146_v20, %v1802_v50  ;;  %v2151_v16 = vmul.f32 %v2150_v56, %v6992_v13  ;;  %v3469_v56 = vpop.permute.xlu1 %3468 }
 0x1d8   : > { %v7225_v42 = vadd.f32 1.0, %v2162_v60  ;;  %v3302_v41 = vmul.f32 %v6681_v48, %v6913_v6  ;;  %v3320_v31 = vmul.f32 %v6693_v27, %v6917_v61  ;;  %v3342_v0 = vmul.f32 %v6705_v44, %v7145_v62  ;;  %v7243_v48 = vld [vmem:[#allocation2 + $0x158] sm:$0xff] }
 0x1d9   : > { %v7227_v35 = vmin.f32 %v3698_v5, 16.0  ;;  %v3908_v3 = vmul.f32 %v3900_v52, %v3564_v45  ;;  %v3210_v12 = vpack.c.bf16 %v3178_v55, %v3178_v55  ;;  %v3361_v50 = vadd.f32 %v3331_v9, %v3284_v33  ;;  %v7245_v6 = vld [vmem:[#allocation2 + $0x159] sm:$0xff]  ;;  %v3520_v45 = vpop.permute.xlu0 %3519 }
 0x1da   : > { %v3388_v13 = vmul.f32 %v6736_v30, %v7229_v34  ;;  %v3369_v27 = vadd.f32 %v3342_v0, %v3302_v41  ;;  %v3377_v61 = vadd.f32 %v3353_v11, %v3320_v31  ;;  %v3399_v51 = vmul.f32 %v6745_v63, %v7243_v48 }
 0x1db   : > { %v3700_v25 = vmul.f32 2.1237322e-06, %v7227_v35  ;;  %v3711_v4 = vmul.f32 3.8918573e-05, %v7227_v35  ;;  %v3916_v44 = vpack.c.bf16 %v3908_v3, %v3908_v3  ;;  %3243 = vst.msk [vmem:[#allocation3 + $0x14] sm:$0xf] %vm3237_vm6, %v3210_v12  ;;  %v3410_v30 = vmul.f32 %v6754_v22, %v7245_v6 }
 0x1dc   : > { %v3418_v28 = vadd.f32 %v3388_v13, %v3361_v50  ;;  %v2152_v17 = vadd.f32 1.1283791, %v2151_v16  ;;  %5033 = vrcp.f32 %v7225_v42  ;;  %v3426_v8 = vadd.f32 %v3399_v51, %v3369_v27  ;;  %v724_v22 = vld [vmem:[#allocation2 + $0x8f] sm:$0xff]  ;;  %v7273_v13 = vld [vmem:[#allocation2 + $0x9f] sm:$0xff] }
 0x1dd   : > { %v3701_v24 = vadd.f32 0.00028619796, %v3700_v25  ;;  %v3712_v54 = vadd.f32 0.001143296, %v3711_v4  ;;  %3924 = vst.msk [vmem:[#allocation3 + $0x88] sm:$0xf] %vm3237_vm6, %v3916_v44  ;;  %v3434_v38 = vadd.f32 %v3410_v30, %v3377_v61  ;;  %v1124_v26 = vmul.f32 %v7063_v21, %v722_v46 }
 0x1de   : > { %v3490_v53 = vmul.f32 %v3469_v56, %v3418_v28  ;;  %v754_v29 = vmul.f32 %v7031_v58, %v7198_v15  ;;  %v922_v20 = vmul.f32 %v7046_v10, %v722_v46  ;;  %v1024_v5 = vadd.f32 %v920_v59, %v752_v43  ;;  %v7290_v4 = vld [vmem:[%s9099_s4 + $0x1] ss:$0 sm:$0xff]  ;;  %v5114_v27 = vld [vmem:[#allocation2 + $0x50] sm:$0xff] }
 0x1df   : > { %v3702_v63 = vmul.f32 %v3701_v24, %v7227_v35  ;;  %v3713_v18 = vmul.f32 %v3712_v54, %v7227_v35  ;;  %v3538_v11 = vmul.f32 %v3520_v45, %v3434_v38  ;;  %v1122_v33 = vmul.f32 %v7063_v21, %v7198_v15  ;;  %v7300_v30 = vld [vmem:[#allocation2 + $0x60] sm:$0xff] }
 0x1e0   : > { %v3498_v60 = vadd.f32 %v3490_v53, %v3426_v8  ;;  %v7263_v55 = vmul.f32 %v2152_v17, %v6979_v40  ;;  %v756_v16 = vmul.f32 %v7031_v58, %v722_v46  ;;  %v924_v31 = vmul.f32 %v7046_v10, %v724_v22  ;;  %v7309_v24 = vld [vmem:[%s9099_s4 + $0x3] ss:$0 sm:$0xff]  ;;  %v9212_v8 = vld [vmem:[#allocation7_spill] sm:$0xff] }
 0x1e1   : > { %v3703_v9 = vadd.f32 0.0036580483, %v3702_v63  ;;  %v3714_v52 = vadd.f32 0.014752088, %v3713_v18  ;;  %v1022_v0 = vadd.f32 %v918_v32, %v7201_v23  ;;  %v1228_v3 = vadd.f32 %v1124_v26, %v1024_v5  ;;  %v7283_v23 = vld [vmem:[#allocation2 + $0xa0] sm:$0xff]  ;;  %v7345_v5 = vld [vmem:[#allocation2 + $0x70] sm:$0xff] }
 0x1e2   : > { %v3546_v41 = vadd.f32 %v3538_v11, %v3498_v60  ;;  %v7268_v12 = vpop.eup %5033  ;;  %v4887_v50 = vld [vmem:[#allocation3 + $0x10] sm:$0xff]  ;;  %v2175_v59 = vand.u32 2147483648, %v7225_v42  ;;  %v7275_v40 = vadd.f32 %v922_v20, %v754_v29  ;;  %v7278_v46 = vmul.f32 0.5, %v7194_v19  ;;  %v7296_v19 = vpop.permute.xlu2 %1432  ;;  %v7331_v18 = vld [vmem:[#allocation2 + $0x15f] sm:$0xff] }
 0x1e3   : > { %v3704_v43 = vmul.f32 %v3703_v9, %v7227_v35  ;;  %v3715_v15 = vmul.f32 %v3714_v52, %v7227_v35  ;;  %v7285_v32 = vadd.f32 %v1122_v33, %v1022_v0  ;;  %v7293_v61 = vmul.f32 %v5114_v27, %v7290_v4  ;;  %4841 = vmatmul.msk.bf16.gmra.mxu1 %vm655_vm1, %v4887_v50  ;;  %v7347_v33 = vld [vmem:[#allocation2 + $0x80] sm:$0xff]  ;;  %v3335_v27 = vld [vmem:[#allocation2 + $0x168] sm:$0xff] }
 0x1e4   : > { %9209 = vst [vmem:[#allocation38_spill] sm:$0xff] %v7275_v40  ;;  %v7281_v25 = vadd.f32 %v6802_v49, %v3546_v41  ;;  %v2165_v51 = vmul.f32 %v7268_v12, %v7225_v42  ;;  %v7304_v28 = vmul.f32 %v7300_v30, %v7290_v4  ;;  %v7313_v54 = vmul.f32 %v7309_v24, %v7229_v34  ;;  %v7349_v41 = vld [vmem:[#allocation2 + $0x160] sm:$0xff] }
 0x1e5   : > { %9210 = vst [vmem:[#allocation39_spill] sm:$0xff] %v7285_v32  ;;  %v3705_v44 = vadd.f32 0.05243302, %v3704_v43  ;;  %v3716_v49 = vadd.f32 0.112945676, %v3715_v15  ;;  %v7318_v17 = vmul.f32 %v7031_v58, %v7273_v13  ;;  %v7321_v38 = vmul.f32 %v9212_v8, %v1228_v3  ;;  %v3324_v15 = vld [vmem:[#allocation2 + $0x167] sm:$0xff] }
 0x1e6   : > { %9211 = vst [vmem:[#allocation40_spill] sm:$0xff] %v7296_v19  ;;  %v2173_v56 = vand.u32 2147483647, %v7225_v42  ;;  %v7325_v45 = vor.u32 1.1754944e-38, %v2175_v59  ;;  %v7329_v63 = vmul.f32 %v7290_v4, %v7283_v23  ;;  %v7334_v29 = vmul.f32 0.70710677, %v7281_v25 }
 0x1e7   : > { %9213 = vst [vmem:[#allocation7_spill] sm:$0xff] %v7321_v38  ;;  %v3706_v53 = vmul.f32 %v3705_v44, %v7227_v35  ;;  %v3717_v26 = vmul.f32 %v3716_v49, %v7227_v35  ;;  %v7338_v20 = vmul.f32 %v7046_v10, %v7273_v13  ;;  %v7340_v60 = vadd.f32 %v924_v31, %v756_v16  ;;  %v5117_v16 = vld [vmem:[%s9099_s4] ss:$0 sm:$0xff]  ;;  %v5118_v50 = vld [vmem:[%s9099_s4 + $0x1] ss:$0 sm:$0xff]  ;;  %v7395_v19 = vld [vmem:[#allocation2 + $0x71] sm:$0xff] }
 0x1e8   : > { %v7343_v11 = vmul.f32 %v7063_v21, %v724_v22  ;;  %v2166_v0 = vsub.f32 1.0, %v2165_v51  ;;  %vm2169_vm15 = vweird.f32 %v7225_v42  ;;  %v7353_v3 = vmul.f32 %v7031_v58, %v724_v22  ;;  %v5119_v58 = vld [vmem:[%s9099_s4 + $0x4] ss:$0 sm:$0xff]  ;;  %v7374_v49 = vld [vmem:[%s9099_s4 + $0x6] ss:$0 sm:$0xff] }
 0x1e9   : > { %9214 = vst [vmem:[#allocation41_spill] sm:$0xff] %v7338_v20  ;;  %v3707_v9 = vadd.f32 0.18741608, %v3706_v53  ;;  %v3718_v52 = vadd.f32 0.4994258, %v3717_v26  ;;  %v3286_v31 = vmul.f32 %v5117_v16, %v7229_v34  ;;  %v3304_v43 = vmul.f32 %v5118_v50, %v7243_v48  ;;  %v7413_v20 = vld [vmem:[#allocation2 + $0x61] sm:$0xff] }
 0x1ea   : > { %9215 = vst [vmem:[#allocation42_spill] sm:$0xff] %v7343_v11  ;;  %v3333_v59 = vmul.f32 %v7309_v24, %v7331_v18  ;;  %v3344_v22 = vmul.f32 %v5119_v58, %v7349_v41  ;;  %v3390_v51 = vmul.f32 %v7374_v49, %v3324_v15  ;;  %v7380_v8 = vld [vmem:[%s9099_s4 + $0x7] ss:$0 sm:$0xff]  ;;  %vm7383_vm2 = vcmp.eq.f32.partialorder %v2173_v56, 8.507059e+37  ;;  %v7406_v32 = vld [vmem:[%s9099_s4 + $0x2] ss:$0 sm:$0xff]  ;;  %v3479_v40 = vpop.permute.xlu2 %3478 }
 0x1eb   : > { %9216 = vst [vmem:[#allocation43_spill] sm:$0xff] %v7353_v3  ;;  %v3708_v44 = vmul.f32 %v3707_v9, %v7227_v35  ;;  %v3719_v34 = vmul.f32 %v3718_v52, %v7227_v35  ;;  %v3401_v53 = vmul.f32 %v7380_v8, %v3335_v27  ;;  %v7389_v52 = vmul.f32 %v7290_v4, %v7345_v5  ;;  %v5123_v11 = vld [vmem:[#allocation2 + $0x51] sm:$0xff]  ;;  %v602_v3 = vpop.f32.mrf.mxu0 }
 0x1ec   : > { %v3363_v9 = vadd.f32 %v3333_v59, %v3286_v31  ;;  %v3371_v35 = vadd.f32 %v3344_v22, %v3304_v43  ;;  %v7393_v36 = vmul.f32 %v7290_v4, %v7347_v33  ;;  %v3738_v56 = vmul.f32 %v7334_v29, %v7334_v29  ;;  %v3381_v22 = vld [vmem:[#allocation2 + $0x16f] sm:$0xff] }
 0x1ed   : > { %9219 = vst [vmem:[#allocation44_spill] sm:$0xff] %v7389_v52  ;;  %v7397_v47 = vadd.f32 1.0, %v3719_v34  ;;  %v2167_v38 = vmul.f32 %v7268_v12, %v2166_v0  ;;  %vm2170_vm3 = vweird.f32 %v7268_v12  ;;  %v3709_v31 = vadd.f32 1.1283791, %v3708_v44 }
 0x1ee   : > { %9220 = vst [vmem:[#allocation45_spill] sm:$0xff] %v7393_v36  ;;  %v3420_v43 = vadd.f32 %v3390_v51, %v3363_v9  ;;  %v3428_v59 = vadd.f32 %v3401_v53, %v3371_v35  ;;  %v7409_v34 = vmul.f32 %v5123_v11, %v7406_v32  ;;  %v3285_v0 = vmul.f32 %v5117_v16, %v7143_v7  ;;  %vm2171_vm5 = vmor %vm2169_vm15, %vm2170_vm3 }
 0x1ef   : > { %5035 = vrcp.f32 %v7397_v47  ;;  %v7417_v44 = vmul.f32 %v7413_v20, %v7406_v32  ;;  %v7421_v51 = vmul.f32 %v7406_v32, %v7395_v19  ;;  %v3287_v9 = vmul.f32 %v5117_v16, %v7331_v18 }
 0x1f0   : > { %v3492_v53 = vmul.f32 %v3479_v40, %v3420_v43  ;;  %v7425_v11 = vmul.f32 %v5118_v50, %v7349_v41  ;;  %v3334_v35 = vmul.f32 %v7309_v24, %v3324_v15  ;;  %v7428_v7 = vmul.f32 %v5119_v58, %v3335_v27  ;;  %v7461_v43 = vld [vmem:[%s9099_s4 + $0x2] ss:$0 sm:$0xff] }
 0x1f1   : > { %9221 = vst [vmem:[#allocation46_spill] sm:$0xff] %v7417_v44  ;;  %v7431_v36 = vmul.f32 %v7374_v49, %v3381_v22  ;;  %v7433_v52 = vmin.f32 %v3738_v56, 16.0  ;;  %v2168_v44 = vadd.f32 %v7268_v12, %v2167_v38  ;;  %vm3726_vm4 = vweird.f32 %v7397_v47 }
 0x1f2   : > { %9222 = vst [vmem:[#allocation47_spill] sm:$0xff] %v7421_v51  ;;  %v7437_v51 = vmul.f32 %v3709_v31, %v7208_v1  ;;  %v3730_v40 = vand.u32 2147483647, %v7397_v47  ;;  %v7441_v16 = vadd.f32 %v3492_v53, %v3428_v59  ;;  %v5125_v1 = vld [vmem:[%s9098_s3] ss:$0 sm:$0xff]  ;;  %v3732_v56 = vand.u32 2147483648, %v7397_v47 }
 0x1f3   : > { %v3740_v24 = vmul.f32 2.1237322e-06, %v7433_v52  ;;  %v3751_v15 = vmul.f32 3.8918573e-05, %v7433_v52  ;;  %v2172_v38 = vsel %vm2171_vm5, %v7268_v12, %v2168_v44  ;;  %v603_v27 = vadd.f32 %v5125_v1, %v602_v3 }
 0x1f4   : > { %9223 = vst [vmem:[#allocation48_spill] sm:$0xff] %v7441_v16  ;;  %v2177_v31 = vsel %vm7383_vm2, %v7325_v45, %v2172_v38  ;;  %v3303_v42 = vmul.f32 %v5118_v50, %v7145_v62  ;;  %v3321_v12 = vmul.f32 %v7461_v43, %v7153_v14  ;;  %v3343_v26 = vmul.f32 %v5119_v58, %v7243_v48  ;;  %v7472_v50 = vld [vmem:[%s9099_s4 + $0x5] ss:$0 sm:$0xff]  ;;  %v7479_v58 = vpop.permute.xlu0 %1634 }
 0x1f5   : > { %v5036_v59 = vpop.eup %5035  ;;  %v3741_v22 = vadd.f32 0.00028619796, %v3740_v24  ;;  %v3752_v44 = vadd.f32 0.001143296, %v3751_v15  ;;  %v2178_v3 = vmul.f32 %v2177_v31, %v7263_v55  ;;  %686 = vst.msk [vmem:[#allocation2 + $0xc0] sm:$0xff] %vm655_vm1, %v603_v27  ;;  %v3364_v62 = vadd.f32 %v3334_v35, %v3287_v9  ;;  %v3313_v15 = vld [vmem:[#allocation2 + $0x161] sm:$0xff] }
 0x1f6   : > { %v3722_v45 = vmul.f32 %v5036_v59, %v7397_v47  ;;  %vm3727_vm7 = vweird.f32 %v5036_v59  ;;  %v3354_v14 = vmul.f32 %v7472_v50, %v7245_v6  ;;  %v3362_v48 = vadd.f32 %v7313_v54, %v3285_v0  ;;  %v5128_v54 = vld [vmem:[%s9099_s4 + $0x8] ss:$0 sm:$0xff] }
 0x1f7   : > { %v3742_v53 = vmul.f32 %v3741_v22, %v7433_v52  ;;  %v3753_v55 = vmul.f32 %v3752_v44, %v7433_v52  ;;  %v4704_v24 = vclamps-f32 %v2178_v3, 1.0  ;;  %v3370_v9 = vadd.f32 %v3343_v26, %v3303_v42  ;;  %v3392_v3 = vld [vmem:[#allocation2 + $0x170] sm:$0xff]  ;;  %vm7491_vm8 = vmor %vm3726_vm4, %vm3727_vm7  ;;  %v3524_v42 = vpop.permute.xlu1 %3523 }
 0x1f8   : > { %v3723_v38 = vsub.f32 1.0, %v3722_v45  ;;  %v3378_v35 = vadd.f32 %v3354_v14, %v3321_v12  ;;  %v3389_v1 = vmul.f32 %v7374_v49, %v7331_v18  ;;  %v3400_v6 = vmul.f32 %v7380_v8, %v7349_v41  ;;  %v7527_v18 = vld [vmem:[#allocation2 + $0xb0] sm:$0xff] }
 0x1f9   : > { %v3743_v27 = vadd.f32 0.0036580483, %v3742_v53  ;;  %v3754_v31 = vadd.f32 0.014752088, %v3753_v55  ;;  %v3148_v16 = vadd.f32 1.0, %v4704_v24  ;;  %v3733_v44 = vor.u32 1.1754944e-38, %v3732_v56 }
 0x1fa   : > { %v3724_v22 = vmul.f32 %v5036_v59, %v3723_v38  ;;  %v3411_v0 = vmul.f32 %v5128_v54, %v3313_v15  ;;  %v3419_v45 = vadd.f32 %v3389_v1, %v3362_v48  ;;  %v3427_v12 = vadd.f32 %v3400_v6, %v3370_v9  ;;  %v7513_v6 = vld [vmem:[#allocation2 + $0xaf] sm:$0xff] }
 0x1fb   : > { %v3744_v49 = vmul.f32 %v3743_v27, %v7433_v52  ;;  %v3755_v41 = vmul.f32 %v3754_v31, %v7433_v52  ;;  %v3180_v56 = vmul.f32 %v3148_v16, %v7190_v2  ;;  %vm3731_vm9 = vcmp.eq.f32.partialorder %v3730_v40, 8.507059e+37 }
 0x1fc   : > { %v3725_v26 = vadd.f32 %v5036_v59, %v3724_v22  ;;  %v3435_v14 = vadd.f32 %v3411_v0, %v3378_v35  ;;  %v3491_v53 = vmul.f32 %v7239_v57, %v3419_v45  ;;  %v3402_v55 = vmul.f32 %v7380_v8, %v3392_v3  ;;  %v3346_v3 = vld [vmem:[#allocation2 + $0x169] sm:$0xff]  ;;  %v5129_v0 = vld [vmem:[%s9100_s5] ss:$0 sm:$0xff] }
 0x1fd   : > { %v3745_v47 = vadd.f32 0.05243302, %v3744_v49  ;;  %v3756_v24 = vadd.f32 0.112945676, %v3755_v41  ;;  %v3212_v48 = vpack.c.bf16 %v3180_v56, %v3180_v56  ;;  %v3372_v1 = vadd.f32 %v7428_v7, %v7425_v11 }
 0x1fe   : > { %v3729_v38 = vsel %vm7491_vm8, %v5036_v59, %v3725_v26  ;;  %v3499_v27 = vadd.f32 %v3491_v53, %v3427_v12  ;;  %v3539_v2 = vmul.f32 %v3524_v42, %v3435_v14  ;;  %v3421_v9 = vadd.f32 %v7431_v36, %v3364_v62 }
 0x1ff   : > { %v3734_v16 = vsel %vm3731_vm9, %v3733_v44, %v3729_v38  ;;  %v3746_v40 = vmul.f32 %v3745_v47, %v7433_v52  ;;  %v3757_v57 = vmul.f32 %v3756_v24, %v7433_v52  ;;  %3245 = vst.msk [vmem:[#allocation3 + $0x1c] sm:$0xf] %vm3237_vm6, %v3212_v48  ;;  %v954_v59 = vmul.f32 %v7300_v30, %v7055_v37  ;;  %v3403_v30 = vld [vmem:[#allocation2 + $0x171] sm:$0xff] }
 0x200   : > { %v3735_v8 = vmul.f32 %v3734_v16, %v7437_v51  ;;  %v3547_v35 = vadd.f32 %v3539_v2, %v3499_v27  ;;  %v956_v11 = vmul.f32 %v7055_v37, %v7345_v5  ;;  %v990_v36 = vmul.f32 %v7413_v20, %v7023_v39  ;;  %v3484_v51 = vpop.permute.xlu0 %3483  ;;  %v7565_v16 = vld [vmem:[#allocation2 + $0x81] sm:$0xff] }
 0x201   : > { %v3747_v7 = vadd.f32 0.18741608, %v3746_v40  ;;  %v3758_v31 = vadd.f32 0.4994258, %v3757_v57  ;;  %v7519_v62 = vmul.f32 %v7023_v39, %v7395_v19  ;;  %v3323_v44 = vmul.f32 %v7461_v43, %v3313_v15  ;;  %v9226_v57 = vld [vmem:[#allocation34_spill] sm:$0xff] }
 0x202   : > { %v4732_v22 = vclamps-f32 %v3735_v8, 1.0  ;;  %v7525_v45 = vadd.f32 %v5129_v0, %v3547_v35  ;;  %v1128_v20 = vmul.f32 %v7063_v21, %v7273_v13  ;;  %v3429_v49 = vadd.f32 %v3402_v55, %v3372_v1 }
 0x203   : > { %v3493_v41 = vmul.f32 %v3484_v51, %v3421_v9  ;;  %v3759_v56 = vmul.f32 %v3758_v31, %v7433_v52  ;;  %v3356_v42 = vmul.f32 %v7472_v50, %v3346_v3  ;;  %v3413_v15 = vmul.f32 %v5128_v54, %v3403_v30  ;;  %v3532_v50 = vpop.permute.xlu2 %3531 }
 0x204   : > { %v3901_v43 = vadd.f32 1.0, %v4732_v22  ;;  %v7534_v12 = vmul.f32 0.70710677, %v7525_v45  ;;  %v928_v26 = vmul.f32 %v7046_v10, %v7513_v6  ;;  %v3748_v14 = vmul.f32 %v3747_v7, %v7433_v52  ;;  %v7554_v52 = vld [vmem:[#allocation2 + $0x90] sm:$0xff]  ;;  %v9227_v7 = vld [vmem:[#allocation16_spill] sm:$0xff] }
 0x205   : > { %v7539_v53 = vadd.f32 1.0, %v3759_v56  ;;  %v3380_v47 = vadd.f32 %v3356_v42, %v3323_v44  ;;  %v964_v13 = vmul.f32 %v7055_v37, %v7527_v18  ;;  %v1232_v48 = vadd.f32 %v1128_v20, %v7340_v60 }
 0x206   : > { %v3909_v55 = vmul.f32 %v3901_v43, %v7278_v46  ;;  %v4888_v24 = vld [vmem:[#allocation3 + $0x18] sm:$0xff]  ;;  %v3778_v54 = vmul.f32 %v7534_v12, %v7534_v12  ;;  %v7548_v38 = vadd.f32 %v954_v59, %v7293_v61  ;;  %v7551_v10 = vmul.f32 0.5, %v7281_v25  ;;  %v7577_v59 = vld [vmem:[#allocation2 + $0xbf] sm:$0xff] }
 0x207   : > { %5037 = vrcp.f32 %v7539_v53  ;;  %v7557_v1 = vadd.f32 %v956_v11, %v7304_v28  ;;  %v7560_v46 = vadd.f32 %v990_v36, %v7409_v34  ;;  %v3501_v2 = vadd.f32 %v3493_v41, %v3429_v49  ;;  %4842 = vmatmul.msk.bf16.gmra.mxu1 %vm655_vm1, %v4888_v24  ;;  %v7567_v25 = vld [vmem:[#allocation2 + $0x91] sm:$0xff]  ;;  %v7579_v11 = vld [vmem:[#allocation2 + $0xc0] sm:$0xff] }
 0x208   : > { %v3917_v27 = vpack.c.bf16 %v3909_v55, %v3909_v55  ;;  %v3437_v60 = vadd.f32 %v3413_v15, %v3380_v47  ;;  %v7563_v61 = vmin.f32 %v3778_v54, 16.0  ;;  %v3749_v9 = vadd.f32 1.1283791, %v3748_v14 }
 0x209   : > { %v1032_v40 = vadd.f32 %v928_v26, %v7318_v17  ;;  %v1064_v28 = vadd.f32 %v964_v13, %v7329_v63  ;;  %v7573_v34 = vmul.f32 %v9226_v57, %v7283_v23  ;;  %v7582_v31 = vmul.f32 %v9227_v7, %v1232_v48 }
 0x20a   : > { %3925 = vst.msk [vmem:[#allocation3 + $0x8c] sm:$0xf] %vm3237_vm6, %v3917_v27  ;;  %v3541_v8 = vmul.f32 %v3532_v50, %v3437_v60  ;;  %v3791_v35 = vmul.f32 3.8918573e-05, %v7563_v61  ;;  %v7586_v17 = vmul.f32 %v7290_v4, %v7554_v52  ;;  %v3770_v63 = vand.u32 2147483647, %v7539_v53 }
 0x20b   : > { %v888_v36 = vmul.f32 %v7406_v32, %v7565_v16  ;;  %v7593_v22 = vmul.f32 %v7406_v32, %v7567_v25  ;;  %v958_v51 = vmul.f32 %v7055_v37, %v7347_v33  ;;  %v3780_v3 = vmul.f32 2.1237322e-06, %v7563_v61  ;;  %v1443_v54 = vpop.permute.xlu2 %1442 }
 0x20c   : > { %v3549_v44 = vadd.f32 %v3541_v8, %v3501_v2  ;;  %v3792_v30 = vadd.f32 0.001143296, %v3791_v35  ;;  %v960_v20 = vmul.f32 %v7055_v37, %v7554_v52  ;;  %v3750_v41 = vmul.f32 %v3749_v9, %v7334_v29  ;;  %v9230_v8 = vld [vmem:[#allocation44_spill] sm:$0xff] }
 0x20d   : > { %v5038_v49 = vpop.eup %5037  ;;  %vm3766_vm10 = vweird.f32 %v7539_v53  ;;  %v1132_v56 = vmul.f32 %v7063_v21, %v7577_v59  ;;  %v1168_v42 = vmul.f32 %v9226_v57, %v7579_v11  ;;  %v3772_v15 = vand.u32 2147483648, %v7539_v53 }
 0x20e   : > { %v3762_v43 = vmul.f32 %v5038_v49, %v7539_v53  ;;  %v3561_v26 = vadd.f32 %v5129_v0, %v3549_v44  ;;  %v3781_v14 = vadd.f32 0.00028619796, %v3780_v3  ;;  %vm7608_vm11 = vcmp.eq.f32.partialorder %v3770_v63, 8.507059e+37  ;;  %v9234_v3 = vld [vmem:[#allocation45_spill] sm:$0xff] }
 0x20f   : > { %v3793_v29 = vmul.f32 %v3792_v30, %v7563_v61  ;;  %v1236_v13 = vadd.f32 %v1132_v56, %v1032_v40  ;;  %v994_v55 = vmul.f32 %v7023_v39, %v7565_v16  ;;  %vm3767_vm12 = vweird.f32 %v5038_v49 }
 0x210   : > { %v3763_v21 = vsub.f32 1.0, %v3762_v43  ;;  %v7615_v24 = vmul.f32 0.70710677, %v3561_v26  ;;  %v3782_v50 = vmul.f32 %v3781_v14, %v7563_v61  ;;  %v1268_v0 = vadd.f32 %v1168_v42, %v1064_v28  ;;  %vm7627_vm13 = vmor %vm3766_vm10, %vm3767_vm12  ;;  %v9235_v43 = vld [vmem:[#allocation46_spill] sm:$0xff] }
 0x211   : > { %v3794_v48 = vadd.f32 0.014752088, %v3793_v29  ;;  %v1524_v27 = vmul.f32 %v1443_v54, %v1236_v13  ;;  %v996_v2 = vmul.f32 %v7023_v39, %v7567_v25  ;;  %v7623_v35 = vadd.f32 %v958_v51, %v9230_v8  ;;  %v9236_v29 = vld [vmem:[#allocation47_spill] sm:$0xff] }
 0x212   : > { %v3764_v60 = vmul.f32 %v5038_v49, %v3763_v21  ;;  %v3858_v9 = vmul.f32 %v7615_v24, %v7615_v24  ;;  %v3783_v40 = vadd.f32 0.0036580483, %v3782_v50  ;;  %v3773_v63 = vor.u32 1.1754944e-38, %v3772_v15 }
 0x213   : > { %v3795_v28 = vmul.f32 %v3794_v48, %v7563_v61  ;;  %v7632_v44 = vadd.f32 %v1524_v27, %v1268_v0  ;;  %v7635_v30 = vadd.f32 %v960_v20, %v9234_v3  ;;  %v1088_v53 = vadd.f32 %v7519_v62, %v9235_v43  ;;  %v9239_v3 = vld [vmem:[#allocation41_spill] sm:$0xff] }
 0x214   : > { %v3765_v56 = vadd.f32 %v5038_v49, %v3764_v60  ;;  %v7637_v42 = vmin.f32 %v3858_v9, 16.0  ;;  %v3784_v51 = vmul.f32 %v3783_v40, %v7563_v61  ;;  %v1090_v13 = vadd.f32 %v994_v55, %v9236_v29  ;;  %v9237_v9 = vld [vmem:[#allocation25_spill] sm:$0xff]  ;;  %v9241_v29 = vld [vmem:[#allocation42_spill] sm:$0xff] }
 0x215   : > { %9233 = vst [vmem:[#allocation34_spill] sm:$0xff] %v7632_v44  ;;  %v3796_v14 = vadd.f32 0.112945676, %v3795_v28  ;;  %v7643_v21 = vadd.f32 %v996_v2, %v888_v36  ;;  %v1158_v15 = vmul.f32 %v9226_v57, %v7345_v5  ;;  %v962_v36 = vmul.f32 %v7055_v37, %v7283_v23  ;;  %v9238_v28 = vld [vmem:[#allocation43_spill] sm:$0xff]  ;;  %v858_v43 = vld [vmem:[#allocation2 + $0xa1] sm:$0xff] }
 0x216   : > { %v3769_v20 = vsel %vm7627_vm13, %v5038_v49, %v3765_v56  ;;  %v3860_v50 = vmul.f32 2.1237322e-06, %v7637_v42  ;;  %v3871_v54 = vmul.f32 3.8918573e-05, %v7637_v42  ;;  %v3785_v48 = vadd.f32 0.05243302, %v3784_v51 }
 0x217   : > { %v3774_v0 = vsel %vm7608_vm11, %v3773_v63, %v3769_v20  ;;  %v3797_v62 = vmul.f32 %v3796_v14, %v7563_v61  ;;  %v1160_v55 = vmul.f32 %v9226_v57, %v7347_v33  ;;  %v1194_v40 = vmul.f32 %v9237_v9, %v7395_v19  ;;  %v9240_v14 = vld [vmem:[#allocation38_spill] sm:$0xff] }
 0x218   : > { %v3775_v5 = vmul.f32 %v3774_v0, %v3750_v41  ;;  %v3861_v27 = vadd.f32 0.00028619796, %v3860_v50  ;;  %v3872_v2 = vadd.f32 0.001143296, %v3871_v54  ;;  %v3786_v49 = vmul.f32 %v3785_v48, %v7563_v61 }
 0x219   : > { %v3798_v60 = vadd.f32 0.4994258, %v3797_v62  ;;  %v1196_v47 = vmul.f32 %v9237_v9, %v7565_v16  ;;  %v1198_v8 = vmul.f32 %v9237_v9, %v7567_v25  ;;  %v7667_v41 = vmul.f32 0.5, %v3561_v26 }
 0x21a   : > { %v4733_v7 = vclamps-f32 %v3775_v5, 1.0  ;;  %v3862_v37 = vmul.f32 %v3861_v27, %v7637_v42  ;;  %v3873_v23 = vmul.f32 %v3872_v2, %v7637_v42  ;;  %v3787_v33 = vadd.f32 0.18741608, %v3786_v49  ;;  %v9242_v49 = vld [vmem:[#allocation39_spill] sm:$0xff] }
 0x21b   : > { %v3799_v63 = vmul.f32 %v3798_v60, %v7563_v61  ;;  %v7672_v56 = vadd.f32 %v9239_v3, %v9238_v28  ;;  %v1162_v19 = vmul.f32 %v9226_v57, %v7554_v52  ;;  %v1230_v20 = vadd.f32 %v9241_v29, %v9240_v14 }
 0x21c   : > { %v3902_v16 = vadd.f32 1.0, %v4733_v7  ;;  %v3863_v51 = vadd.f32 0.0036580483, %v3862_v37  ;;  %v3874_v25 = vadd.f32 0.014752088, %v3873_v23  ;;  %v3788_v50 = vmul.f32 %v3787_v33, %v7563_v61  ;;  %v9243_v61 = vld [vmem:[#allocation17_spill] sm:$0xff] }
 0x21d   : > { %v7679_v26 = vadd.f32 1.0, %v3799_v63  ;;  %v1290_v54 = vadd.f32 %v1194_v40, %v7560_v46  ;;  %v1292_v48 = vadd.f32 %v1196_v47, %v1088_v53  ;;  %v1294_v5 = vadd.f32 %v1198_v8, %v1090_v13  ;;  %v9244_v53 = vld [vmem:[#allocation8_spill] sm:$0xff]  ;;  %v9245_v13 = vld [vmem:[#allocation14_spill] sm:$0xff] }
 0x21e   : > { %v3910_v0 = vmul.f32 %v3902_v16, %v7551_v10  ;;  %v3864_v62 = vmul.f32 %v3863_v51, %v7637_v42  ;;  %v3875_v52 = vmul.f32 %v3874_v25, %v7637_v42  ;;  %v998_v27 = vmul.f32 %v7023_v39, %v858_v43  ;;  %v9247_v33 = vld [vmem:[#allocation24_spill] sm:$0xff] }
 0x21f   : > { %5039 = vrcp.f32 %v7679_v26  ;;  %v1062_v2 = vadd.f32 %v962_v36, %v7586_v17  ;;  %v1514_v60 = vmul.f32 %v9243_v61, %v9242_v49  ;;  %v1518_v40 = vmul.f32 %v9244_v53, %v1230_v20  ;;  %v9246_v36 = vld [vmem:[#allocation5_spill] sm:$0xff] }
 0x220   : > { %v3918_v9 = vpack.c.bf16 %v3910_v0, %v3910_v0  ;;  %v3865_v7 = vadd.f32 0.05243302, %v3864_v62  ;;  %v3876_v46 = vadd.f32 0.112945676, %v3875_v52  ;;  %v3789_v10 = vadd.f32 1.1283791, %v3788_v50 }
 0x221   : > { %v1258_v47 = vadd.f32 %v1158_v15, %v7548_v38  ;;  %v1260_v37 = vadd.f32 %v1160_v55, %v7557_v1  ;;  %v1706_v8 = vmul.f32 %v9245_v13, %v1290_v54  ;;  %v1262_v17 = vadd.f32 %v1162_v19, %v7623_v35  ;;  %v7703_v38 = vld [vmem:[%s9099_s4 + $0x8] ss:$0 sm:$0xff]  ;;  %v9248_v55 = vld [vmem:[#allocation7_spill] sm:$0xff]  ;;  %v1639_v13 = vpop.permute.xlu1 %1638 }
 0x222   : > { %3926 = vst.msk [vmem:[#allocation3 + $0x90] sm:$0xf] %vm3237_vm6, %v3918_v9  ;;  %v3877_v39 = vmul.f32 %v3876_v46, %v7637_v42  ;;  %v1708_v23 = vmul.f32 %v9246_v36, %v1292_v48  ;;  %v1710_v63 = vmul.f32 %v9247_v33, %v1294_v5  ;;  %v3866_v28 = vmul.f32 %v3865_v7, %v7637_v42  ;;  %v860_v54 = vld [vmem:[#allocation2 + $0xb1] sm:$0xff] }
 0x223   : > { %v1200_v1 = vmul.f32 %v7703_v38, %v858_v43  ;;  %v1546_v15 = vadd.f32 %v1514_v60, %v1258_v47  ;;  %v1548_v3 = vadd.f32 %v9248_v55, %v1260_v37  ;;  %v3810_v51 = vand.u32 2147483647, %v7679_v26 }
 0x224   : > { %v3878_v16 = vadd.f32 0.4994258, %v3877_v39  ;;  %v1094_v35 = vadd.f32 %v998_v27, %v7593_v22  ;;  %v1550_v19 = vadd.f32 %v1518_v40, %v1262_v17  ;;  %v3790_v14 = vmul.f32 %v3789_v10, %v7534_v12  ;;  %v7717_v22 = vld [vmem:[%s9099_s4 + $0x6] ss:$0 sm:$0xff]  ;;  %v9254_v39 = vld [vmem:[#allocation19_spill] sm:$0xff] }
 0x225   : > { %v5040_v25 = vpop.eup %5039  ;;  %vm3806_vm14 = vweird.f32 %v7679_v26  ;;  %v3812_v29 = vand.u32 2147483648, %v7679_v26  ;;  %v1738_v20 = vadd.f32 %v1706_v8, %v1546_v15  ;;  %v1740_v48 = vadd.f32 %v1708_v23, %v1548_v3 }
 0x226   : > { %v3879_v50 = vmul.f32 %v3878_v16, %v7637_v42  ;;  %v3802_v43 = vmul.f32 %v5040_v25, %v7679_v26  ;;  %v1742_v0 = vadd.f32 %v1710_v63, %v1550_v19  ;;  %v3867_v62 = vadd.f32 0.18741608, %v3866_v28 }
 0x227   : > { %v1130_v12 = vmul.f32 %v7717_v22, %v7513_v6  ;;  %v1264_v52 = vadd.f32 %v7573_v34, %v7635_v30  ;;  %v1296_v5 = vadd.f32 %v1200_v1, %v7643_v21  ;;  %vm7724_vm15 = vcmp.eq.f32.partialorder %v3810_v51, 8.507059e+37  ;;  %v9251_v6 = vld [vmem:[#allocation37_spill] sm:$0xff]  ;;  %v7736_v34 = vld [vmem:[%s9100_s5] ss:$0 sm:$0xff] }
 0x228   : > { %v3880_v27 = vadd.f32 1.0, %v3879_v50  ;;  %v3803_v49 = vsub.f32 1.0, %v3802_v43  ;;  %v1166_v60 = vmul.f32 %v9226_v57, %v7527_v18  ;;  %vm3807_vm2 = vweird.f32 %v5040_v25  ;;  %v9255_v1 = vld [vmem:[#allocation40_spill] sm:$0xff] }
 0x229   : > { %v1202_v9 = vmul.f32 %v7703_v38, %v860_v54  ;;  %v1552_v7 = vadd.f32 %v7582_v31, %v1264_v52  ;;  %v1712_v46 = vmul.f32 %v9251_v6, %v1296_v5  ;;  %v7739_v30 = vadd.f32 %v7736_v34, %v1738_v20  ;;  %vm7752_vm3 = vmor %vm3806_vm14, %vm3807_vm2 }
 0x22a   : > { %5041 = vrcp.f32 %v3880_v27  ;;  %v7742_v21 = vadd.f32 %v7736_v34, %v1740_v48  ;;  %v7745_v18 = vadd.f32 %v7736_v34, %v1742_v0  ;;  %v3868_v57 = vmul.f32 %v3867_v62, %v7637_v42 }
 0x22b   : > { %v3804_v31 = vmul.f32 %v5040_v25, %v3803_v49  ;;  %v1234_v53 = vadd.f32 %v1130_v12, %v7672_v56  ;;  %v1744_v40 = vadd.f32 %v1712_v46, %v1552_v7  ;;  %v3567_v10 = vmul.f32 0.5, %v7525_v45 }
 0x22c   : > { %v3813_v37 = vor.u32 1.1754944e-38, %v3812_v29  ;;  %v1266_v8 = vadd.f32 %v1166_v60, %v1062_v2  ;;  %v7758_v17 = vadd.f32 %v7736_v34, %v9254_v39  ;;  %v3890_v42 = vand.u32 2147483647, %v3880_v27 }
 0x22d   : > { %v3892_v36 = vand.u32 2147483648, %v3880_v27  ;;  %v3805_v23 = vadd.f32 %v5040_v25, %v3804_v31  ;;  %v1298_v56 = vadd.f32 %v1202_v9, %v1094_v35  ;;  %v7761_v33 = vadd.f32 %v7736_v34, %v1744_v40 }
 0x22e   : > { %v7764_v45 = vmul.f32 0.70710677, %v7739_v30  ;;  %v7767_v26 = vmul.f32 0.70710677, %v7742_v21  ;;  %v7770_v63 = vmul.f32 0.70710677, %v7745_v18  ;;  %v1522_v15 = vmul.f32 %v9255_v1, %v1234_v53 }
 0x22f   : > { %v3869_v2 = vadd.f32 1.1283791, %v3868_v57  ;;  %v3809_v28 = vsel %vm7752_vm3, %v5040_v25, %v3805_v23  ;;  %v1714_v55 = vmul.f32 %v1639_v13, %v1298_v56  ;;  %vm3886_vm4 = vweird.f32 %v3880_v27 }
 0x230   : > { %v5042_v3 = vpop.eup %5041  ;;  %v3814_v16 = vsel %vm7724_vm15, %v3813_v37, %v3809_v28  ;;  %v2221_v51 = vmul.f32 %v7764_v45, %v7764_v45  ;;  %v2301_v35 = vmul.f32 %v7767_v26, %v7767_v26  ;;  %vm7781_vm5 = vcmp.eq.f32.partialorder %v3890_v42, 8.507059e+37 }
 0x231   : > { %v3882_v19 = vmul.f32 %v5042_v3, %v3880_v27  ;;  %v3893_v25 = vor.u32 1.1754944e-38, %v3892_v36  ;;  %v3815_v20 = vmul.f32 %v3814_v16, %v3790_v14  ;;  %v7786_v50 = vmul.f32 0.70710677, %v7761_v33 }
 0x232   : > { %v7788_v43 = vmin.f32 %v2221_v51, 16.0  ;;  %v7790_v54 = vmin.f32 %v2301_v35, 16.0  ;;  %v2381_v48 = vmul.f32 %v7770_v63, %v7770_v63  ;;  %vm3887_vm7 = vweird.f32 %v5042_v3 }
 0x233   : > { %v3883_v0 = vsub.f32 1.0, %v3882_v19  ;;  %v4734_v62 = vclamps-f32 %v3815_v20, 1.0  ;;  %v7795_v12 = vmul.f32 0.70710677, %v7758_v17  ;;  %v3870_v52 = vmul.f32 %v3869_v2, %v7615_v24  ;;  %vm7805_vm8 = vmor %vm3886_vm4, %vm3887_vm7 }
 0x234   : > { %v2223_v14 = vmul.f32 2.1237322e-06, %v7788_v43  ;;  %v2234_v5 = vmul.f32 3.8918573e-05, %v7788_v43  ;;  %v2303_v49 = vmul.f32 2.1237322e-06, %v7790_v54  ;;  %v1554_v46 = vadd.f32 %v1522_v15, %v1266_v8 }
 0x235   : > { %v3884_v61 = vmul.f32 %v5042_v3, %v3883_v0  ;;  %v3903_v60 = vadd.f32 1.0, %v4734_v62  ;;  %v2314_v9 = vmul.f32 3.8918573e-05, %v7790_v54  ;;  %v7802_v7 = vmin.f32 %v2381_v48, 16.0 }
 0x236   : > { %v2224_v57 = vadd.f32 0.00028619796, %v2223_v14  ;;  %v2235_v24 = vadd.f32 0.001143296, %v2234_v5  ;;  %v2304_v31 = vadd.f32 0.00028619796, %v2303_v49  ;;  %v2181_v29 = vmul.f32 %v7795_v12, %v7795_v12 }
 0x237   : > { %v3885_v53 = vadd.f32 %v5042_v3, %v3884_v61  ;;  %v3911_v40 = vmul.f32 %v3903_v60, %v3567_v10  ;;  %v2315_v47 = vadd.f32 0.001143296, %v2314_v9  ;;  %v2383_v37 = vmul.f32 2.1237322e-06, %v7802_v7 }
 0x238   : > { %v2225_v13 = vmul.f32 %v2224_v57, %v7788_v43  ;;  %v2236_v39 = vmul.f32 %v2235_v24, %v7788_v43  ;;  %v2305_v42 = vmul.f32 %v2304_v31, %v7790_v54  ;;  %v2394_v27 = vmul.f32 3.8918573e-05, %v7802_v7 }
 0x239   : > { %v3889_v36 = vsel %vm7805_vm8, %v5042_v3, %v3885_v53  ;;  %v3919_v8 = vpack.c.bf16 %v3911_v40, %v3911_v40  ;;  %v2316_v23 = vmul.f32 %v2315_v47, %v7790_v54  ;;  %v2384_v56 = vadd.f32 0.00028619796, %v2383_v37 }
 0x23a   : > { %v3894_v10 = vsel %vm7781_vm5, %v3893_v25, %v3889_v36  ;;  %v2226_v2 = vadd.f32 0.0036580483, %v2225_v13  ;;  %v2237_v28 = vadd.f32 0.014752088, %v2236_v39  ;;  %v2306_v1 = vadd.f32 0.0036580483, %v2305_v42 }
 0x23b   : > { %v3895_v15 = vmul.f32 %v3894_v10, %v3870_v52  ;;  %3927 = vst.msk [vmem:[#allocation3 + $0x94] sm:$0xf] %vm3237_vm6, %v3919_v8  ;;  %v2317_v16 = vadd.f32 0.014752088, %v2316_v23  ;;  %v2385_v51 = vmul.f32 %v2384_v56, %v7802_v7  ;;  %v2395_v35 = vadd.f32 0.001143296, %v2394_v27 }
 0x23c   : > { %v2227_v19 = vmul.f32 %v2226_v2, %v7788_v43  ;;  %v2238_v3 = vmul.f32 %v2237_v28, %v7788_v43  ;;  %v2307_v20 = vmul.f32 %v2306_v1, %v7790_v54  ;;  %v1746_v52 = vadd.f32 %v1714_v55, %v1554_v46  ;;  %v5134_v56 = vld [vmem:[#allocation2 + $0xf0] sm:$0xff]  ;;  %v7851_v2 = vld [vmem:[%s9099_s4] ss:$0 sm:$0xff]  ;;  %v5136_v28 = vld [vmem:[#allocation2 + $0x67] sm:$0xff] }
 0x23d   : > { %v4736_v25 = vclamps-f32 %v3895_v15, 1.0  ;;  %v2318_v48 = vmul.f32 %v2317_v16, %v7790_v54  ;;  %v2386_v0 = vadd.f32 0.0036580483, %v2385_v51  ;;  %v2396_v62 = vmul.f32 %v2395_v35, %v7802_v7  ;;  %v7862_v51 = vld [vmem:[%s9099_s4 + $0x3] ss:$0 sm:$0xff] }
 0x23e   : > { %v2228_v14 = vadd.f32 0.05243302, %v2227_v19  ;;  %v2239_v5 = vadd.f32 0.112945676, %v2238_v3  ;;  %v2308_v49 = vadd.f32 0.05243302, %v2307_v20  ;;  %v2461_v42 = vmul.f32 %v7786_v50, %v7786_v50 }
 0x23f   : > { %v3905_v61 = vadd.f32 1.0, %v4736_v25  ;;  %v2319_v60 = vadd.f32 0.112945676, %v2318_v48  ;;  %v2387_v9 = vmul.f32 %v2386_v0, %v7802_v7  ;;  %v2397_v6 = vadd.f32 0.014752088, %v2396_v62 }
 0x240   : > { %v2229_v57 = vmul.f32 %v2228_v14, %v7788_v43  ;;  %v2240_v24 = vmul.f32 %v2239_v5, %v7788_v43  ;;  %v2309_v31 = vmul.f32 %v2308_v49, %v7790_v54  ;;  %v7832_v53 = vmin.f32 %v2181_v29, 16.0 }
 0x241   : > { %v3913_v40 = vmul.f32 %v3905_v61, %v7667_v41  ;;  %v2320_v55 = vmul.f32 %v2319_v60, %v7790_v54  ;;  %v2388_v46 = vadd.f32 0.05243302, %v2387_v9  ;;  %v2398_v47 = vmul.f32 %v2397_v6, %v7802_v7  ;;  %v7843_v41 = vld [vmem:[%s9099_s4 + $0x7] ss:$0 sm:$0xff]  ;;  %v5139_v60 = vld [vmem:[#allocation2 + $0x68] sm:$0xff] }
 0x242   : > { %v2230_v37 = vadd.f32 0.18741608, %v2229_v57  ;;  %v2241_v13 = vadd.f32 0.4994258, %v2240_v24  ;;  %v2310_v39 = vadd.f32 0.18741608, %v2309_v31  ;;  %v7846_v10 = vmul.f32 %v5134_v56, %v7843_v41 }
 0x243   : > { %v3921_v27 = vpack.c.bf16 %v3913_v40, %v3913_v40  ;;  %v2321_v36 = vadd.f32 0.4994258, %v2320_v55  ;;  %v2389_v8 = vmul.f32 %v2388_v46, %v7802_v7  ;;  %v2399_v23 = vadd.f32 0.112945676, %v2398_v47  ;;  %v9260_v24 = vld [vmem:[#allocation28_spill] sm:$0xff] }
 0x244   : > { %v7854_v1 = vmul.f32 %v5136_v28, %v7851_v2  ;;  %v2242_v15 = vmul.f32 %v2241_v13, %v7788_v43  ;;  %v7857_v16 = vmin.f32 %v2461_v42, 16.0  ;;  %v919_v35 = vmul.f32 %v7862_v51, %v5136_v28 }
 0x245   : > { %3929 = vst.msk [vmem:[#allocation3 + $0x9c] sm:$0xf] %vm3237_vm6, %v3921_v27  ;;  %v7867_v19 = vadd.f32 %v7736_v34, %v1746_v52  ;;  %v2322_v3 = vmul.f32 %v2321_v36, %v7790_v54  ;;  %v2400_v20 = vmul.f32 %v2399_v23, %v7802_v7  ;;  %v2231_v29 = vmul.f32 %v2230_v37, %v7788_v43  ;;  %v5138_v52 = vld [vmem:[#allocation2 + $0x58] sm:$0xff] }
 0x246   : > { %v7872_v25 = vadd.f32 1.0, %v2242_v15  ;;  %v2390_v48 = vadd.f32 0.18741608, %v2389_v8  ;;  %v2183_v0 = vmul.f32 2.1237322e-06, %v7832_v53  ;;  %v2311_v62 = vmul.f32 %v2310_v39, %v7790_v54  ;;  %v5140_v43 = vld [vmem:[#allocation2 + $0x59] sm:$0xff] }
 0x247   : > { %v7876_v14 = vadd.f32 1.0, %v2322_v3  ;;  %v2401_v5 = vadd.f32 0.4994258, %v2400_v20  ;;  %v2463_v49 = vmul.f32 2.1237322e-06, %v7857_v16  ;;  %v7880_v61 = vmul.f32 %v5138_v52, %v7290_v4 }
 0x248   : > { %v7883_v9 = vmul.f32 %v5139_v60, %v7290_v4  ;;  %v7886_v6 = vmul.f32 %v5140_v43, %v7406_v32  ;;  %5043 = vrcp.f32 %v7872_v25  ;;  %v7892_v54 = vld [vmem:[%s9099_s4 + $0x4] ss:$0 sm:$0xff]  ;;  %v7898_v31 = vadd.f32 %v919_v35, %v9260_v24 }
 0x249   : > { %v7895_v57 = vmul.f32 %v7892_v54, %v5139_v60  ;;  %v7901_v4 = vmul.f32 0.5, %v7739_v30  ;;  %5045 = vrcp.f32 %v7876_v14  ;;  %v7905_v32 = vmul.f32 0.70710677, %v7867_v19 }
 0x24a   : > { %v2232_v40 = vadd.f32 1.1283791, %v2231_v29  ;;  %v2391_v55 = vmul.f32 %v2390_v48, %v7802_v7  ;;  %v2184_v46 = vadd.f32 0.00028619796, %v2183_v0  ;;  %v2312_v47 = vadd.f32 1.1283791, %v2311_v62 }
 0x24b   : > { %v2402_v37 = vmul.f32 %v2401_v5, %v7802_v7  ;;  %v2464_v13 = vadd.f32 0.00028619796, %v2463_v49  ;;  %v2474_v39 = vmul.f32 3.8918573e-05, %v7857_v16  ;;  %v7911_v42 = vmul.f32 0.5, %v7742_v21 }
 0x24c   : > { %v2253_v30 = vand.u32 2147483647, %v7872_v25  ;;  %v2255_v27 = vand.u32 2147483648, %v7872_v25  ;;  %v2333_v36 = vand.u32 2147483647, %v7876_v14  ;;  %v2335_v8 = vand.u32 2147483648, %v7876_v14 }
 0x24d   : > { %v7917_v23 = vadd.f32 1.0, %v2402_v37  ;;  %v2465_v56 = vmul.f32 %v2464_v13, %v7857_v16  ;;  %v2475_v28 = vadd.f32 0.001143296, %v2474_v39  ;;  %v2233_v15 = vmul.f32 %v2232_v40, %v7764_v45 }
 0x24e   : > { %v5044_v7 = vpop.eup %5043  ;;  %vm2249_vm9 = vweird.f32 %v7872_v25  ;;  %v2392_v21 = vadd.f32 1.1283791, %v2391_v55  ;;  %v2185_v35 = vmul.f32 %v2184_v46, %v7832_v53  ;;  %v2313_v29 = vmul.f32 %v2312_v47, %v7767_v26 }
 0x24f   : > { %v5046_v3 = vpop.eup %5045  ;;  %v2245_v20 = vmul.f32 %v5044_v7, %v7872_v25  ;;  %vm2329_vm10 = vweird.f32 %v7876_v14  ;;  %5047 = vrcp.f32 %v7917_v23  ;;  %vm7927_vm11 = vcmp.eq.f32.partialorder %v2253_v30, 8.507059e+37 }
 0x250   : > { %v2256_v0 = vor.u32 1.1754944e-38, %v2255_v27  ;;  %v2325_v45 = vmul.f32 %v5046_v3, %v7876_v14  ;;  %vm7932_vm12 = vcmp.eq.f32.partialorder %v2333_v36, 8.507059e+37  ;;  %v2336_v49 = vor.u32 1.1754944e-38, %v2335_v8 }
 0x251   : > { %v2246_v5 = vsub.f32 1.0, %v2245_v20  ;;  %v2466_v52 = vadd.f32 0.0036580483, %v2465_v56  ;;  %v2476_v26 = vmul.f32 %v2475_v28, %v7857_v16  ;;  %vm2250_vm13 = vweird.f32 %v5044_v7 }
 0x252   : > { %v2326_v60 = vsub.f32 1.0, %v2325_v45  ;;  %v2393_v43 = vmul.f32 %v2392_v21, %v7770_v63  ;;  %v2186_v24 = vadd.f32 0.0036580483, %v2185_v35  ;;  %v2413_v55 = vand.u32 2147483647, %v7917_v23  ;;  %vm2251_vm2 = vmor %vm2249_vm9, %vm2250_vm13 }
 0x253   : > { %v2247_v40 = vmul.f32 %v5044_v7, %v2246_v5  ;;  %v2467_v46 = vmul.f32 %v2466_v52, %v7857_v16  ;;  %v2477_v47 = vadd.f32 0.014752088, %v2476_v26  ;;  %vm2330_vm14 = vweird.f32 %v5046_v3 }
 0x254   : > { %v2327_v37 = vmul.f32 %v5046_v3, %v2326_v60  ;;  %v2541_v13 = vmul.f32 %v7905_v32, %v7905_v32  ;;  %v2194_v39 = vmul.f32 3.8918573e-05, %v7832_v53  ;;  %vm2409_vm15 = vweird.f32 %v7917_v23  ;;  %vm2331_vm3 = vmor %vm2329_vm10, %vm2330_vm14 }
 0x255   : > { %v5048_v30 = vpop.eup %5047  ;;  %v2248_v27 = vadd.f32 %v5044_v7, %v2247_v40  ;;  %v2415_v63 = vand.u32 2147483648, %v7917_v23  ;;  %v2478_v36 = vmul.f32 %v2477_v47, %v7857_v16  ;;  %v2187_v21 = vmul.f32 %v2186_v24, %v7832_v53 }
 0x256   : > { %v2328_v8 = vadd.f32 %v5046_v3, %v2327_v37  ;;  %v2405_v56 = vmul.f32 %v5048_v30, %v7917_v23  ;;  %v7950_v28 = vmin.f32 %v2541_v13, 16.0  ;;  %vm7955_vm4 = vcmp.eq.f32.partialorder %v2413_v55, 8.507059e+37 }
 0x257   : > { %v2252_v35 = vsel %vm2251_vm2, %v5044_v7, %v2248_v27  ;;  %v2468_v45 = vadd.f32 0.05243302, %v2467_v46  ;;  %v2479_v5 = vadd.f32 0.112945676, %v2478_v36  ;;  %vm2410_vm5 = vweird.f32 %v5048_v30 }
 0x258   : > { %v2257_v25 = vsel %vm7927_vm11, %v2256_v0, %v2252_v35  ;;  %v2332_v52 = vsel %vm2331_vm3, %v5046_v3, %v2328_v8  ;;  %v2406_v26 = vsub.f32 1.0, %v2405_v56  ;;  %v2543_v60 = vmul.f32 2.1237322e-06, %v7950_v28  ;;  %vm2411_vm7 = vmor %vm2409_vm15, %vm2410_vm5 }
 0x259   : > { %v2258_v40 = vmul.f32 %v2257_v25, %v2233_v15  ;;  %v2337_v7 = vsel %vm7932_vm12, %v2336_v49, %v2332_v52  ;;  %v2480_v14 = vmul.f32 %v2479_v5, %v7857_v16  ;;  %v2554_v46 = vmul.f32 3.8918573e-05, %v7950_v28 }
 0x25a   : > { %v2338_v24 = vmul.f32 %v2337_v7, %v2313_v29  ;;  %v2407_v55 = vmul.f32 %v5048_v30, %v2406_v26  ;;  %v2544_v47 = vadd.f32 0.00028619796, %v2543_v60  ;;  %v2416_v13 = vor.u32 1.1754944e-38, %v2415_v63 }
 0x25b   : > { %v4706_v37 = vclamps-f32 %v2258_v40, 1.0  ;;  %v2481_v48 = vadd.f32 0.4994258, %v2480_v14  ;;  %v2195_v0 = vadd.f32 0.001143296, %v2194_v39  ;;  %v2469_v62 = vmul.f32 %v2468_v45, %v7857_v16 }
 0x25c   : > { %v4708_v3 = vclamps-f32 %v2338_v24, 1.0  ;;  %v2408_v27 = vadd.f32 %v5048_v30, %v2407_v55  ;;  %v2545_v36 = vmul.f32 %v2544_v47, %v7950_v28  ;;  %v2555_v15 = vadd.f32 0.001143296, %v2554_v46  ;;  %v5142_v24 = vld [vmem:[#allocation2 + $0xe7] sm:$0xff] }
 0x25d   : > { %v2482_v29 = vmul.f32 %v2481_v48, %v7857_v16  ;;  %v3150_v49 = vadd.f32 1.0, %v4706_v37  ;;  %v2188_v8 = vadd.f32 0.05243302, %v2187_v21  ;;  %v7974_v39 = vadd.f32 %v7895_v57, %v7880_v61 }
 0x25e   : > { %v2412_v56 = vsel %vm2411_vm7, %v5048_v30, %v2408_v27  ;;  %v2546_v35 = vadd.f32 0.0036580483, %v2545_v36  ;;  %v2556_v63 = vmul.f32 %v2555_v15, %v7950_v28  ;;  %v3152_v5 = vadd.f32 1.0, %v4708_v3  ;;  %v5146_v3 = vld [vmem:[#allocation2 + $0x69] sm:$0xff] }
 0x25f   : > { %v2417_v25 = vsel %vm7955_vm4, %v2416_v13, %v2412_v56  ;;  %v7978_v23 = vadd.f32 1.0, %v2482_v29  ;;  %v3182_v45 = vmul.f32 %v3150_v49, %v7901_v4  ;;  %v2470_v60 = vadd.f32 0.18741608, %v2469_v62 }
 0x260   : > { %v2418_v52 = vmul.f32 %v2417_v25, %v2393_v43  ;;  %v2547_v26 = vmul.f32 %v2546_v35, %v7950_v28  ;;  %v2557_v21 = vadd.f32 0.014752088, %v2556_v63  ;;  %v3184_v30 = vmul.f32 %v3152_v5, %v7911_v42  ;;  %v5143_v43 = vld [vmem:[#allocation2 + $0xe8] sm:$0xff]  ;;  %v5144_v42 = vld [vmem:[#allocation2 + $0xf1] sm:$0xff]  ;;  %v853_v35 = vld [vmem:[#allocation2 + $0x79] sm:$0xff] }
 0x261   : > { %5049 = vrcp.f32 %v7978_v23  ;;  %v2189_v40 = vmul.f32 %v2188_v8, %v7832_v53  ;;  %v2196_v61 = vmul.f32 %v2195_v0, %v7832_v53  ;;  %v3214_v14 = vpack.c.bf16 %v3182_v45, %v3182_v45  ;;  %v8001_v0 = vld [vmem:[%s9099_s4 + $0x5] ss:$0 sm:$0xff] }
 0x262   : > { %v4710_v57 = vclamps-f32 %v2418_v52, 1.0  ;;  %v2548_v20 = vadd.f32 0.05243302, %v2547_v26  ;;  %v2558_v7 = vmul.f32 %v2557_v21, %v7950_v28  ;;  %v7988_v4 = vmul.f32 %v5142_v24, %v7717_v22  ;;  %v8035_v26 = vld [vmem:[%s9099_s4 + $0x2] ss:$0 sm:$0xff] }
 0x263   : > { %v7991_v55 = vmul.f32 %v5143_v43, %v7843_v41  ;;  %v7994_v47 = vmul.f32 %v5144_v42, %v7703_v38  ;;  %v3216_v46 = vpack.c.bf16 %v3184_v30, %v3184_v30  ;;  %v1810_v37 = vmul.f32 0.5, %v7745_v18  ;;  %3247 = vst.msk [vmem:[#allocation3 + $0x24] sm:$0xf] %vm3237_vm6, %v3214_v14  ;;  %v8011_v18 = vld [vmem:[%s9099_s4 + $0x1] ss:$0 sm:$0xff] }
 0x264   : > { %9267 = vst [vmem:[#allocation16_spill] sm:$0xff] %v7988_v4  ;;  %v2559_v13 = vadd.f32 0.112945676, %v2558_v7  ;;  %v3154_v48 = vadd.f32 1.0, %v4710_v57  ;;  %v991_v27 = vmul.f32 %v5146_v3, %v8001_v0  ;;  %v8006_v36 = vmul.f32 %v7851_v2, %v7577_v59 }
 0x265   : > { %9268 = vst [vmem:[#allocation44_spill] sm:$0xff] %v7991_v55  ;;  %v8015_v15 = vmul.f32 %v8011_v18, %v7579_v11  ;;  %v2190_v62 = vadd.f32 0.18741608, %v2189_v40  ;;  %v2197_v29 = vadd.f32 0.014752088, %v2196_v61  ;;  %v2471_v49 = vmul.f32 %v2470_v60, %v7857_v16 }
 0x266   : > { %9269 = vst [vmem:[#allocation45_spill] sm:$0xff] %v7994_v47  ;;  %v2549_v8 = vmul.f32 %v2548_v20, %v7950_v28  ;;  %v2560_v59 = vmul.f32 %v2559_v13, %v7950_v28  ;;  %v3186_v56 = vmul.f32 %v3154_v48, %v1810_v37  ;;  %v8022_v5 = vmul.f32 0.5, %v7761_v33  ;;  %v8049_v37 = vld [vmem:[#allocation2 + $0x99] sm:$0xff] }
 0x267   : > { %3249 = vst.msk [vmem:[#allocation3 + $0x2c] sm:$0xf] %vm3237_vm6, %v3216_v46  ;;  %v5050_v63 = vpop.eup %5049  ;;  %v8025_v25 = vmul.f32 0.5, %v7867_v19  ;;  %v8028_v11 = vmul.f32 0.5, %v7758_v17  ;;  %v2198_v45 = vmul.f32 %v2197_v29, %v7832_v53  ;;  %v885_v21 = vmul.f32 %v8035_v26, %v5146_v3  ;;  %v855_v17 = vld [vmem:[#allocation2 + $0x89] sm:$0xff] }
 0x268   : > { %v2485_v16 = vmul.f32 %v5050_v63, %v7978_v23  ;;  %v2561_v52 = vadd.f32 0.4994258, %v2560_v59  ;;  %v1087_v33 = vadd.f32 %v991_v27, %v7886_v6  ;;  %v3218_v30 = vpack.c.bf16 %v3186_v56, %v3186_v56 }
 0x269   : > { %v2191_v19 = vmul.f32 %v2190_v62, %v7832_v53  ;;  %v2199_v60 = vadd.f32 0.112945676, %v2198_v45  ;;  %v993_v40 = vmul.f32 %v8001_v0, %v853_v35  ;;  %v2472_v61 = vadd.f32 1.1283791, %v2471_v49 }
 0x26a   : > { %v2486_v57 = vsub.f32 1.0, %v2485_v16  ;;  %v2550_v20 = vadd.f32 0.18741608, %v2549_v8  ;;  %v2562_v7 = vmul.f32 %v2561_v52, %v7950_v28  ;;  %v2493_v14 = vand.u32 2147483647, %v7978_v23  ;;  %v8056_v8 = vld [vmem:[#allocation2 + $0x77] sm:$0xff] }
 0x26b   : > { %v2495_v24 = vand.u32 2147483648, %v7978_v23  ;;  %3251 = vst.msk [vmem:[#allocation3 + $0x34] sm:$0xf] %vm3237_vm6, %v3218_v30  ;;  %v2200_v6 = vmul.f32 %v2199_v60, %v7832_v53  ;;  %v887_v43 = vmul.f32 %v8035_v26, %v853_v35  ;;  %vm2490_vm8 = vweird.f32 %v5050_v63  ;;  %v8066_v60 = vld [vmem:[#allocation2 + $0x87] sm:$0xff] }
 0x26c   : > { %v2487_v42 = vmul.f32 %v5050_v63, %v2486_v57  ;;  %v8047_v46 = vadd.f32 1.0, %v2562_v7  ;;  %v1197_v13 = vmul.f32 %v7703_v38, %v855_v17  ;;  %vm2489_vm9 = vweird.f32 %v7978_v23  ;;  %v5149_v7 = vld [vmem:[#allocation2 + $0xc9] sm:$0xff] }
 0x26d   : > { %v2192_v48 = vadd.f32 1.1283791, %v2191_v19  ;;  %v2201_v3 = vadd.f32 0.4994258, %v2200_v6  ;;  %v995_v27 = vmul.f32 %v8001_v0, %v855_v17  ;;  %v2551_v29 = vmul.f32 %v2550_v20, %v7950_v28  ;;  %vm2491_vm10 = vmor %vm2489_vm9, %vm2490_vm8 }
 0x26e   : > { %v2488_v62 = vadd.f32 %v5050_v63, %v2487_v42  ;;  %5051 = vrcp.f32 %v8047_v46  ;;  %v1089_v49 = vadd.f32 %v993_v40, %v885_v21  ;;  %v2496_v59 = vor.u32 1.1754944e-38, %v2495_v24  ;;  %v789_v24 = vld [vmem:[#allocation2 + $0x88] sm:$0xff]  ;;  %v9271_v42 = vld [vmem:[#allocation32_spill] sm:$0xff] }
 0x26f   : > { %v2202_v56 = vmul.f32 %v2201_v3, %v7832_v53  ;;  %v997_v45 = vmul.f32 %v8001_v0, %v8049_v37  ;;  %v1195_v23 = vmul.f32 %v7703_v38, %v853_v35  ;;  %v2473_v16 = vmul.f32 %v2472_v61, %v7786_v50  ;;  %v8077_v61 = vld [vmem:[#allocation2 + $0x78] sm:$0xff] }
 0x270   : > { %v2492_v52 = vsel %vm2491_vm10, %v5050_v63, %v2488_v62  ;;  %vm2494_vm11 = vcmp.eq.f32.partialorder %v2493_v14, 8.507059e+37  ;;  %v1293_v30 = vadd.f32 %v1197_v13, %v1089_v49  ;;  %v889_v21 = vmul.f32 %v8035_v26, %v855_v17  ;;  %v725_v63 = vld [vmem:[#allocation2 + $0x97] sm:$0xff] }
 0x271   : > { %v2497_v28 = vsel %vm2494_vm11, %v2496_v59, %v2492_v52  ;;  %v8063_v19 = vadd.f32 1.0, %v2202_v56  ;;  %v8070_v53 = vmul.f32 %v7851_v2, %v8056_v8  ;;  %v2552_v57 = vadd.f32 1.1283791, %v2551_v29  ;;  %v5151_v52 = vld [vmem:[#allocation2 + $0x159] sm:$0xff] }
 0x272   : > { %v2498_v40 = vmul.f32 %v2497_v28, %v2473_v16  ;;  %v8073_v35 = vmul.f32 %v2192_v48, %v7795_v12  ;;  %v8075_v50 = vadd.f32 %v995_v27, %v887_v43  ;;  %v8080_v20 = vadd.f32 %v997_v45, %v889_v21  ;;  %v5150_v16 = vld [vmem:[%s9099_s4 + $0x2] ss:$0 sm:$0xff] }
 0x273   : > { %5053 = vrcp.f32 %v8063_v19  ;;  %v8084_v17 = vmul.f32 %v7703_v38, %v8049_v37  ;;  %v8087_v14 = vmul.f32 %v5149_v7, %v7703_v38  ;;  %v8089_v43 = vadd.f32 %v1195_v23, %v1087_v33  ;;  %v5153_v28 = vld [vmem:[#allocation2 + $0x161] sm:$0xff]  ;;  %v5155_v7 = vld [vmem:[#allocation2 + $0x169] sm:$0xff] }
 0x274   : > { %v5052_v12 = vpop.eup %5051  ;;  %v4712_v6 = vclamps-f32 %v2498_v40, 1.0  ;;  %v8092_v13 = vmul.f32 %v9271_v42, %v1293_v30  ;;  %v8096_v48 = vmul.f32 %v7851_v2, %v8066_v60  ;;  %v2573_v27 = vand.u32 2147483647, %v8047_v46 }
 0x275   : > { %9270 = vst [vmem:[#allocation46_spill] sm:$0xff] %v8087_v14  ;;  %v2565_v3 = vmul.f32 %v5052_v12, %v8047_v46  ;;  %v8101_v62 = vmul.f32 %v7851_v2, %v725_v63  ;;  %v8105_v29 = vmul.f32 %v8011_v18, %v8077_v61  ;;  %v2553_v33 = vmul.f32 %v2552_v57, %v7905_v32  ;;  %v5152_v32 = vld [vmem:[%s9099_s4 + $0x5] ss:$0 sm:$0xff]  ;;  %v5154_v57 = vld [vmem:[%s9099_s4 + $0x8] ss:$0 sm:$0xff] }
 0x276   : > { %v3156_v49 = vadd.f32 1.0, %v4712_v6  ;;  %v8109_v59 = vmul.f32 %v8011_v18, %v789_v24  ;;  %v921_v56 = vmul.f32 %v7862_v51, %v8056_v8  ;;  %v2575_v23 = vand.u32 2147483648, %v8047_v46  ;;  %v9274_v14 = vld [vmem:[#allocation48_spill] sm:$0xff] }
 0x277   : > { %v2566_v45 = vsub.f32 1.0, %v2565_v3  ;;  %v3322_v30 = vmul.f32 %v5151_v52, %v5150_v16  ;;  %v3355_v21 = vmul.f32 %v5153_v28, %v5152_v32  ;;  %vm2569_vm12 = vweird.f32 %v8047_v46 }
 0x278   : > { %v3188_v40 = vmul.f32 %v3156_v49, %v8022_v5  ;;  %v3412_v6 = vmul.f32 %v5155_v7, %v5154_v57  ;;  %v923_v42 = vmul.f32 %v7862_v51, %v8066_v60  ;;  %vm2570_vm13 = vweird.f32 %v5052_v12 }
 0x279   : > { %v5054_v3 = vpop.eup %5053  ;;  %v2567_v16 = vmul.f32 %v5052_v12, %v2566_v45  ;;  %vm8127_vm14 = vcmp.eq.f32.partialorder %v2573_v27, 8.507059e+37  ;;  %v3379_v32 = vadd.f32 %v3355_v21, %v3322_v30  ;;  %v8133_v49 = vmul.f32 %v7862_v51, %v725_v63  ;;  %vm2571_vm15 = vmor %vm2569_vm12, %vm2570_vm13  ;;  %v3528_v21 = vpop.permute.xlu1 %3527 }
 0x27a   : > { %v3220_v28 = vpack.c.bf16 %v3188_v40, %v3188_v40  ;;  %v2205_v5 = vmul.f32 %v5054_v3, %v8063_v19  ;;  %v957_v57 = vmul.f32 %v7892_v54, %v8077_v61  ;;  %v2576_v47 = vor.u32 1.1754944e-38, %v2575_v23 }
 0x27b   : > { %v2568_v7 = vadd.f32 %v5052_v12, %v2567_v16  ;;  %v3436_v55 = vadd.f32 %v3412_v6, %v3379_v32  ;;  %v959_v45 = vmul.f32 %v7892_v54, %v789_v24  ;;  %v2213_v30 = vand.u32 2147483647, %v8063_v19 }
 0x27c   : > { %3253 = vst.msk [vmem:[#allocation3 + $0x3c] sm:$0xf] %vm3237_vm6, %v3220_v28  ;;  %v2206_v27 = vsub.f32 1.0, %v2205_v5  ;;  %v1025_v40 = vadd.f32 %v921_v56, %v7854_v1  ;;  %v1123_v4 = vmul.f32 %v7717_v22, %v8056_v8  ;;  %v2215_v23 = vand.u32 2147483648, %v8063_v19 }
 0x27d   : > { %v2572_v44 = vsel %vm2571_vm15, %v5052_v12, %v2568_v7  ;;  %v3540_v6 = vmul.f32 %v3528_v21, %v3436_v55  ;;  %v1125_v16 = vmul.f32 %v7717_v22, %v8066_v60  ;;  %vm2210_vm2 = vweird.f32 %v5054_v3  ;;  %v9275_v21 = vld [vmem:[#allocation6_spill] sm:$0xff] }
 0x27e   : > { %v2577_v46 = vsel %vm8127_vm14, %v2576_v47, %v2572_v44  ;;  %v2207_v32 = vmul.f32 %v5054_v3, %v2206_v27  ;;  %v1127_v28 = vmul.f32 %v7717_v22, %v725_v63  ;;  %v1027_v56 = vadd.f32 %v923_v42, %v8070_v53  ;;  %v5156_v63 = vld [vmem:[%s9100_s5] ss:$0 sm:$0xff] }
 0x27f   : > { %v2578_v5 = vmul.f32 %v2577_v46, %v2553_v33  ;;  %v3548_v1 = vadd.f32 %v3540_v6, %v9274_v14  ;;  %v1159_v8 = vmul.f32 %v7843_v41, %v8077_v61  ;;  %vm2209_vm3 = vweird.f32 %v8063_v19  ;;  %v8163_v61 = vld [vmem:[#allocation2 + $0x98] sm:$0xff]  ;;  %v8182_v46 = vld [vmem:[#allocation2 + $0xd0] sm:$0xff] }
 0x280   : > { %v2208_v12 = vadd.f32 %v5054_v3, %v2207_v32  ;;  %v1161_v55 = vmul.f32 %v7843_v41, %v789_v24  ;;  %v1227_v60 = vadd.f32 %v1123_v4, %v7898_v31  ;;  %vm2211_vm4 = vmor %vm2209_vm3, %vm2210_vm2  ;;  %v2216_v47 = vor.u32 1.1754944e-38, %v2215_v23 }
 0x281   : > { %v4714_v44 = vclamps-f32 %v2578_v5, 1.0  ;;  %v8161_v14 = vadd.f32 %v5156_v63, %v3548_v1  ;;  %v1229_v53 = vadd.f32 %v1125_v16, %v1025_v40  ;;  %vm2214_vm5 = vcmp.eq.f32.partialorder %v2213_v30, 8.507059e+37  ;;  %v9276_v40 = vld [vmem:[#allocation4_spill] sm:$0xff]  ;;  %v8173_v30 = vld [vmem:[#allocation2 + $0xcf] sm:$0xff]  ;;  %v9277_v16 = vld [vmem:[#allocation23_spill] sm:$0xff] }
 0x282   : > { %v2212_v33 = vsel %vm2211_vm4, %v5054_v3, %v2208_v12  ;;  %v1057_v19 = vadd.f32 %v957_v57, %v7883_v9  ;;  %v1231_v42 = vadd.f32 %v1127_v28, %v1027_v56  ;;  %v1259_v4 = vadd.f32 %v1159_v8, %v7974_v39 }
 0x283   : > { %v3158_v24 = vadd.f32 1.0, %v4714_v44  ;;  %v2217_v52 = vsel %vm2214_vm5, %v2216_v47, %v2212_v33  ;;  %v8167_v31 = vmul.f32 0.70710677, %v8161_v14  ;;  %v1515_v23 = vmul.f32 %v9275_v21, %v1227_v60  ;;  %v8190_v60 = vld [vmem:[#allocation2 + $0xa7] sm:$0xff] }
 0x284   : > { %v2218_v7 = vmul.f32 %v2217_v52, %v8073_v35  ;;  %v1261_v27 = vadd.f32 %v1161_v55, %v1057_v19  ;;  %v1517_v3 = vmul.f32 %v9276_v40, %v1229_v53  ;;  %v1163_v57 = vmul.f32 %v7843_v41, %v8163_v61  ;;  %v9279_v53 = vld [vmem:[#allocation29_spill] sm:$0xff] }
 0x285   : > { %v3190_v6 = vmul.f32 %v3158_v24, %v8025_v25  ;;  %v3818_v9 = vmul.f32 %v8167_v31, %v8167_v31  ;;  %v1707_v39 = vmul.f32 %v9277_v16, %v8089_v43  ;;  %v1059_v32 = vadd.f32 %v959_v45, %v8105_v29  ;;  %v9278_v25 = vld [vmem:[#allocation9_spill] sm:$0xff] }
 0x286   : > { %v4705_v35 = vclamps-f32 %v2218_v7, 1.0  ;;  %v1547_v28 = vadd.f32 %v1515_v23, %v1259_v4  ;;  %v1549_v5 = vadd.f32 %v1517_v3, %v1261_v27  ;;  %v1519_v8 = vmul.f32 %v9278_v25, %v1231_v42  ;;  %v8200_v19 = vld [vmem:[#allocation2 + $0xa9] sm:$0xff]  ;;  %v9281_v3 = vld [vmem:[#allocation36_spill] sm:$0xff] }
 0x287   : > { %v3222_v1 = vpack.c.bf16 %v3190_v6, %v3190_v6  ;;  %v8185_v56 = vmin.f32 %v3818_v9, 16.0  ;;  %v766_v12 = vmul.f32 %v7851_v2, %v8173_v30  ;;  %v832_v47 = vmul.f32 %v8011_v18, %v8182_v46  ;;  %v9280_v27 = vld [vmem:[#allocation30_spill] sm:$0xff] }
 0x288   : > { %v3149_v55 = vadd.f32 1.0, %v4705_v35  ;;  %v1739_v44 = vadd.f32 %v1707_v39, %v1547_v28  ;;  %v1741_v43 = vadd.f32 %v8092_v13, %v1549_v5  ;;  %v1263_v63 = vadd.f32 %v1163_v57, %v1059_v32  ;;  %v9282_v32 = vld [vmem:[#allocation33_spill] sm:$0xff] }
 0x289   : > { %3255 = vst.msk [vmem:[#allocation3 + $0x44] sm:$0xf] %vm3237_vm6, %v3222_v1  ;;  %v3820_v29 = vmul.f32 2.1237322e-06, %v8185_v56  ;;  %v3831_v45 = vmul.f32 3.8918573e-05, %v8185_v56  ;;  %v1038_v33 = vadd.f32 %v9279_v53, %v766_v12  ;;  %v1295_v42 = vadd.f32 %v8084_v17, %v8075_v50 }
 0x28a   : > { %v3181_v2 = vmul.f32 %v3149_v55, %v8028_v11  ;;  %v8205_v13 = vadd.f32 %v7736_v34, %v1739_v44  ;;  %v8208_v24 = vadd.f32 %v7736_v34, %v1741_v43  ;;  %v961_v7 = vmul.f32 %v7892_v54, %v8163_v61  ;;  %v8230_v1 = vld [vmem:[#allocation2 + $0xa8] sm:$0xff] }
 0x28b   : > { %v3821_v52 = vadd.f32 0.00028619796, %v3820_v29  ;;  %v3832_v4 = vadd.f32 0.001143296, %v3831_v45  ;;  %v1070_v21 = vadd.f32 %v9280_v27, %v832_v47  ;;  %v1129_v11 = vmul.f32 %v7717_v22, %v8190_v60 }
 0x28c   : > { %v3213_v23 = vpack.c.bf16 %v3181_v2, %v3181_v2  ;;  %v1551_v40 = vadd.f32 %v1519_v8, %v1263_v63  ;;  %v1711_v50 = vmul.f32 %v9281_v3, %v1295_v42  ;;  %v1201_v17 = vmul.f32 %v7703_v38, %v8200_v19  ;;  %v8263_v3 = vld [vmem:[#allocation2 + $0xb9] sm:$0xff] }
 0x28d   : > { %v3822_v6 = vmul.f32 %v3821_v52, %v8185_v56  ;;  %v3833_v9 = vmul.f32 %v3832_v4, %v8185_v56  ;;  %v8221_v57 = vmul.f32 0.70710677, %v8205_v13  ;;  %v1029_v16 = vadd.f32 %v8133_v49, %v8096_v48  ;;  %v9283_v49 = vld [vmem:[#allocation18_spill] sm:$0xff] }
 0x28e   : > { %3246 = vst.msk [vmem:[#allocation3 + $0x20] sm:$0xf] %vm3237_vm6, %v3213_v23  ;;  %v1743_v39 = vadd.f32 %v1711_v50, %v1551_v40  ;;  %v8227_v35 = vmul.f32 0.70710677, %v8208_v24  ;;  %v1242_v28 = vadd.f32 %v9282_v32, %v1038_v33  ;;  %v1274_v8 = vadd.f32 %v7846_v10, %v1070_v21  ;;  %v9284_v21 = vld [vmem:[#allocation10_spill] sm:$0xff] }
 0x28f   : > { %v3823_v5 = vadd.f32 0.0036580483, %v3822_v6  ;;  %v3834_v38 = vadd.f32 0.014752088, %v3833_v9  ;;  %v2261_v25 = vmul.f32 %v8221_v57, %v8221_v57  ;;  %v1233_v12 = vadd.f32 %v1129_v11, %v1029_v16  ;;  %v8271_v32 = vld [vmem:[#allocation2 + $0xb7] sm:$0xff] }
 0x290   : > { %v8236_v55 = vadd.f32 %v7736_v34, %v1743_v39  ;;  %v2341_v48 = vmul.f32 %v8227_v35, %v8227_v35  ;;  %v1530_v44 = vmul.f32 %v9283_v49, %v1242_v28  ;;  %v1297_v43 = vadd.f32 %v1201_v17, %v8080_v20  ;;  %v8281_v49 = vld [vmem:[#allocation2 + $0xb8] sm:$0xff] }
 0x291   : > { %v3824_v47 = vmul.f32 %v3823_v5, %v8185_v56  ;;  %v3835_v29 = vmul.f32 %v3834_v38, %v8185_v56  ;;  %v8244_v45 = vmin.f32 %v2261_v25, 16.0  ;;  %v999_v10 = vmul.f32 %v8001_v0, %v8200_v19 }
 0x292   : > { %v1165_v63 = vmul.f32 %v7843_v41, %v8230_v1  ;;  %v8251_v53 = vmul.f32 0.70710677, %v8236_v55  ;;  %v8253_v33 = vmin.f32 %v2341_v48, 16.0  ;;  %v8256_v52 = vadd.f32 %v1530_v44, %v1274_v8  ;;  %v8286_v44 = vld [vmem:[%s9099_s4 + $0x8] ss:$0 sm:$0xff] }
 0x293   : > { %v3825_v2 = vadd.f32 0.05243302, %v3824_v47  ;;  %v3836_v42 = vadd.f32 0.112945676, %v3835_v29  ;;  %v2263_v20 = vmul.f32 2.1237322e-06, %v8244_v45  ;;  %v891_v4 = vmul.f32 %v8035_v26, %v8049_v37 }
 0x294   : > { %v1061_v27 = vadd.f32 %v961_v7, %v8109_v59  ;;  %v1521_v23 = vmul.f32 %v9284_v21, %v1233_v12  ;;  %v2274_v11 = vmul.f32 3.8918573e-05, %v8244_v45  ;;  %v1713_v50 = vmul.f32 %v7479_v58, %v1297_v43 }
 0x295   : > { %v4889_v40 = vld [vmem:[#allocation3 + $0x20] sm:$0xff]  ;;  %v3826_v17 = vmul.f32 %v3825_v2, %v8185_v56  ;;  %v3837_v6 = vmul.f32 %v3836_v42, %v8185_v56  ;;  %v2264_v9 = vadd.f32 0.00028619796, %v2263_v20  ;;  %v2343_v37 = vmul.f32 2.1237322e-06, %v8253_v33 }
 0x296   : > { %v1265_v16 = vadd.f32 %v1165_v63, %v1061_v27  ;;  %v2275_v39 = vadd.f32 0.001143296, %v2274_v11  ;;  %v2354_v59 = vmul.f32 3.8918573e-05, %v8253_v33  ;;  %4843 = vmatmul.msk.bf16.gmra.mxu1 %vm655_vm1, %v4889_v40  ;;  %v927_v28 = vmul.f32 %v7862_v51, %v8190_v60 }
 0x297   : > { %v3838_v7 = vadd.f32 0.4994258, %v3837_v6  ;;  %v2265_v58 = vmul.f32 %v2264_v9, %v8244_v45  ;;  %v2421_v5 = vmul.f32 %v8251_v53, %v8251_v53  ;;  %v3827_v38 = vadd.f32 0.18741608, %v3826_v17  ;;  %v1438_v17 = vpop.permute.xlu1 %1437 }
 0x298   : > { %v963_v25 = vmul.f32 %v7892_v54, %v8230_v1  ;;  %v1095_v8 = vadd.f32 %v999_v10, %v891_v4  ;;  %v1553_v12 = vadd.f32 %v1521_v23, %v1265_v16  ;;  %v1203_v43 = vmul.f32 %v8286_v44, %v8263_v3 }
 0x299   : > { %v3839_v48 = vmul.f32 %v3838_v7, %v8185_v56  ;;  %v2266_v47 = vadd.f32 0.0036580483, %v2265_v58  ;;  %v2276_v29 = vmul.f32 %v2275_v39, %v8244_v45  ;;  %v1131_v54 = vmul.f32 %v7717_v22, %v8271_v32 }
 0x29a   : > { %v1745_v10 = vadd.f32 %v1713_v50, %v1553_v12  ;;  %v2344_v63 = vadd.f32 0.00028619796, %v2343_v37  ;;  %v2355_v2 = vadd.f32 0.001143296, %v2354_v59  ;;  %v8296_v27 = vmin.f32 %v2421_v5, 16.0  ;;  %v1643_v37 = vpop.permute.xlu0 %1642 }
 0x29b   : > { %v8293_v42 = vadd.f32 1.0, %v3839_v48  ;;  %v2267_v20 = vmul.f32 %v2266_v47, %v8244_v45  ;;  %v2277_v4 = vadd.f32 0.014752088, %v2276_v29  ;;  %v3828_v21 = vmul.f32 %v3827_v38, %v8185_v56 }
 0x29c   : > { %v825_v23 = vmul.f32 %v8011_v18, %v8163_v61  ;;  %v1031_v11 = vadd.f32 %v927_v28, %v8101_v62  ;;  %v1167_v22 = vmul.f32 %v7843_v41, %v8281_v49  ;;  %v8306_v40 = vmul.f32 %v8035_v26, %v8200_v19 }
 0x29d   : > { %v8310_v50 = vmul.f32 %v8001_v0, %v8263_v3  ;;  %5055 = vrcp.f32 %v8293_v42  ;;  %v1299_v56 = vadd.f32 %v1203_v43, %v1095_v8  ;;  %v8314_v61 = vadd.f32 %v7736_v34, %v1745_v10 }
 0x29e   : > { %v1063_v6 = vadd.f32 %v963_v25, %v825_v23  ;;  %v1235_v9 = vadd.f32 %v1131_v54, %v1031_v11  ;;  %v2278_v62 = vmul.f32 %v2277_v4, %v8244_v45  ;;  %v2268_v41 = vadd.f32 0.05243302, %v2267_v20 }
 0x29f   : > { %v2345_v16 = vmul.f32 %v2344_v63, %v8253_v33  ;;  %v2356_v19 = vmul.f32 %v2355_v2, %v8253_v33  ;;  %v2423_v39 = vmul.f32 2.1237322e-06, %v8296_v27  ;;  %v3829_v59 = vadd.f32 1.1283791, %v3828_v21 }
 0x2a0   : > { %v1267_v7 = vadd.f32 %v1167_v22, %v1063_v6  ;;  %v1523_v28 = vmul.f32 %v1438_v17, %v1235_v9  ;;  %v2279_v58 = vadd.f32 0.112945676, %v2278_v62  ;;  %v1715_v5 = vmul.f32 %v1643_v37, %v1299_v56 }
 0x2a1   : > { %v2346_v38 = vadd.f32 0.0036580483, %v2345_v16  ;;  %v2357_v25 = vadd.f32 0.014752088, %v2356_v19  ;;  %v2424_v8 = vadd.f32 0.00028619796, %v2423_v39  ;;  %vm3846_vm7 = vweird.f32 %v8293_v42 }
 0x2a2   : > { %v8322_v34 = vmul.f32 0.70710677, %v8314_v61  ;;  %v2280_v12 = vmul.f32 %v2279_v58, %v8244_v45  ;;  %v2434_v48 = vmul.f32 3.8918573e-05, %v8296_v27  ;;  %v2269_v47 = vmul.f32 %v2268_v41, %v8244_v45 }
 0x2a3   : > { %v5056_v43 = vpop.eup %5055  ;;  %v2347_v29 = vmul.f32 %v2346_v38, %v8253_v33  ;;  %v2358_v54 = vmul.f32 %v2357_v25, %v8253_v33  ;;  %v2425_v10 = vmul.f32 %v2424_v8, %v8296_v27  ;;  %v3850_v2 = vand.u32 2147483647, %v8293_v42 }
 0x2a4   : > { %v3842_v63 = vmul.f32 %v5056_v43, %v8293_v42  ;;  %v3852_v20 = vand.u32 2147483648, %v8293_v42  ;;  %v1555_v4 = vadd.f32 %v1523_v28, %v1267_v7  ;;  %vm3847_vm8 = vweird.f32 %v5056_v43 }
 0x2a5   : > { %v2281_v21 = vadd.f32 0.4994258, %v2280_v12  ;;  %v2348_v23 = vadd.f32 0.05243302, %v2347_v29  ;;  %v2359_v11 = vadd.f32 0.112945676, %v2358_v54  ;;  %v2501_v6 = vmul.f32 %v8322_v34, %v8322_v34  ;;  %vm8344_vm9 = vmor %vm3846_vm7, %vm3847_vm8 }
 0x2a6   : > { %v3843_v22 = vsub.f32 1.0, %v3842_v63  ;;  %v2426_v17 = vadd.f32 0.0036580483, %v2425_v10  ;;  %v2435_v56 = vadd.f32 0.001143296, %v2434_v48  ;;  %v3830_v9 = vmul.f32 %v3829_v59, %v8167_v31 }
 0x2a7   : > { %v2270_v62 = vadd.f32 0.18741608, %v2269_v47  ;;  %v2282_v41 = vmul.f32 %v2281_v21, %v8244_v45  ;;  %v2360_v16 = vmul.f32 %v2359_v11, %v8253_v33  ;;  %v3853_v39 = vor.u32 1.1754944e-38, %v3852_v20 }
 0x2a8   : > { %v3844_v19 = vmul.f32 %v5056_v43, %v3843_v22  ;;  %v2436_v37 = vmul.f32 %v2435_v56, %v8296_v27  ;;  %v8339_v7 = vmin.f32 %v2501_v6, 16.0  ;;  %v2349_v31 = vmul.f32 %v2348_v23, %v8253_v33 }
 0x2a9   : > { %v8348_v58 = vadd.f32 1.0, %v2282_v41  ;;  %v2361_v59 = vadd.f32 0.4994258, %v2360_v16  ;;  %v2427_v38 = vmul.f32 %v2426_v17, %v8296_v27  ;;  %vm3851_vm10 = vcmp.eq.f32.partialorder %v3850_v2, 8.507059e+37 }
 0x2aa   : > { %v3845_v25 = vadd.f32 %v5056_v43, %v3844_v19  ;;  %v1747_v8 = vadd.f32 %v1715_v5, %v1555_v4  ;;  %v2437_v12 = vadd.f32 0.014752088, %v2436_v37  ;;  %v895_v48 = vmul.f32 %v8035_v26, %v8263_v3  ;;  %v8369_v4 = vld [vmem:[%s9100_s5] ss:$0 sm:$0xff] }
 0x2ab   : > { %v2271_v42 = vmul.f32 %v2270_v62, %v8244_v45  ;;  %5057 = vrcp.f32 %v8348_v58  ;;  %v2503_v47 = vmul.f32 2.1237322e-06, %v8339_v7  ;;  %v8359_v29 = vadd.f32 %v8310_v50, %v8306_v40 }
 0x2ac   : > { %v3568_v54 = vmul.f32 0.5, %v8161_v14  ;;  %v3849_v10 = vsel %vm8344_vm9, %v5056_v43, %v3845_v25  ;;  %v2362_v5 = vmul.f32 %v2361_v59, %v8253_v33  ;;  %v2350_v2 = vadd.f32 0.18741608, %v2349_v31  ;;  %v9287_v43 = vld [vmem:[#allocation27_spill] sm:$0xff] }
 0x2ad   : > { %v3854_v63 = vsel %vm3851_vm10, %v3853_v39, %v3849_v10  ;;  %v2428_v3 = vadd.f32 0.05243302, %v2427_v38  ;;  %v2438_v45 = vmul.f32 %v2437_v12, %v8296_v27  ;;  %v8372_v40 = vadd.f32 %v8369_v4, %v1747_v8 }
 0x2ae   : > { %v3855_v20 = vmul.f32 %v3854_v63, %v3830_v9  ;;  %v8375_v14 = vmul.f32 0.5, %v8205_v13  ;;  %v8377_v50 = vadd.f32 1.0, %v2362_v5  ;;  %v8380_v21 = vadd.f32 %v9287_v43, %v895_v48 }
 0x2af   : > { %v2272_v23 = vadd.f32 1.1283791, %v2271_v42  ;;  %v2439_v11 = vadd.f32 0.112945676, %v2438_v45  ;;  %v2504_v22 = vadd.f32 0.00028619796, %v2503_v47  ;;  %v2351_v13 = vmul.f32 %v2350_v2, %v8253_v33 }
 0x2b0   : > { %v4735_v17 = vclamps-f32 %v3855_v20, 1.0  ;;  %v8383_v56 = vmul.f32 0.5, %v8208_v24  ;;  %5059 = vrcp.f32 %v8377_v50  ;;  %v2514_v6 = vmul.f32 3.8918573e-05, %v8339_v7 }
 0x2b1   : > { %v5058_v9 = vpop.eup %5057  ;;  %v2429_v62 = vmul.f32 %v2428_v3, %v8296_v27  ;;  %v2440_v41 = vmul.f32 %v2439_v11, %v8296_v27  ;;  %v8392_v16 = vmul.f32 %v7862_v51, %v8173_v30  ;;  %v8395_v39 = vmul.f32 0.70710677, %v8372_v40 }
 0x2b2   : > { %v3904_v19 = vadd.f32 1.0, %v4735_v17  ;;  %v2285_v24 = vmul.f32 %v5058_v9, %v8348_v58  ;;  %v2505_v37 = vmul.f32 %v2504_v22, %v8339_v7  ;;  %v2273_v28 = vmul.f32 %v2272_v23, %v8221_v57 }
 0x2b3   : > { %v2293_v33 = vand.u32 2147483647, %v8348_v58  ;;  %v2295_v31 = vand.u32 2147483648, %v8348_v58  ;;  %v2441_v59 = vadd.f32 0.4994258, %v2440_v41  ;;  %vm2290_vm11 = vweird.f32 %v5058_v9 }
 0x2b4   : > { %v3912_v38 = vmul.f32 %v3904_v19, %v3568_v54  ;;  %v2286_v25 = vsub.f32 1.0, %v2285_v24  ;;  %v2506_v8 = vadd.f32 0.0036580483, %v2505_v37  ;;  %v2515_v51 = vadd.f32 0.001143296, %v2514_v6 }
 0x2b5   : > { %v2352_v12 = vadd.f32 1.1283791, %v2351_v13  ;;  %v2430_v48 = vadd.f32 0.18741608, %v2429_v62  ;;  %v2442_v42 = vmul.f32 %v2441_v59, %v8296_v27  ;;  %vm8405_vm12 = vcmp.eq.f32.partialorder %v2293_v33, 8.507059e+37 }
 0x2b6   : > { %v5060_v47 = vpop.eup %5059  ;;  %v3920_v10 = vpack.c.bf16 %v3912_v38, %v3912_v38  ;;  %v2287_v5 = vmul.f32 %v5058_v9, %v2286_v25  ;;  %v2507_v63 = vmul.f32 %v2506_v8, %v8339_v7  ;;  %v2516_v57 = vmul.f32 %v2515_v51, %v8339_v7 }
 0x2b7   : > { %v2296_v54 = vor.u32 1.1754944e-38, %v2295_v31  ;;  %v2365_v3 = vmul.f32 %v5060_v47, %v8377_v50  ;;  %v8410_v45 = vadd.f32 1.0, %v2442_v42  ;;  %vm2289_vm13 = vweird.f32 %v8348_v58 }
 0x2b8   : > { %3928 = vst.msk [vmem:[#allocation3 + $0x98] sm:$0xf] %vm3237_vm6, %v3920_v10  ;;  %v2288_v20 = vadd.f32 %v5058_v9, %v2287_v5  ;;  %v2373_v43 = vand.u32 2147483647, %v8377_v50  ;;  %v2517_v23 = vadd.f32 0.014752088, %v2516_v57  ;;  %vm2291_vm14 = vmor %vm2289_vm13, %vm2290_vm11  ;;  %v2431_v17 = vmul.f32 %v2430_v48, %v8296_v27 }
 0x2b9   : > { %v2366_v11 = vsub.f32 1.0, %v2365_v3  ;;  %v2375_v22 = vand.u32 2147483648, %v8377_v50  ;;  %5061 = vrcp.f32 %v8410_v45  ;;  %v2353_v13 = vmul.f32 %v2352_v12, %v8227_v35 }
 0x2ba   : > { %v2292_v6 = vsel %vm2291_vm14, %v5058_v9, %v2288_v20  ;;  %v2508_v62 = vadd.f32 0.05243302, %v2507_v63  ;;  %v2518_v41 = vmul.f32 %v2517_v23, %v8339_v7  ;;  %vm2370_vm15 = vweird.f32 %v5060_v47 }
 0x2bb   : > { %v2297_v58 = vsel %vm8405_vm12, %v2296_v54, %v2292_v6  ;;  %v2367_v19 = vmul.f32 %v5060_v47, %v2366_v11  ;;  %v2581_v24 = vmul.f32 %v8395_v39, %v8395_v39  ;;  %vm2369_vm2 = vweird.f32 %v8377_v50  ;;  %v8437_v50 = vld [vmem:[%s9099_s4 + $0x4] ss:$0 sm:$0xff] }
 0x2bc   : > { %v2298_v37 = vmul.f32 %v2297_v58, %v2273_v28  ;;  %vm8426_vm3 = vcmp.eq.f32.partialorder %v2373_v43, 8.507059e+37  ;;  %v2519_v9 = vadd.f32 0.112945676, %v2518_v41  ;;  %v2376_v33 = vor.u32 1.1754944e-38, %v2375_v22  ;;  %vm2371_vm4 = vmor %vm2369_vm2, %vm2370_vm15 }
 0x2bd   : > { %v2368_v35 = vadd.f32 %v5060_v47, %v2367_v19  ;;  %v2432_v31 = vadd.f32 1.1283791, %v2431_v17  ;;  %v8430_v59 = vmin.f32 %v2581_v24, 16.0  ;;  %v2509_v25 = vmul.f32 %v2508_v62, %v8339_v7 }
 0x2be   : > { %v4707_v38 = vclamps-f32 %v2298_v37, 1.0  ;;  %v2520_v8 = vmul.f32 %v2519_v9, %v8339_v7  ;;  %v968_v28 = vmul.f32 %v8437_v50, %v8182_v46  ;;  %v2453_v48 = vand.u32 2147483647, %v8410_v45 }
 0x2bf   : > { %v5062_v51 = vpop.eup %5061  ;;  %v2372_v12 = vsel %vm2371_vm4, %v5060_v47, %v2368_v35  ;;  %v2583_v42 = vmul.f32 2.1237322e-06, %v8430_v59  ;;  %v2594_v10 = vmul.f32 3.8918573e-05, %v8430_v59  ;;  %v2455_v57 = vand.u32 2147483648, %v8410_v45 }
 0x2c0   : > { %v2377_v5 = vsel %vm8426_vm3, %v2376_v33, %v2372_v12  ;;  %v2445_v63 = vmul.f32 %v5062_v51, %v8410_v45  ;;  %v1036_v2 = vadd.f32 %v8392_v16, %v8006_v36  ;;  %v2521_v3 = vadd.f32 0.4994258, %v2520_v8  ;;  %v9292_v16 = vld [vmem:[#allocation31_spill] sm:$0xff] }
 0x2c1   : > { %v2378_v54 = vmul.f32 %v2377_v5, %v2353_v13  ;;  %v2584_v20 = vadd.f32 0.00028619796, %v2583_v42  ;;  %v2595_v47 = vadd.f32 0.001143296, %v2594_v10  ;;  %v2510_v23 = vadd.f32 0.18741608, %v2509_v25 }
 0x2c2   : > { %v2446_v43 = vsub.f32 1.0, %v2445_v63  ;;  %v3151_v11 = vadd.f32 1.0, %v4707_v38  ;;  %v1068_v22 = vadd.f32 %v968_v28, %v8015_v15  ;;  %v2522_v6 = vmul.f32 %v2521_v3, %v8339_v7  ;;  %v9294_v12 = vld [vmem:[#allocation35_spill] sm:$0xff]  ;;  %v9295_v42 = vld [vmem:[#allocation12_spill] sm:$0xff] }
 0x2c3   : > { %v4709_v17 = vclamps-f32 %v2378_v54, 1.0  ;;  %v2585_v62 = vmul.f32 %v2584_v20, %v8430_v59  ;;  %v2596_v41 = vmul.f32 %v2595_v47, %v8430_v59  ;;  %vm2450_vm5 = vweird.f32 %v5062_v51  ;;  %v8475_v20 = vld [vmem:[#allocation2 + $0xb1] sm:$0xff] }
 0x2c4   : > { %v2447_v58 = vmul.f32 %v5062_v51, %v2446_v43  ;;  %v3183_v36 = vmul.f32 %v3151_v11, %v8375_v14  ;;  %v1240_v13 = vadd.f32 %v9292_v16, %v1036_v2  ;;  %v8456_v19 = vadd.f32 1.0, %v2522_v6  ;;  %v8479_v47 = vld [vmem:[#allocation2 + $0xd1] sm:$0xff] }
 0x2c5   : > { %v2586_v24 = vadd.f32 0.0036580483, %v2585_v62  ;;  %v2597_v37 = vadd.f32 0.014752088, %v2596_v41  ;;  %v3153_v27 = vadd.f32 1.0, %v4709_v17  ;;  %v2433_v15 = vmul.f32 %v2432_v31, %v8251_v53  ;;  %v9293_v53 = vld [vmem:[#allocation26_spill] sm:$0xff] }
 0x2c6   : > { %v2448_v9 = vadd.f32 %v5062_v51, %v2447_v58  ;;  %vm2449_vm7 = vweird.f32 %v8410_v45  ;;  %v3215_v35 = vpack.c.bf16 %v3183_v36, %v3183_v36  ;;  %vm2454_vm9 = vcmp.eq.f32.partialorder %v2453_v48, 8.507059e+37  ;;  %v9296_v6 = vld [vmem:[#allocation46_spill] sm:$0xff]  ;;  %v9297_v41 = vld [vmem:[#allocation13_spill] sm:$0xff] }
 0x2c7   : > { %vm2451_vm8 = vmor %vm2449_vm7, %vm2450_vm5  ;;  %v2456_v33 = vor.u32 1.1754944e-38, %v2455_v57  ;;  %v2511_v38 = vmul.f32 %v2510_v23, %v8339_v7  ;;  %5063 = vrcp.f32 %v8456_v19  ;;  %v2587_v25 = vmul.f32 %v2586_v24, %v8430_v59  ;;  %v8470_v7 = vld [vmem:[#allocation2 + $0xc1] sm:$0xff] }
 0x2c8   : > { %v2452_v14 = vsel %vm2451_vm8, %v5062_v51, %v2448_v9  ;;  %v2598_v8 = vmul.f32 %v2597_v37, %v8430_v59  ;;  %v3185_v28 = vmul.f32 %v3153_v27, %v8383_v56  ;;  %3248 = vst.msk [vmem:[#allocation3 + $0x28] sm:$0xf] %vm3237_vm6, %v3215_v35  ;;  %v1303_v45 = vadd.f32 %v9293_v53, %v8380_v21  ;;  %v5160_v56 = vld [vmem:[#allocation2 + $0xa1] sm:$0xff] }
 0x2c9   : > { %v2457_v31 = vsel %vm2454_vm9, %v2456_v33, %v2452_v14  ;;  %v1272_v48 = vadd.f32 %v9294_v12, %v1068_v22  ;;  %v1528_v10 = vmul.f32 %v9295_v42, %v1240_v13  ;;  %v2588_v51 = vadd.f32 0.05243302, %v2587_v25  ;;  %v1647_v33 = vpop.permute.xlu1 %1646  ;;  %v8508_v14 = vld [vmem:[#allocation2 + $0xc7] sm:$0xff] }
 0x2ca   : > { %v2458_v5 = vmul.f32 %v2457_v31, %v2433_v15  ;;  %v2599_v63 = vadd.f32 0.112945676, %v2598_v8  ;;  %v3217_v57 = vpack.c.bf16 %v3185_v28, %v3185_v28  ;;  %v2512_v2 = vadd.f32 1.1283791, %v2511_v38  ;;  %v8522_v42 = vld [vmem:[#allocation2 + $0xc8] sm:$0xff] }
 0x2cb   : > { %v8472_v54 = vadd.f32 %v1528_v10, %v1272_v48  ;;  %v892_v3 = vmul.f32 %v5160_v56, %v8035_v26  ;;  %v1000_v21 = vmul.f32 %v8475_v20, %v8001_v0  ;;  %v2589_v23 = vmul.f32 %v2588_v51, %v8430_v59  ;;  %v8496_v0 = vld [vmem:[%s9099_s4] ss:$0 sm:$0xff]  ;;  %v5164_v56 = vld [vmem:[#allocation2 + $0xd7] sm:$0xff] }
 0x2cc   : > { %v4711_v43 = vclamps-f32 %v2458_v5, 1.0  ;;  %v2600_v11 = vmul.f32 %v2599_v63, %v8430_v59  ;;  %3250 = vst.msk [vmem:[#allocation3 + $0x30] sm:$0xf] %vm3237_vm6, %v3217_v57  ;;  %v1204_v22 = vmul.f32 %v8286_v44, %v8470_v7  ;;  %v8488_v62 = vadd.f32 %v9296_v6, %v8359_v29  ;;  %v9298_v5 = vld [vmem:[#allocation34_spill] sm:$0xff]  ;;  %v8529_v63 = vld [vmem:[%s9099_s4 + $0x3] ss:$0 sm:$0xff] }
 0x2cd   : > { %v5064_v17 = vpop.eup %5063  ;;  %v8491_v58 = vmul.f32 %v9297_v41, %v1303_v45  ;;  %v763_v36 = vmul.f32 %v8496_v0, %v8271_v32  ;;  %v1096_v16 = vadd.f32 %v1000_v21, %v892_v3  ;;  %v829_v13 = vmul.f32 %v8011_v18, %v8281_v49 }
 0x2ce   : > { %v2525_v24 = vmul.f32 %v5064_v17, %v8456_v19  ;;  %v2601_v37 = vadd.f32 0.4994258, %v2600_v11  ;;  %v8505_v29 = vmul.f32 %v8035_v26, %v8479_v47  ;;  %v1811_v27 = vmul.f32 0.5, %v8236_v55 }
 0x2cf   : > { %v2590_v15 = vadd.f32 0.18741608, %v2589_v23  ;;  %v3155_v9 = vadd.f32 1.0, %v4711_v43  ;;  %v4890_v35 = vld [vmem:[#allocation3 + $0x28] sm:$0xff]  ;;  %v1300_v38 = vadd.f32 %v1204_v22, %v1096_v16  ;;  %v8511_v25 = vmul.f32 0.5, %v8314_v61  ;;  %v5165_v23 = vld [vmem:[#allocation2 + $0xd8] sm:$0xff] }
 0x2d0   : > { %v2513_v8 = vmul.f32 %v2512_v2, %v8322_v34  ;;  %v2526_v28 = vsub.f32 1.0, %v2525_v24  ;;  %v2602_v53 = vmul.f32 %v2601_v37, %v8430_v59  ;;  %v2533_v26 = vand.u32 2147483647, %v8456_v19  ;;  %4844 = vmatmul.msk.bf16.gmra.mxu1 %vm655_vm1, %v4890_v35  ;;  %v5166_v24 = vld [vmem:[#allocation2 + $0xaf] sm:$0xff]  ;;  %v8557_v35 = vld [vmem:[%s9099_s4 + $0x1] ss:$0 sm:$0xff] }
 0x2d1   : > { %v2535_v45 = vand.u32 2147483648, %v8456_v19  ;;  %v3187_v55 = vmul.f32 %v3155_v9, %v1811_v27  ;;  %v1716_v31 = vmul.f32 %v1647_v33, %v1300_v38  ;;  %vm2530_vm10 = vweird.f32 %v5064_v17  ;;  %v5168_v33 = vld [vmem:[#allocation2 + $0xb0] sm:$0xff] }
 0x2d2   : > { %v2527_v12 = vmul.f32 %v5064_v17, %v2526_v28  ;;  %v8518_v48 = vadd.f32 1.0, %v2602_v53  ;;  %v765_v61 = vmul.f32 %v8496_v0, %v8508_v14  ;;  %v2591_v34 = vmul.f32 %v2590_v15, %v8430_v59  ;;  %v5169_v28 = vld [vmem:[#allocation2 + $0xbf] sm:$0xff] }
 0x2d3   : > { %v3219_v10 = vpack.c.bf16 %v3187_v55, %v3187_v55  ;;  %v1748_v51 = vadd.f32 %v1716_v31, %v9298_v5  ;;  %v931_v57 = vmul.f32 %v8529_v63, %v8508_v14  ;;  %vm2529_vm11 = vweird.f32 %v8456_v19  ;;  %v8576_v55 = vld [vmem:[%s9099_s4 + $0x7] ss:$0 sm:$0xff] }
 0x2d4   : > { %v2528_v2 = vadd.f32 %v5064_v17, %v2527_v12  ;;  %5065 = vrcp.f32 %v8518_v48  ;;  %v933_v3 = vmul.f32 %v5164_v56, %v8529_v63  ;;  %vm2531_vm12 = vmor %vm2529_vm11, %vm2530_vm10  ;;  %v2536_v59 = vor.u32 1.1754944e-38, %v2535_v45  ;;  %v9299_v12 = vld [vmem:[#allocation16_spill] sm:$0xff] }
 0x2d5   : > { %3252 = vst.msk [vmem:[#allocation3 + $0x38] sm:$0xf] %vm3237_vm6, %v3219_v10  ;;  %v8538_v21 = vadd.f32 %v8369_v4, %v1748_v51  ;;  %v831_v43 = vmul.f32 %v8011_v18, %v8522_v42  ;;  %v969_v11 = vmul.f32 %v5165_v23, %v8437_v50  ;;  %vm2534_vm13 = vcmp.eq.f32.partialorder %v2533_v26, 8.507059e+37 }
 0x2d6   : > { %v2532_v22 = vsel %vm2531_vm12, %v5064_v17, %v2528_v2  ;;  %v967_v19 = vmul.f32 %v8437_v50, %v8522_v42  ;;  %v1037_v6 = vadd.f32 %v933_v3, %v765_v61  ;;  %v2592_v16 = vadd.f32 1.1283791, %v2591_v34 }
 0x2d7   : > { %v2537_v41 = vsel %vm2534_vm13, %v2536_v59, %v2532_v22  ;;  %v8546_v37 = vmul.f32 %v5166_v24, %v8496_v0  ;;  %v1035_v27 = vadd.f32 %v931_v57, %v763_v36  ;;  %v8549_v15 = vmul.f32 0.5, %v8372_v40 }
 0x2d8   : > { %v2538_v18 = vmul.f32 %v2537_v41, %v2513_v8  ;;  %v8552_v9 = vmul.f32 0.70710677, %v8538_v21  ;;  %v1067_v17 = vadd.f32 %v967_v19, %v829_v13  ;;  %v8560_v38 = vmul.f32 %v5168_v33, %v8557_v35  ;;  %v8568_v8 = vld [vmem:[%s9099_s4 + $0x6] ss:$0 sm:$0xff] }
 0x2d9   : > { %v8563_v36 = vmul.f32 %v5169_v28, %v8529_v63  ;;  %v1069_v40 = vadd.f32 %v969_v11, %v831_v43  ;;  %v1135_v13 = vmul.f32 %v8568_v8, %v5164_v56  ;;  %v1171_v31 = vmul.f32 %v8576_v55, %v5165_v23  ;;  %v9300_v43 = vld [vmem:[#allocation44_spill] sm:$0xff]  ;;  %v9301_v23 = vld [vmem:[#allocation11_spill] sm:$0xff] }
 0x2da   : > { %v5066_v53 = vpop.eup %5065  ;;  %v4713_v26 = vclamps-f32 %v2538_v18, 1.0  ;;  %v2621_v45 = vmul.f32 %v8552_v9, %v8552_v9  ;;  %v1241_v61 = vadd.f32 %v9299_v12, %v1037_v6  ;;  %v2593_v34 = vmul.f32 %v2592_v16, %v8395_v39  ;;  %v9302_v19 = vld [vmem:[#allocation20_spill] sm:$0xff]  ;;  %v8590_v39 = vpop.permute.xlu2 %3997 }
 0x2db   : > { %v2605_v10 = vmul.f32 %v5066_v53, %v8518_v48  ;;  %v965_v5 = vmul.f32 %v8437_v50, %v8281_v49  ;;  %v1239_v51 = vadd.f32 %v1135_v13, %v1035_v27  ;;  %v2613_v57 = vand.u32 2147483647, %v8518_v48 }
 0x2dc   : > { %v3157_v2 = vadd.f32 1.0, %v4713_v26  ;;  %v8585_v56 = vmin.f32 %v2621_v45, 16.0  ;;  %v1271_v3 = vadd.f32 %v1171_v31, %v1067_v17  ;;  %v1273_v11 = vadd.f32 %v9300_v43, %v1069_v40  ;;  %v4891_v26 = vld [vmem:[#allocation3 + $0x30] sm:$0xff]  ;;  %v9303_v31 = vld [vmem:[#allocation22_spill] sm:$0xff] }
 0x2dd   : > { %v2606_v59 = vsub.f32 1.0, %v2605_v10  ;;  %v1527_v22 = vmul.f32 %v9301_v23, %v1239_v51  ;;  %v1529_v6 = vmul.f32 %v9302_v19, %v1241_v61  ;;  %v2615_v41 = vand.u32 2147483648, %v8518_v48  ;;  %v8604_v61 = vld [vmem:[#allocation2 + $0xe1] sm:$0xff] }
 0x2de   : > { %v3189_v49 = vmul.f32 %v3157_v2, %v8511_v25  ;;  %v2623_v16 = vmul.f32 2.1237322e-06, %v8585_v56  ;;  %v2634_v24 = vmul.f32 3.8918573e-05, %v8585_v56  ;;  %vm2610_vm14 = vweird.f32 %v5066_v53  ;;  %v8602_v25 = vld [vmem:[%s9099_s4 + $0x5] ss:$0 sm:$0xff] }
 0x2df   : > { %v2607_v27 = vmul.f32 %v5066_v53, %v2606_v59  ;;  %v1559_v18 = vadd.f32 %v1527_v22, %v1271_v3  ;;  %v1561_v17 = vadd.f32 %v1529_v6, %v1273_v11  ;;  %vm2609_vm15 = vweird.f32 %v8518_v48  ;;  %v8619_v11 = vpop.permute.xlu0 %4014  ;;  %v5174_v23 = vld [vmem:[#allocation2 + $0xc0] sm:$0xff] }
 0x2e0   : > { %v3221_v33 = vpack.c.bf16 %v3189_v49, %v3189_v49  ;;  %v2624_v28 = vadd.f32 0.00028619796, %v2623_v16  ;;  %v2635_v40 = vadd.f32 0.001143296, %v2634_v24  ;;  %v1006_v10 = vmul.f32 %v8604_v61, %v8602_v25  ;;  %vm2611_vm2 = vmor %vm2609_vm15, %vm2610_vm14  ;;  %4845 = vmatmul.msk.bf16.gmra.mxu1 %vm655_vm1, %v4891_v26 }
 0x2e1   : > { %v2608_v13 = vadd.f32 %v5066_v53, %v2607_v27  ;;  %v1751_v45 = vadd.f32 %v8491_v58, %v1559_v18  ;;  %v1753_v12 = vadd.f32 %v9303_v31, %v1561_v17  ;;  %vm2614_vm3 = vcmp.eq.f32.partialorder %v2613_v57, 8.507059e+37  ;;  %v9304_v18 = vld [vmem:[#allocation45_spill] sm:$0xff] }
 0x2e2   : > { %v2616_v48 = vor.u32 1.1754944e-38, %v2615_v41  ;;  %3254 = vst.msk [vmem:[#allocation3 + $0x40] sm:$0xf] %vm3237_vm6, %v3221_v33  ;;  %v2625_v51 = vmul.f32 %v2624_v28, %v8585_v56  ;;  %v2636_v58 = vmul.f32 %v2635_v40, %v8585_v56  ;;  %v1102_v43 = vadd.f32 %v1006_v10, %v8505_v29 }
 0x2e3   : > { %v2612_v2 = vsel %vm2611_vm2, %v5066_v53, %v2608_v13  ;;  %v8613_v3 = vadd.f32 %v8369_v4, %v1751_v45  ;;  %v8616_v59 = vadd.f32 %v8369_v4, %v1753_v12  ;;  %v966_v22 = vmul.f32 %v5174_v23, %v8437_v50  ;;  %v8622_v53 = vpop.permute.xlu1 %4002  ;;  %v9305_v13 = vld [vmem:[#allocation21_spill] sm:$0xff] }
 0x2e4   : > { %v2617_v57 = vsel %vm2614_vm3, %v2616_v48, %v2612_v2  ;;  %v2626_v19 = vadd.f32 0.0036580483, %v2625_v51  ;;  %v2637_v6 = vadd.f32 0.014752088, %v2636_v58  ;;  %v827_v49 = vmul.f32 %v8557_v35, %v8230_v1 }
 0x2e5   : > { %v2618_v41 = vmul.f32 %v2617_v57, %v2593_v34  ;;  %v929_v16 = vmul.f32 %v8529_v63, %v8271_v32  ;;  %v8629_v24 = vmul.f32 0.70710677, %v8613_v3  ;;  %v8634_v50 = vmul.f32 0.70710677, %v8616_v59  ;;  %v8641_v63 = vpop.permute.xlu2 %4010 }
 0x2e6   : > { %v2627_v29 = vmul.f32 %v2626_v19, %v8585_v56  ;;  %v2638_v27 = vmul.f32 %v2637_v6, %v8585_v56  ;;  %v1306_v34 = vadd.f32 %v9304_v18, %v1102_v43  ;;  %v761_v33 = vmul.f32 %v8496_v0, %v8190_v60 }
 0x2e7   : > { %v4715_v17 = vclamps-f32 %v2618_v41, 1.0  ;;  %v1065_v1 = vadd.f32 %v965_v5, %v827_v49  ;;  %v2741_v32 = vmul.f32 %v8629_v24, %v8629_v24  ;;  %v1133_v28 = vmul.f32 %v8568_v8, %v8508_v14 }
 0x2e8   : > { %v2639_v35 = vadd.f32 0.112945676, %v2638_v27  ;;  %v2821_v40 = vmul.f32 %v8634_v50, %v8634_v50  ;;  %v1722_v26 = vmul.f32 %v9305_v13, %v1306_v34  ;;  %v1033_v31 = vadd.f32 %v929_v16, %v761_v33  ;;  %v1651_v16 = vpop.permute.xlu0 %1650 }
 0x2e9   : > { %v3159_v45 = vadd.f32 1.0, %v4715_v17  ;;  %v1169_v60 = vmul.f32 %v8576_v55, %v8522_v42  ;;  %v8650_v0 = vmin.f32 %v2741_v32, 16.0  ;;  %v2628_v5 = vadd.f32 0.05243302, %v2627_v29 }
 0x2ea   : > { %v2640_v12 = vmul.f32 %v2639_v35, %v8585_v56  ;;  %v8653_v10 = vmin.f32 %v2821_v40, 16.0  ;;  %v1754_v48 = vadd.f32 %v1722_v26, %v8256_v52  ;;  %v1034_v51 = vadd.f32 %v8563_v36, %v8546_v37 }
 0x2eb   : > { %v3191_v14 = vmul.f32 %v3159_v45, %v8549_v15  ;;  %v2743_v58 = vmul.f32 2.1237322e-06, %v8650_v0  ;;  %v2754_v2 = vmul.f32 3.8918573e-05, %v8650_v0  ;;  %v1237_v42 = vadd.f32 %v1133_v28, %v1033_v31  ;;  %v1448_v6 = vpop.permute.xlu1 %1447 }
 0x2ec   : > { %v2641_v43 = vadd.f32 0.4994258, %v2640_v12  ;;  %v1269_v57 = vadd.f32 %v1169_v60, %v1065_v1  ;;  %v2823_v23 = vmul.f32 2.1237322e-06, %v8653_v10  ;;  %v2834_v52 = vmul.f32 3.8918573e-05, %v8653_v10 }
 0x2ed   : > { %v3223_v19 = vpack.c.bf16 %v3191_v14, %v3191_v14  ;;  %v2744_v41 = vadd.f32 0.00028619796, %v2743_v58  ;;  %v2755_v49 = vadd.f32 0.001143296, %v2754_v2  ;;  %v2629_v15 = vmul.f32 %v2628_v5, %v8585_v56  ;;  %v1453_v45 = vpop.permute.xlu2 %1452 }
 0x2ee   : > { %v2642_v37 = vmul.f32 %v2641_v43, %v8585_v56  ;;  %v1525_v36 = vmul.f32 %v1448_v6, %v1237_v42  ;;  %v2824_v29 = vadd.f32 0.00028619796, %v2823_v23  ;;  %v2835_v34 = vadd.f32 0.001143296, %v2834_v52 }
 0x2ef   : > { %3256 = vst.msk [vmem:[#allocation3 + $0x48] sm:$0xf] %vm3237_vm6, %v3223_v19  ;;  %v2745_v27 = vmul.f32 %v2744_v41, %v8650_v0  ;;  %v2756_v18 = vmul.f32 %v2755_v49, %v8650_v0  ;;  %v8669_v17 = vadd.f32 %v8369_v4, %v1754_v48  ;;  %v1134_v33 = vmul.f32 %v8568_v8, %v8173_v30  ;;  %v5175_v41 = vld [vmem:[%s9099_s4 + $0x2] ss:$0 sm:$0xff] }
 0x2f0   : > { %v8673_v1 = vadd.f32 1.0, %v2642_v37  ;;  %v1557_v32 = vadd.f32 %v1525_v36, %v1269_v57  ;;  %v2825_v35 = vmul.f32 %v2824_v29, %v8653_v10  ;;  %v1717_v28 = vmul.f32 %v1651_v16, %v8488_v62 }
 0x2f1   : > { %v2746_v40 = vadd.f32 0.0036580483, %v2745_v27  ;;  %v2757_v13 = vadd.f32 0.014752088, %v2756_v18  ;;  %v2836_v26 = vmul.f32 %v2835_v34, %v8653_v10  ;;  %v1066_v31 = vadd.f32 %v966_v22, %v8560_v38 }
 0x2f2   : > { %v1238_v60 = vadd.f32 %v1134_v33, %v1034_v51  ;;  %v2630_v5 = vadd.f32 0.18741608, %v2629_v15  ;;  %5067 = vrcp.f32 %v8673_v1  ;;  %v1749_v12 = vadd.f32 %v1717_v28, %v1557_v32 }
 0x2f3   : > { %v2747_v30 = vmul.f32 %v2746_v40, %v8650_v0  ;;  %v2758_v8 = vmul.f32 %v2757_v13, %v8650_v0  ;;  %v8683_v48 = vmul.f32 0.70710677, %v8669_v17  ;;  %v1170_v62 = vmul.f32 %v8576_v55, %v8182_v46 }
 0x2f4   : > { %v2826_v14 = vadd.f32 0.0036580483, %v2825_v35  ;;  %v2837_v58 = vadd.f32 0.014752088, %v2836_v26  ;;  %v1526_v2 = vmul.f32 %v1453_v45, %v1238_v60  ;;  %v8688_v38 = vadd.f32 %v8369_v4, %v1749_v12 }
 0x2f5   : > { %v2748_v22 = vadd.f32 0.05243302, %v2747_v30  ;;  %v2759_v51 = vadd.f32 0.112945676, %v2758_v8  ;;  %v2631_v43 = vmul.f32 %v2630_v5, %v8585_v56  ;;  %v1270_v23 = vadd.f32 %v1170_v62, %v1066_v31 }
 0x2f6   : > { %v2827_v42 = vmul.f32 %v2826_v14, %v8653_v10  ;;  %v2838_v57 = vmul.f32 %v2837_v58, %v8653_v10  ;;  %v8694_v19 = vmul.f32 0.70710677, %v8688_v38  ;;  %v2861_v55 = vmul.f32 %v8683_v48, %v8683_v48 }
 0x2f7   : > { %v2760_v46 = vmul.f32 %v2759_v51, %v8650_v0  ;;  %v8703_v56 = vmul.f32 %v5175_v41, %v8470_v7  ;;  %v2749_v49 = vmul.f32 %v2748_v22, %v8650_v0  ;;  %v8706_v15 = vadd.f32 %v1526_v2, %v1270_v23 }
 0x2f8   : > { %v5068_v6 = vpop.eup %5067  ;;  %v2828_v52 = vadd.f32 0.05243302, %v2827_v42  ;;  %v2839_v16 = vadd.f32 0.112945676, %v2838_v57  ;;  %v8709_v37 = vmul.f32 0.5, %v8538_v21  ;;  %v2661_v29 = vmul.f32 %v8694_v19, %v8694_v19 }
 0x2f9   : > { %v2645_v36 = vmul.f32 %v5068_v6, %v8673_v1  ;;  %v2632_v27 = vadd.f32 1.1283791, %v2631_v43  ;;  %v2653_v18 = vand.u32 2147483647, %v8673_v1  ;;  %v2761_v34 = vadd.f32 0.4994258, %v2760_v46 }
 0x2fa   : > { %v2840_v33 = vmul.f32 %v2839_v16, %v8653_v10  ;;  %v2655_v35 = vand.u32 2147483648, %v8673_v1  ;;  %v8717_v28 = vmin.f32 %v2661_v29, 16.0  ;;  %v8719_v40 = vmin.f32 %v2861_v55, 16.0 }
 0x2fb   : > { %v2646_v32 = vsub.f32 1.0, %v2645_v36  ;;  %v2750_v21 = vadd.f32 0.18741608, %v2749_v49  ;;  %v2762_v13 = vmul.f32 %v2761_v34, %v8650_v0  ;;  %v2829_v26 = vmul.f32 %v2828_v52, %v8653_v10  ;;  %v4892_v36 = vld [vmem:[#allocation3 + $0x38] sm:$0xff] }
 0x2fc   : > { %v2841_v45 = vadd.f32 0.4994258, %v2840_v33  ;;  %vm2650_vm4 = vweird.f32 %v5068_v6  ;;  %v2663_v60 = vmul.f32 2.1237322e-06, %v8717_v28  ;;  %v2674_v5 = vmul.f32 3.8918573e-05, %v8717_v28  ;;  %4846 = vmatmul.msk.bf16.gmra.mxu1 %vm655_vm1, %v4892_v36 }
 0x2fd   : > { %v2647_v31 = vmul.f32 %v5068_v6, %v2646_v32  ;;  %v2633_v12 = vmul.f32 %v2632_v27, %v8552_v9  ;;  %v8726_v30 = vadd.f32 1.0, %v2762_v13  ;;  %v2863_v62 = vmul.f32 2.1237322e-06, %v8719_v40 }
 0x2fe   : > { %v2842_v8 = vmul.f32 %v2841_v45, %v8653_v10  ;;  %vm2649_vm5 = vweird.f32 %v8673_v1  ;;  %v2664_v58 = vadd.f32 0.00028619796, %v2663_v60  ;;  %v2675_v2 = vadd.f32 0.001143296, %v2674_v5 }
 0x2ff   : > { %v2648_v14 = vadd.f32 %v5068_v6, %v2647_v31  ;;  %vm2651_vm7 = vmor %vm2649_vm5, %vm2650_vm4  ;;  %v2656_v22 = vor.u32 1.1754944e-38, %v2655_v35  ;;  %v2751_v51 = vmul.f32 %v2750_v21, %v8650_v0  ;;  %5069 = vrcp.f32 %v8726_v30 }
 0x300   : > { %v2830_v43 = vadd.f32 0.18741608, %v2829_v26  ;;  %vm2654_vm8 = vcmp.eq.f32.partialorder %v2653_v18, 8.507059e+37  ;;  %v2665_v9 = vmul.f32 %v2664_v58, %v8717_v28  ;;  %v2676_v57 = vmul.f32 %v2675_v2, %v8717_v28 }
 0x301   : > { %v2652_v42 = vsel %vm2651_vm7, %v5068_v6, %v2648_v14  ;;  %v8735_v46 = vadd.f32 1.0, %v2842_v8  ;;  %v2864_v55 = vadd.f32 0.00028619796, %v2863_v62  ;;  %v2874_v1 = vmul.f32 3.8918573e-05, %v8719_v40 }
 0x302   : > { %v2657_v23 = vsel %vm2654_vm8, %v2656_v22, %v2652_v42  ;;  %v2666_v52 = vadd.f32 0.0036580483, %v2665_v9  ;;  %v2677_v16 = vadd.f32 0.014752088, %v2676_v57  ;;  %v894_v0 = vmul.f32 %v5175_v41, %v8475_v20 }
 0x303   : > { %v2658_v49 = vmul.f32 %v2657_v23, %v2633_v12  ;;  %v2752_v29 = vadd.f32 1.1283791, %v2751_v51  ;;  %v2831_v6 = vmul.f32 %v2830_v43, %v8653_v10  ;;  %5071 = vrcp.f32 %v8735_v46 }
 0x304   : > { %v1002_v27 = vmul.f32 %v8602_v25, %v8470_v7  ;;  %v2667_v34 = vmul.f32 %v2666_v52, %v8717_v28  ;;  %v2678_v33 = vmul.f32 %v2677_v16, %v8717_v28  ;;  %v1004_v32 = vmul.f32 %v8602_v25, %v8479_v47  ;;  %v1655_v52 = vpop.permute.xlu1 %1654 }
 0x305   : > { %v4716_v18 = vclamps-f32 %v2658_v49, 1.0  ;;  %v5070_v35 = vpop.eup %5069  ;;  %v2773_v20 = vand.u32 2147483647, %v8726_v30  ;;  %v2775_v10 = vand.u32 2147483648, %v8726_v30  ;;  %v2865_v41 = vmul.f32 %v2864_v55, %v8719_v40 }
 0x306   : > { %v2875_v21 = vadd.f32 0.001143296, %v2874_v1  ;;  %v2679_v7 = vadd.f32 0.112945676, %v2678_v33  ;;  %v2765_v26 = vmul.f32 %v5070_v35, %v8726_v30  ;;  %v1206_v45 = vmul.f32 %v8286_v44, %v8479_v47  ;;  %v9308_v33 = vld [vmem:[#allocation15_spill] sm:$0xff] }
 0x307   : > { %v3160_v13 = vadd.f32 1.0, %v4716_v18  ;;  %v2753_v31 = vmul.f32 %v2752_v29, %v8629_v24  ;;  %vm2769_vm9 = vweird.f32 %v8726_v30  ;;  %v2832_v25 = vadd.f32 1.1283791, %v2831_v6 }
 0x308   : > { %v2876_v60 = vmul.f32 %v2875_v21, %v8719_v40  ;;  %v2668_v12 = vadd.f32 0.05243302, %v2667_v34  ;;  %v2680_v8 = vmul.f32 %v2679_v7, %v8717_v28  ;;  %v2766_v62 = vsub.f32 1.0, %v2765_v26 }
 0x309   : > { %v3192_v5 = vmul.f32 %v3160_v13, %v8709_v37  ;;  %v5072_v14 = vpop.eup %5071  ;;  %vm2770_vm10 = vweird.f32 %v5070_v35  ;;  %vm8759_vm11 = vcmp.eq.f32.partialorder %v2773_v20, 8.507059e+37  ;;  %v2776_v47 = vor.u32 1.1754944e-38, %v2775_v10 }
 0x30a   : > { %v2866_v2 = vadd.f32 0.0036580483, %v2865_v41  ;;  %v2681_v22 = vadd.f32 0.4994258, %v2680_v8  ;;  %v2767_v51 = vmul.f32 %v5070_v35, %v2766_v62  ;;  %v2877_v43 = vadd.f32 0.014752088, %v2876_v60  ;;  %vm2771_vm12 = vmor %vm2769_vm9, %vm2770_vm10 }
 0x30b   : > { %v3224_v24 = vpack.c.bf16 %v3192_v5, %v3192_v5  ;;  %v2845_v42 = vmul.f32 %v5072_v14, %v8735_v46  ;;  %v1098_v9 = vadd.f32 %v1002_v27, %v894_v0  ;;  %v1100_v37 = vadd.f32 %v1004_v32, %v8703_v56 }
 0x30c   : > { %v1208_v57 = vmul.f32 %v8604_v61, %v8286_v44  ;;  %v2669_v23 = vmul.f32 %v2668_v12, %v8717_v28  ;;  %v2682_v55 = vmul.f32 %v2681_v22, %v8717_v28  ;;  %v2768_v1 = vadd.f32 %v5070_v35, %v2767_v51 }
 0x30d   : > { %3257 = vst.msk [vmem:[#allocation3 + $0x4c] sm:$0xf] %vm3237_vm6, %v3224_v24  ;;  %v2853_v49 = vand.u32 2147483647, %v8735_v46  ;;  %v2846_v16 = vsub.f32 1.0, %v2845_v42  ;;  %v1302_v36 = vadd.f32 %v1206_v45, %v1098_v9  ;;  %v2867_v0 = vmul.f32 %v2866_v2, %v8719_v40 }
 0x30e   : > { %v1304_v56 = vadd.f32 %v1208_v57, %v1100_v37  ;;  %v8775_v44 = vadd.f32 1.0, %v2682_v55  ;;  %v2772_v61 = vsel %vm2771_vm12, %v5070_v35, %v2768_v1  ;;  %v2855_v29 = vand.u32 2147483648, %v8735_v46 }
 0x30f   : > { %v2878_v6 = vmul.f32 %v2877_v43, %v8719_v40  ;;  %v2777_v27 = vsel %vm8759_vm11, %v2776_v47, %v2772_v61  ;;  %v2847_v18 = vmul.f32 %v5072_v14, %v2846_v16  ;;  %vm2850_vm13 = vweird.f32 %v5072_v14 }
 0x310   : > { %v1718_v34 = vmul.f32 %v1655_v52, %v1302_v36  ;;  %v2670_v30 = vadd.f32 0.18741608, %v2669_v23  ;;  %5073 = vrcp.f32 %v8775_v44  ;;  %vm2849_vm14 = vweird.f32 %v8735_v46 }
 0x311   : > { %v1720_v32 = vmul.f32 %v9308_v33, %v1304_v56  ;;  %v2778_v20 = vmul.f32 %v2777_v27, %v2753_v31  ;;  %v2848_v10 = vadd.f32 %v5072_v14, %v2847_v18  ;;  %v2868_v41 = vadd.f32 0.05243302, %v2867_v0  ;;  %vm2851_vm15 = vmor %vm2849_vm14, %vm2850_vm13 }
 0x312   : > { %v1750_v35 = vadd.f32 %v1718_v34, %v8706_v15  ;;  %v2833_v21 = vmul.f32 %v2832_v25, %v8634_v50  ;;  %v2856_v13 = vor.u32 1.1754944e-38, %v2855_v29  ;;  %v2879_v26 = vadd.f32 0.112945676, %v2878_v6 }
 0x313   : > { %v1752_v7 = vadd.f32 %v1720_v32, %v8472_v54  ;;  %v4719_v45 = vclamps-f32 %v2778_v20, 1.0  ;;  %v2852_v60 = vsel %vm2851_vm15, %v5072_v14, %v2848_v10  ;;  %vm2854_vm2 = vcmp.eq.f32.partialorder %v2853_v49, 8.507059e+37 }
 0x314   : > { %v8788_v5 = vadd.f32 %v8369_v4, %v1750_v35  ;;  %v1819_v46 = vmul.f32 0.5, %v8613_v3  ;;  %v2671_v31 = vmul.f32 %v2670_v30, %v8717_v28  ;;  %v2857_v12 = vsel %vm2854_vm2, %v2856_v13, %v2852_v60 }
 0x315   : > { %v2880_v15 = vmul.f32 %v2879_v26, %v8719_v40  ;;  %v2858_v8 = vmul.f32 %v2857_v12, %v2833_v21  ;;  %v3163_v50 = vadd.f32 1.0, %v4719_v45  ;;  %v2869_v54 = vmul.f32 %v2868_v41, %v8719_v40 }
 0x316   : > { %v8794_v25 = vmul.f32 0.70710677, %v8788_v5  ;;  %v5074_v62 = vpop.eup %5073  ;;  %v8799_v3 = vadd.f32 %v8369_v4, %v1752_v7  ;;  %v1821_v28 = vmul.f32 0.5, %v8616_v59  ;;  %v2672_v24 = vadd.f32 1.1283791, %v2671_v31 }
 0x317   : > { %v2881_v14 = vadd.f32 0.4994258, %v2880_v15  ;;  %v2685_v58 = vmul.f32 %v5074_v62, %v8775_v44  ;;  %v4721_v47 = vclamps-f32 %v2858_v8, 1.0  ;;  %v3195_v2 = vmul.f32 %v3163_v50, %v1819_v46 }
 0x318   : > { %v2701_v22 = vmul.f32 %v8794_v25, %v8794_v25  ;;  %v2870_v37 = vadd.f32 0.18741608, %v2869_v54  ;;  %v2693_v57 = vand.u32 2147483647, %v8775_v44  ;;  %v2695_v23 = vand.u32 2147483648, %v8775_v44 }
 0x319   : > { %v2882_v51 = vmul.f32 %v2881_v14, %v8719_v40  ;;  %v2686_v43 = vsub.f32 1.0, %v2685_v58  ;;  %v3165_v42 = vadd.f32 1.0, %v4721_v47  ;;  %v3227_v9 = vpack.c.bf16 %v3195_v2, %v3195_v2 }
 0x31a   : > { %v8807_v55 = vmin.f32 %v2701_v22, 16.0  ;;  %vm2690_vm3 = vweird.f32 %v5074_v62  ;;  %v8811_v49 = vmul.f32 0.70710677, %v8799_v3  ;;  %vm2689_vm4 = vweird.f32 %v8775_v44 }
 0x31b   : > { %v2883_v4 = vadd.f32 1.0, %v2882_v51  ;;  %v2687_v1 = vmul.f32 %v5074_v62, %v2686_v43  ;;  %v3197_v59 = vmul.f32 %v3165_v42, %v1821_v28  ;;  %3260 = vst.msk [vmem:[#allocation3 + $0x58] sm:$0xf] %vm3237_vm6, %v3227_v9  ;;  %v2871_v0 = vmul.f32 %v2870_v37, %v8719_v40  ;;  %vm2691_vm5 = vmor %vm2689_vm4, %vm2690_vm3 }
 0x31c   : > { %v2703_v52 = vmul.f32 2.1237322e-06, %v8807_v55  ;;  %v2714_v16 = vmul.f32 3.8918573e-05, %v8807_v55  ;;  %v2696_v61 = vor.u32 1.1754944e-38, %v2695_v23  ;;  %v2673_v27 = vmul.f32 %v2672_v24, %v8694_v19 }
 0x31d   : > { %5075 = vrcp.f32 %v2883_v4  ;;  %v2688_v36 = vadd.f32 %v5074_v62, %v2687_v1  ;;  %v3229_v56 = vpack.c.bf16 %v3197_v59, %v3197_v59  ;;  %vm2694_vm7 = vcmp.eq.f32.partialorder %v2693_v57, 8.507059e+37 }
 0x31e   : > { %v2704_v29 = vadd.f32 0.00028619796, %v2703_v52  ;;  %v2715_v6 = vadd.f32 0.001143296, %v2714_v16  ;;  %v2781_v34 = vmul.f32 %v8811_v49, %v8811_v49  ;;  %v1817_v40 = vmul.f32 0.5, %v8688_v38 }
 0x31f   : > { %v2692_v18 = vsel %vm2691_vm5, %v5074_v62, %v2688_v36  ;;  %3262 = vst.msk [vmem:[#allocation3 + $0x60] sm:$0xf] %vm3237_vm6, %v3229_v56  ;;  %v2872_v10 = vadd.f32 1.1283791, %v2871_v0  ;;  %vm2889_vm8 = vweird.f32 %v2883_v4  ;;  %v2893_v21 = vand.u32 2147483647, %v2883_v4 }
 0x320   : > { %v2697_v30 = vsel %vm2694_vm7, %v2696_v61, %v2692_v18  ;;  %v2705_v33 = vmul.f32 %v2704_v29, %v8807_v55  ;;  %v2716_v44 = vmul.f32 %v2715_v6, %v8807_v55  ;;  %v8824_v20 = vmin.f32 %v2781_v34, 16.0  ;;  %v650_v18 = vpop.f32.mrf.mxu3  ;;  %v4374_v34 = vpop.f32.mrf.mxu1 }
 0x321   : > { %v2698_v32 = vmul.f32 %v2697_v30, %v2673_v27  ;;  %v2895_v38 = vand.u32 2147483648, %v2883_v4  ;;  %v2873_v2 = vmul.f32 %v2872_v10, %v8683_v48  ;;  %vm2894_vm11 = vcmp.eq.f32.partialorder %v2893_v21, 8.507059e+37  ;;  %v4893_v30 = vld [vmem:[#allocation3 + $0x40] sm:$0xff] }
 0x322   : > { %v2706_v19 = vadd.f32 0.0036580483, %v2705_v33  ;;  %v2717_v41 = vadd.f32 0.014752088, %v2716_v44  ;;  %v2783_v7 = vmul.f32 2.1237322e-06, %v8824_v20  ;;  %4847 = vmatmul.msk.bf16.gmra.mxu1 %vm655_vm1, %v4893_v30 }
 0x323   : > { %v5076_v35 = vpop.eup %5075  ;;  %v4717_v13 = vclamps-f32 %v2698_v32, 1.0  ;;  %v2794_v26 = vmul.f32 3.8918573e-05, %v8824_v20  ;;  %v2896_v28 = vor.u32 1.1754944e-38, %v2895_v38  ;;  %v1822_v36 = vmul.f32 0.5, %v8669_v17 }
 0x324   : > { %v2885_v45 = vmul.f32 %v5076_v35, %v2883_v4  ;;  %v2707_v60 = vmul.f32 %v2706_v19, %v8807_v55  ;;  %v2718_v46 = vmul.f32 %v2717_v41, %v8807_v55  ;;  %vm2890_vm9 = vweird.f32 %v5076_v35  ;;  %v8850_v32 = vld [vmem:[%s9102_s7] ss:$0 sm:$0xff] }
 0x325   : > { %v3161_v31 = vadd.f32 1.0, %v4717_v13  ;;  %v2784_v12 = vadd.f32 0.00028619796, %v2783_v7  ;;  %v2795_v15 = vadd.f32 0.001143296, %v2794_v26  ;;  %vm2891_vm10 = vmor %vm2889_vm8, %vm2890_vm9  ;;  %v4375_v13 = vadd.f32 %v8850_v32, %v4374_v34 }
 0x326   : > { %v2886_v8 = vsub.f32 1.0, %v2885_v45  ;;  %v2719_v50 = vadd.f32 0.112945676, %v2718_v46  ;;  %v2708_v22 = vadd.f32 0.05243302, %v2707_v60 }
 0x327   : > { %v3193_v54 = vmul.f32 %v3161_v31, %v1817_v40  ;;  %v2785_v62 = vmul.f32 %v2784_v12, %v8824_v20  ;;  %v2796_v14 = vmul.f32 %v2795_v15, %v8824_v20  ;;  %v5176_v40 = vld [vmem:[%s9098_s3] ss:$0 sm:$0xff]  ;;  %4479 = vst.msk [vmem:[%s8857_s15] sm:$0xff] %vm477_vm0, %v4375_v13  ;;  %v4996_v13 = vld [vmem:[%s9099_s4 + $0x5] ss:$0 sm:$0xff] }
 0x328   : > { %v2887_v58 = vmul.f32 %v5076_v35, %v2886_v8  ;;  %v2720_v47 = vmul.f32 %v2719_v50, %v8807_v55  ;;  %v2709_v48 = vmul.f32 %v2708_v22, %v8807_v55  ;;  %v651_v17 = vadd.f32 %v5176_v40, %v650_v18  ;;  %v652_v38 = vpop.f32.mrf.mxu3  ;;  %v4376_v31 = vpop.f32.mrf.mxu1 }
 0x329   : > { %v3225_v24 = vpack.c.bf16 %v3193_v54, %v3193_v54  ;;  %v2797_v51 = vadd.f32 0.014752088, %v2796_v14  ;;  %v2786_v9 = vadd.f32 0.0036580483, %v2785_v62  ;;  %v653_v15 = vadd.f32 %v5176_v40, %v652_v38 }
 0x32a   : > { %v2888_v43 = vadd.f32 %v5076_v35, %v2887_v58  ;;  %v2721_v42 = vadd.f32 0.4994258, %v2720_v47  ;;  %v2710_v61 = vadd.f32 0.18741608, %v2709_v48  ;;  %705 = vst.msk [vmem:[#allocation2 + $0x180] sm:$0xff] %vm655_vm1, %v651_v17  ;;  %v4377_v8 = vadd.f32 %v8850_v32, %v4376_v31 }
 0x32b   : > { %3258 = vst.msk [vmem:[#allocation3 + $0x50] sm:$0xf] %vm3237_vm6, %v3225_v24  ;;  %v2798_v37 = vmul.f32 %v2797_v51, %v8824_v20  ;;  %v2787_v16 = vmul.f32 %v2786_v9, %v8824_v20  ;;  %v4990_v17 = vld [vmem:[%s9099_s4] ss:$0 sm:$0xff] }
 0x32c   : > { %v2892_v57 = vsel %vm2891_vm10, %v5076_v35, %v2888_v43  ;;  %v2722_v23 = vmul.f32 %v2721_v42, %v8807_v55  ;;  %v2711_v10 = vmul.f32 %v2710_v61, %v8807_v55  ;;  %706 = vst.msk [vmem:[#allocation2 + $0x188] sm:$0xff] %vm655_vm1, %v653_v15 }
 0x32d   : > { %v2897_v1 = vsel %vm2894_vm11, %v2896_v28, %v2892_v57  ;;  %v2799_v4 = vadd.f32 0.112945676, %v2798_v37  ;;  %v2788_v27 = vadd.f32 0.05243302, %v2787_v16  ;;  %4480 = vst.msk [vmem:[%s8857_s15 + $0x8] sm:$0xff] %vm477_vm0, %v4377_v8 }
 0x32e   : > { %v2898_v59 = vmul.f32 %v2897_v1, %v2873_v2  ;;  %v2723_v52 = vadd.f32 1.0, %v2722_v23  ;;  %v2712_v55 = vadd.f32 1.1283791, %v2711_v10  ;;  %v1818_v1 = vmul.f32 0.5, %v8788_v5  ;;  %v4991_v10 = vld [vmem:[%s9099_s4 + $0x1] ss:$0 sm:$0xff] }
 0x32f   : > { %v2800_v56 = vmul.f32 %v2799_v4, %v8824_v20  ;;  %v2789_v21 = vmul.f32 %v2788_v27, %v8824_v20 }
 0x330   : > { %v4722_v0 = vclamps-f32 %v2898_v59, 1.0  ;;  %5077 = vrcp.f32 %v2723_v52  ;;  %v2733_v45 = vand.u32 2147483647, %v2723_v52  ;;  %v2735_v60 = vand.u32 2147483648, %v2723_v52  ;;  %v4379_v37 = vpop.f32.mrf.mxu1 }
 0x331   : > { %v2801_v29 = vadd.f32 0.4994258, %v2800_v56  ;;  %v2790_v46 = vadd.f32 0.18741608, %v2789_v21  ;;  %vm2729_vm13 = vweird.f32 %v2723_v52  ;;  %v2713_v47 = vmul.f32 %v2712_v55, %v8794_v25  ;;  %v4994_v21 = vld [vmem:[%s9099_s4 + $0x4] ss:$0 sm:$0xff] }
 0x332   : > { %v3166_v6 = vadd.f32 1.0, %v4722_v0  ;;  %v2736_v62 = vor.u32 1.1754944e-38, %v2735_v60  ;;  %vm2734_vm15 = vcmp.eq.f32.partialorder %v2733_v45, 8.507059e+37  ;;  %v3936_v45 = vld [vmem:[#allocation2 + $0x17c] sm:$0xff] }
 0x333   : > { %v2802_v33 = vmul.f32 %v2801_v29, %v8824_v20  ;;  %v2791_v14 = vmul.f32 %v2790_v46, %v8824_v20  ;;  %v4380_v20 = vadd.f32 %v8850_v32, %v4379_v37  ;;  %v4894_v29 = vld [vmem:[#allocation3 + $0x48] sm:$0xff] }
 0x334   : > { %v3198_v44 = vmul.f32 %v3166_v6, %v1822_v36  ;;  %v1820_v6 = vmul.f32 0.5, %v8799_v3  ;;  %4848 = vmatmul.msk.bf16.gmra.mxu1 %vm655_vm1, %v4894_v29  ;;  %v3931_v55 = vld [vmem:[#allocation2 + $0x183] sm:$0xff] }
 0x335   : > { %v2803_v35 = vadd.f32 1.0, %v2802_v33  ;;  %v2792_v43 = vadd.f32 1.1283791, %v2791_v14  ;;  %4481 = vst.msk [vmem:[%s8857_s15 + $0x10] sm:$0xff] %vm477_vm0, %v4380_v20  ;;  %v3942_v60 = vld [vmem:[#allocation2 + $0x17d] sm:$0xff]  ;;  %v3943_v14 = vld [vmem:[#allocation2 + $0x185] sm:$0xff] }
 0x336   : > { %v3230_v19 = vpack.c.bf16 %v3198_v44, %v3198_v44  ;;  %v5078_v41 = vpop.eup %5077  ;;  %v3954_v46 = vld [vmem:[#allocation2 + $0x180] sm:$0xff] }
 0x337   : > { %v2725_v7 = vmul.f32 %v5078_v41, %v2723_v52  ;;  %5079 = vrcp.f32 %v2803_v35  ;;  %vm2730_vm12 = vweird.f32 %v5078_v41  ;;  %v2815_v51 = vand.u32 2147483648, %v2803_v35  ;;  %v3937_v31 = vld [vmem:[#allocation2 + $0x184] sm:$0xff] }
 0x338   : > { %3263 = vst.msk [vmem:[#allocation3 + $0x64] sm:$0xf] %vm3237_vm6, %v3230_v19  ;;  %vm2731_vm14 = vmor %vm2729_vm13, %vm2730_vm12  ;;  %v2813_v9 = vand.u32 2147483647, %v2803_v35  ;;  %vm2809_vm3 = vweird.f32 %v2803_v35  ;;  %v2793_v4 = vmul.f32 %v2792_v43, %v8811_v49  ;;  %v4381_v61 = vpop.f32.mrf.mxu1  ;;  %v4993_v19 = vld [vmem:[%s9099_s4 + $0x3] ss:$0 sm:$0xff]  ;;  %v3941_v43 = vmul.f32 %v4991_v10, %v3937_v31 }
 0x339   : > { %v2726_v26 = vsub.f32 1.0, %v2725_v7  ;;  %v2816_v25 = vor.u32 1.1754944e-38, %v2815_v51  ;;  %v4382_v5 = vadd.f32 %v8850_v32, %v4381_v61  ;;  %v3948_v7 = vld [vmem:[#allocation2 + $0x17f] sm:$0xff]  ;;  %v3958_v51 = vmul.f32 %v4994_v21, %v3954_v46  ;;  %v4998_v20 = vld [vmem:[%s9099_s4 + $0x7] ss:$0 sm:$0xff] }
 0x33a   : > { %vm2814_vm5 = vcmp.eq.f32.partialorder %v2813_v9, 8.507059e+37  ;;  %v3960_v15 = vld [vmem:[#allocation2 + $0x181] sm:$0xff]  ;;  %v3980_v29 = vmul.f32 %v4998_v20, %v3937_v31 }
 0x33b   : > { %v2727_v12 = vmul.f32 %v5078_v41, %v2726_v26  ;;  %4482 = vst.msk [vmem:[%s8857_s15 + $0x18] sm:$0xff] %vm477_vm0, %v4382_v5  ;;  %v3949_v26 = vld [vmem:[#allocation2 + $0x187] sm:$0xff]  ;;  %v3964_v9 = vmul.f32 %v4996_v13, %v3960_v15 }
 0x33d   : > { %v5080_v50 = vpop.eup %5079  ;;  %v2728_v54 = vadd.f32 %v5078_v41, %v2727_v12  ;;  %v3955_v12 = vld [vmem:[#allocation2 + $0x188] sm:$0xff] }
 0x33e   : > { %v2805_v58 = vmul.f32 %v5080_v50, %v2803_v35  ;;  %vm2810_vm2 = vweird.f32 %v5080_v50  ;;  %v4992_v35 = vld [vmem:[%s9099_s4 + $0x2] ss:$0 sm:$0xff] }
 0x33f   : > { %v2732_v2 = vsel %vm2731_vm14, %v5078_v41, %v2728_v54  ;;  %vm2811_vm4 = vmor %vm2809_vm3, %vm2810_vm2  ;;  %v3930_v41 = vld [vmem:[#allocation2 + $0x17b] sm:$0xff]  ;;  %v3952_v54 = vmul.f32 %v4993_v19, %v3948_v7  ;;  %v3947_v37 = vmul.f32 %v4992_v35, %v3943_v14 }
 0x340   : > { %v2737_v28 = vsel %vm2734_vm15, %v2736_v62, %v2732_v2  ;;  %v2806_v24 = vsub.f32 1.0, %v2805_v58  ;;  %v4384_v34 = vpop.f32.mrf.mxu1  ;;  %v3935_v62 = vmul.f32 %v4990_v17, %v3931_v55  ;;  %v3953_v58 = vmul.f32 %v4993_v19, %v3949_v26  ;;  %v4997_v2 = vld [vmem:[%s9099_s4 + $0x6] ss:$0 sm:$0xff] }
 0x341   : > { %v2738_v22 = vmul.f32 %v2737_v28, %v2713_v47  ;;  %v4385_v30 = vadd.f32 %v8850_v32, %v4384_v34  ;;  %v3961_v47 = vld [vmem:[#allocation2 + $0x189] sm:$0xff]  ;;  %v3940_v28 = vmul.f32 %v4991_v10, %v3936_v45  ;;  %v4898_v45 = vld [vmem:[#allocation3 + $0x68] sm:$0xff] }
 0x342   : > { %v2807_v42 = vmul.f32 %v5080_v50, %v2806_v24  ;;  %v3946_v24 = vmul.f32 %v4992_v35, %v3942_v60 }
 0x343   : > { %v4718_v57 = vclamps-f32 %v2738_v22, 1.0  ;;  %4483 = vst.msk [vmem:[%s8857_s15 + $0x20] sm:$0xff] %vm477_vm0, %v4385_v30  ;;  %v3972_v22 = vld [vmem:[#allocation2 + $0x18b] sm:$0xff] }
 0x344   : > { %v2808_v23 = vadd.f32 %v5080_v50, %v2807_v42  ;;  %v3959_v42 = vmul.f32 %v4994_v21, %v3955_v12 }
 0x345   : > { %v3162_v48 = vadd.f32 1.0, %v4718_v57  ;;  %v3965_v57 = vmul.f32 %v4996_v13, %v3961_v47 }
 0x346   : > { %v2812_v59 = vsel %vm2811_vm4, %v5080_v50, %v2808_v23  ;;  %v3934_v50 = vmul.f32 %v4990_v17, %v3930_v41 }
 0x347   : > { %v2817_v52 = vsel %vm2814_vm5, %v2816_v25, %v2812_v59  ;;  %v3194_v16 = vmul.f32 %v3162_v48, %v1818_v1  ;;  %v3967_v1 = vadd.f32 %v3953_v58, %v3935_v62  ;;  %v3975_v25 = vmul.f32 %v4997_v2, %v3931_v55  ;;  %v4999_v59 = vld [vmem:[%s9099_s4 + $0x8] ss:$0 sm:$0xff] }
 0x348   : > { %v2818_v36 = vmul.f32 %v2817_v52, %v2793_v4  ;;  %v4386_v44 = vpop.f32.mrf.mxu1  ;;  %v3966_v23 = vadd.f32 %v3952_v54, %v3934_v50  ;;  %v3976_v48 = vmul.f32 %v4997_v2, %v3972_v22  ;;  %v3977_v4 = vld [vmem:[#allocation2 + $0x18c] sm:$0xff]  ;;  %v3971_v5 = vadd.f32 %v3965_v57, %v3947_v37 }
 0x349   : > { %v3226_v56 = vpack.c.bf16 %v3194_v16, %v3194_v16  ;;  %v4387_v3 = vadd.f32 %v8850_v32, %v4386_v44  ;;  %v3982_v52 = vld [vmem:[#allocation2 + $0x18d] sm:$0xff]  ;;  %v4897_v16 = vld [vmem:[#allocation3 + $0x60] sm:$0xff] }
 0x34a   : > { %v4720_v0 = vclamps-f32 %v2818_v36, 1.0  ;;  %v3968_v36 = vadd.f32 %v3958_v51, %v3940_v28  ;;  %v3987_v34 = vadd.f32 %v3975_v25, %v3966_v23  ;;  %v3988_v30 = vadd.f32 %v3976_v48, %v3967_v1 }
 0x34b   : > { %3259 = vst.msk [vmem:[#allocation3 + $0x54] sm:$0xf] %vm3237_vm6, %v3226_v56  ;;  %v3969_v56 = vadd.f32 %v3959_v42, %v3941_v43 }
 0x34c   : > { %v3164_v27 = vadd.f32 1.0, %v4720_v0  ;;  %4484 = vst.msk [vmem:[%s8857_s15 + $0x28] sm:$0xff] %vm477_vm0, %v4387_v3  ;;  %v3970_v0 = vadd.f32 %v3964_v9, %v3946_v24  ;;  %v4005_v17 = vmul.f32 %v8590_v39, %v3987_v34  ;;  %v4006_v10 = vmul.f32 %v8622_v53, %v3988_v30  ;;  %v5000_v39 = vld [vmem:[%s9100_s5] ss:$0 sm:$0xff]  ;;  %v4899_v24 = vld [vmem:[#allocation3 + $0x70] sm:$0xff] }
 0x34e   : > { %v3196_v49 = vmul.f32 %v3164_v27, %v1820_v6  ;;  %v3981_v6 = vmul.f32 %v4998_v20, %v3977_v4 }
 0x350   : > { %v3228_v18 = vpack.c.bf16 %v3196_v49, %v3196_v49  ;;  %v4389_v38 = vpop.f32.mrf.mxu1  ;;  %v3985_v49 = vmul.f32 %v4999_v59, %v3943_v14  ;;  %v3990_v44 = vadd.f32 %v3981_v6, %v3969_v56 }
 0x351   : > { %v4390_v8 = vadd.f32 %v8850_v32, %v4389_v38 }
 0x352   : > { %3261 = vst.msk [vmem:[#allocation3 + $0x5c] sm:$0xf] %vm3237_vm6, %v3228_v18  ;;  %v4895_v40 = vld [vmem:[#allocation3 + $0x50] sm:$0xff]  ;;  %v3986_v18 = vmul.f32 %v4999_v59, %v3982_v52  ;;  %v3991_v3 = vadd.f32 %v3985_v49, %v3970_v0  ;;  %v4008_v21 = vadd.f32 %v4006_v10, %v3990_v44  ;;  %v4900_v49 = vld [vmem:[#allocation3 + $0x78] sm:$0xff] }
 0x353   : > { %4849 = vmatmul.msk.bf16.gmra.mxu1 %vm655_vm1, %v4895_v40  ;;  %4485 = vst.msk [vmem:[%s8857_s15 + $0x30] sm:$0xff] %vm477_vm0, %v4390_v8 }
 0x354   : > { %v3992_v40 = vadd.f32 %v3986_v18, %v3971_v5  ;;  %v4017_v13 = vmul.f32 %v8641_v63, %v3991_v3 }
 0x356   : > { %v4018_v7 = vmul.f32 %v8619_v11, %v3992_v40 }
 0x358   : > { %v4391_v61 = vpop.f32.mrf.mxu1  ;;  %v4020_v26 = vadd.f32 %v4018_v7, %v4008_v21 }
 0x359   : > { %v4896_v33 = vld [vmem:[#allocation3 + $0x58] sm:$0xff]  ;;  %v4392_v27 = vadd.f32 %v8850_v32, %v4391_v61 }
 0x35a   : > { %4850 = vmatmul.msk.bf16.vlgmr.msra.gmra.mxu2 %vm655_vm1, %v4896_v33  ;;  %v3989_v33 = vadd.f32 %v3980_v29, %v3968_v36  ;;  %v8939_v63 = vadd.f32 %v5000_v39, %v4020_v26 }
 0x35b   : > { %4486 = vst.msk [vmem:[%s8857_s15 + $0x38] sm:$0xff] %vm477_vm0, %v4392_v27 }
 0x35c   : > { %v4007_v41 = vadd.f32 %v4005_v17, %v3989_v33  ;;  %v8947_v38 = vmul.f32 0.70710677, %v8939_v63 }
 0x35e   : > { %v4019_v55 = vadd.f32 %v4017_v13, %v4007_v41  ;;  %v4071_v12 = vmul.f32 %v8947_v38, %v8947_v38 }
 0x360   : > { %v4394_v35 = vpop.f32.mrf.mxu1  ;;  %v8937_v46 = vadd.f32 %v5000_v39, %v4019_v55  ;;  %v8955_v50 = vmin.f32 %v4071_v12, 16.0 }
 0x361   : > { %v4395_v19 = vadd.f32 %v8850_v32, %v4394_v35 }
 0x362   : > { %v8944_v11 = vmul.f32 0.70710677, %v8937_v46  ;;  %v4084_v14 = vmul.f32 3.8918573e-05, %v8955_v50 }
 0x363   : > { %4487 = vst.msk [vmem:[%s8857_s15 + $0x40] sm:$0xff] %vm477_vm0, %v4395_v19 }
 0x364   : > { %v4031_v31 = vmul.f32 %v8944_v11, %v8944_v11  ;;  %v4085_v47 = vadd.f32 0.001143296, %v4084_v14 }
 0x366   : > { %v8953_v8 = vmin.f32 %v4031_v31, 16.0  ;;  %v4086_v28 = vmul.f32 %v4085_v47, %v8955_v50 }
 0x368   : > { %v4396_v60 = vpop.f32.mrf.mxu1  ;;  %v4044_v62 = vmul.f32 3.8918573e-05, %v8953_v8  ;;  %v4087_v43 = vadd.f32 0.014752088, %v4086_v28  ;;  %v4033_v52 = vmul.f32 2.1237322e-06, %v8953_v8 }
 0x369   : > { %v4397_v53 = vadd.f32 %v8850_v32, %v4396_v60 }
 0x36a   : > { %4851 = vmatmul.msk.bf16.gmra.mxu2 %vm655_vm1, %v4897_v16  ;;  %v4045_v58 = vadd.f32 0.001143296, %v4044_v62  ;;  %v4088_v37 = vmul.f32 %v4087_v43, %v8955_v50  ;;  %v4073_v16 = vmul.f32 2.1237322e-06, %v8955_v50  ;;  %v4034_v0 = vadd.f32 0.00028619796, %v4033_v52 }
 0x36b   : > { %4488 = vst.msk [vmem:[%s8857_s15 + $0x48] sm:$0xff] %vm477_vm0, %v4397_v53 }
 0x36c   : > { %v4046_v2 = vmul.f32 %v4045_v58, %v8953_v8  ;;  %v4089_v20 = vadd.f32 0.112945676, %v4088_v37  ;;  %v4074_v61 = vadd.f32 0.00028619796, %v4073_v16  ;;  %v4035_v6 = vmul.f32 %v4034_v0, %v8953_v8 }
 0x36e   : > { %v4047_v51 = vadd.f32 0.014752088, %v4046_v2  ;;  %v4090_v1 = vmul.f32 %v4089_v20, %v8955_v50  ;;  %v4075_v27 = vmul.f32 %v4074_v61, %v8955_v50  ;;  %v4036_v18 = vadd.f32 0.0036580483, %v4035_v6 }
 0x370   : > { %v4399_v15 = vpop.f32.mrf.mxu1  ;;  %v4048_v9 = vmul.f32 %v4047_v51, %v8953_v8  ;;  %v4091_v4 = vadd.f32 0.4994258, %v4090_v1  ;;  %v4076_v34 = vadd.f32 0.0036580483, %v4075_v27  ;;  %v4037_v44 = vmul.f32 %v4036_v18, %v8953_v8  ;;  %v4903_v27 = vld [vmem:[#allocation3 + $0x90] sm:$0xff] }
 0x371   : > { %v4400_v54 = vadd.f32 %v8850_v32, %v4399_v15 }
 0x372   : > { %v4049_v57 = vadd.f32 0.112945676, %v4048_v9  ;;  %v4092_v56 = vmul.f32 %v4091_v4, %v8955_v50  ;;  %v4077_v3 = vmul.f32 %v4076_v34, %v8955_v50  ;;  %v4038_v40 = vadd.f32 0.05243302, %v4037_v44  ;;  %v4901_v9 = vld [vmem:[#allocation3 + $0x80] sm:$0xff] }
 0x373   : > { %4489 = vst.msk [vmem:[%s8857_s15 + $0x50] sm:$0xff] %vm477_vm0, %v4400_v54  ;;  %v4028_v4 = vmul.f32 0.5, %v8939_v63 }
 0x374   : > { %v4050_v23 = vmul.f32 %v4049_v57, %v8953_v8  ;;  %v4093_v29 = vadd.f32 1.0, %v4092_v56  ;;  %v4078_v17 = vadd.f32 0.05243302, %v4077_v3  ;;  %v4039_v19 = vmul.f32 %v4038_v40, %v8953_v8 }
 0x376   : > { %v4051_v48 = vadd.f32 0.4994258, %v4050_v23  ;;  %v4079_v21 = vmul.f32 %v4078_v17, %v8955_v50  ;;  %v4040_v7 = vadd.f32 0.18741608, %v4039_v19  ;;  %v4105_v62 = vand.u32 2147483648, %v4093_v29 }
 0x377   : > { %vm4099_vm10 = vweird.f32 %v4093_v29  ;;  %v4103_v43 = vand.u32 2147483647, %v4093_v29 }
 0x378   : > { %v4401_v22 = vpop.f32.mrf.mxu1  ;;  %v4052_v36 = vmul.f32 %v4051_v48, %v8953_v8  ;;  %v4080_v26 = vadd.f32 0.18741608, %v4079_v21  ;;  %v4041_v53 = vmul.f32 %v4040_v7, %v8953_v8 }
 0x379   : > { %v4402_v42 = vadd.f32 %v8850_v32, %v4401_v22  ;;  %vm4104_vm14 = vcmp.eq.f32.partialorder %v4103_v43, 8.507059e+37 }
 0x37a   : > { %4852 = vmatmul.msk.bf16.gmra.mxu2 %vm655_vm1, %v4898_v45  ;;  %v4053_v5 = vadd.f32 1.0, %v4052_v36  ;;  %v4081_v12 = vmul.f32 %v4080_v26, %v8955_v50  ;;  %v4042_v14 = vadd.f32 1.1283791, %v4041_v53 }
 0x37b   : > { %4490 = vst.msk [vmem:[%s8857_s15 + $0x58] sm:$0xff] %vm477_vm0, %v4402_v42  ;;  %v4106_v42 = vor.u32 1.1754944e-38, %v4105_v62 }
 0x37c   : > { %5081 = vrcp.f32 %v4053_v5  ;;  %v4065_v15 = vand.u32 2147483648, %v4053_v5  ;;  %vm4059_vm7 = vweird.f32 %v4053_v5  ;;  %v4063_v2 = vand.u32 2147483647, %v4053_v5 }
 0x37d   : > { %5083 = vrcp.f32 %v4093_v29  ;;  %v4043_v22 = vmul.f32 %v4042_v14, %v8944_v11 }
 0x37e   : > { %v4066_v28 = vor.u32 1.1754944e-38, %v4065_v15  ;;  %vm4064_vm12 = vcmp.eq.f32.partialorder %v4063_v2, 8.507059e+37 }
 0x380   : > { %v4404_v25 = vpop.f32.mrf.mxu1 }
 0x381   : > { %v4405_v59 = vadd.f32 %v8850_v32, %v4404_v25 }
 0x382   : > { %v5082_v10 = vpop.eup %5081 }
 0x383   : > { %4491 = vst.msk [vmem:[%s8857_s15 + $0x60] sm:$0xff] %vm477_vm0, %v4405_v59  ;;  %v5084_v35 = vpop.eup %5083  ;;  %v4055_v41 = vmul.f32 %v5082_v10, %v4053_v5  ;;  %vm4060_vm8 = vweird.f32 %v5082_v10 }
 0x384   : > { %v4095_v13 = vmul.f32 %v5084_v35, %v4093_v29  ;;  %vm8994_vm9 = vmor %vm4059_vm7, %vm4060_vm8  ;;  %vm4100_vm11 = vweird.f32 %v5084_v35 }
 0x385   : > { %v4056_v55 = vsub.f32 1.0, %v4055_v41  ;;  %vm4101_vm13 = vmor %vm4099_vm10, %vm4100_vm11 }
 0x386   : > { %v4096_v60 = vsub.f32 1.0, %v4095_v13 }
 0x387   : > { %v4057_v31 = vmul.f32 %v5082_v10, %v4056_v55 }
 0x388   : > { %v4406_v30 = vpop.f32.mrf.mxu1  ;;  %v4097_v54 = vmul.f32 %v5084_v35, %v4096_v60 }
 0x389   : > { %v4407_v33 = vadd.f32 %v8850_v32, %v4406_v30  ;;  %v4058_v58 = vadd.f32 %v5082_v10, %v4057_v31 }
 0x38a   : > { %4853 = vmatmul.msk.bf16.gmra.mxu2 %vm655_vm1, %v4899_v24  ;;  %v4082_v24 = vadd.f32 1.1283791, %v4081_v12  ;;  %v4098_v8 = vadd.f32 %v5084_v35, %v4097_v54 }
 0x38b   : > { %4492 = vst.msk [vmem:[%s8857_s15 + $0x68] sm:$0xff] %vm477_vm0, %v4407_v33  ;;  %v4062_v50 = vsel %vm8994_vm9, %v5082_v10, %v4058_v58  ;;  %v4904_v33 = vld [vmem:[#allocation3 + $0x98] sm:$0xff] }
 0x38c   : > { %v4083_v51 = vmul.f32 %v4082_v24, %v8947_v38  ;;  %v4067_v37 = vsel %vm4064_vm12, %v4066_v28, %v4062_v50  ;;  %v4102_v57 = vsel %vm4101_vm13, %v5084_v35, %v4098_v8  ;;  %v4027_v38 = vmul.f32 0.5, %v8937_v46  ;;  %v4902_v46 = vld [vmem:[#allocation3 + $0x88] sm:$0xff] }
 0x38d   : > { %v4068_v23 = vmul.f32 %v4067_v37, %v4043_v22  ;;  %v4107_v1 = vsel %vm4104_vm14, %v4106_v42, %v4102_v57 }
 0x38e   : > { %v4108_v48 = vmul.f32 %v4107_v1, %v4083_v51 }
 0x38f   : > { %v4737_v25 = vclamps-f32 %v4068_v23, 1.0 }
 0x390   : > { %v4409_v45 = vpop.f32.mrf.mxu1  ;;  %v4738_v59 = vclamps-f32 %v4108_v48, 1.0 }
 0x391   : > { %v4410_v39 = vadd.f32 %v8850_v32, %v4409_v45  ;;  %v4111_v52 = vadd.f32 1.0, %v4737_v25 }
 0x392   : > { %v4112_v16 = vadd.f32 1.0, %v4738_v59 }
 0x393   : > { %4493 = vst.msk [vmem:[%s8857_s15 + $0x70] sm:$0xff] %vm477_vm0, %v4410_v39  ;;  %v4113_v36 = vmul.f32 %v4111_v52, %v4027_v38 }
 0x394   : > { %v4114_v0 = vmul.f32 %v4112_v16, %v4028_v4 }
 0x395   : > { %v4115_v61 = vpack.c.bf16 %v4113_v36, %v4113_v36 }
 0x396   : > { %v4116_v29 = vpack.c.bf16 %v4114_v0, %v4114_v0 }
 0x397   : > { %4117 = vst.msk [vmem:[#allocation3 + $0xa0] sm:$0xf] %vm3237_vm6, %v4115_v61 }
 0x398   : > { %v4411_v20 = vpop.f32.mrf.mxu1  ;;  %4118 = vst.msk [vmem:[#allocation3 + $0xa4] sm:$0xf] %vm3237_vm6, %v4116_v29 }
 0x399   : > { %v4412_v11 = vadd.f32 %v8850_v32, %v4411_v20 }
 0x39a   : > { %4854 = vmatmul.msk.bf16.gmra.mxu2 %vm655_vm1, %v4900_v49 }
 0x39b   : > { %4494 = vst.msk [vmem:[%s8857_s15 + $0x78] sm:$0xff] %vm477_vm0, %v4412_v11 }
 0x39f   : > { %v4905_v19 = vld [vmem:[#allocation3 + $0xa0] sm:$0xff] }
 0x3a0   : > { %v4414_v56 = vpop.f32.mrf.mxu1 }
 0x3a1   : > { %v4415_v5 = vadd.f32 %v8850_v32, %v4414_v56 }
 0x3a3   : > { %4495 = vst.msk [vmem:[%s8857_s15 + $0x80] sm:$0xff] %vm477_vm0, %v4415_v5 }
 0x3a8   : > { %v4416_v63 = vpop.f32.mrf.mxu1 }
 0x3a9   : > { %v4417_v6 = vadd.f32 %v8850_v32, %v4416_v63 }
 0x3aa   : > { %4855 = vmatmul.msk.bf16.gmra.mxu2 %vm655_vm1, %v4901_v9 }
 0x3ab   : > { %4496 = vst.msk [vmem:[%s8857_s15 + $0x88] sm:$0xff] %vm477_vm0, %v4417_v6 }
 0x3b1   : > { %v4419_v49 = vpop.f32.mrf.mxu1 }
 0x3b2   : > { %v4420_v18 = vadd.f32 %v8850_v32, %v4419_v49 }
 0x3b4   : > { %4497 = vst.msk [vmem:[%s8857_s15 + $0x90] sm:$0xff] %vm477_vm0, %v4420_v18 }
 0x3b9   : > { %v4421_v34 = vpop.f32.mrf.mxu1 }
 0x3ba   : > { %4856 = vmatmul.msk.bf16.gmra.mxu2 %vm655_vm1, %v4902_v46  ;;  %v4422_v30 = vadd.f32 %v8850_v32, %v4421_v34 }
 0x3bc   : > { %4498 = vst.msk [vmem:[%s8857_s15 + $0x98] sm:$0xff] %vm477_vm0, %v4422_v30 }
 0x3ca   : > { %4857 = vmatmul.msk.bf16.gmra.mxu2 %vm655_vm1, %v4903_v27 }
 0x3d0   : > { %v4424_v40 = vpop.f32.mrf.mxu1 }
 0x3d1   : > { %v4425_v17 = vadd.f32 %v8850_v32, %v4424_v40 }
 0x3d3   : > { %4499 = vst.msk [vmem:[%s8857_s15 + $0xa0] sm:$0xff] %vm477_vm0, %v4425_v17 }
 0x3d8   : > { %v4426_v41 = vpop.f32.mrf.mxu1 }
 0x3d9   : > { %v4427_v21 = vadd.f32 %v8850_v32, %v4426_v41 }
 0x3da   : > { %4858 = vmatmul.msk.bf16.gmra.mxu2 %vm655_vm1, %v4904_v33 }
 0x3db   : > { %4500 = vst.msk [vmem:[%s8857_s15 + $0xa8] sm:$0xff] %vm477_vm0, %v4427_v21 }
 0x3dd   : > { %v4429_v44 = vpop.f32.mrf.mxu2 }
 0x3de   : > { %v4430_v3 = vadd.f32 %v8850_v32, %v4429_v44 }
 0x3e0   : > { %4501 = vst.msk [vmem:[%s8857_s15 + $0xb0] sm:$0xff] %vm477_vm0, %v4430_v3 }
 0x3e5   : > { %v4431_v10 = vpop.f32.mrf.mxu2 }
 0x3e6   : > { %v4432_v35 = vadd.f32 %v8850_v32, %v4431_v10 }
 0x3e8   : > { %4502 = vst.msk [vmem:[%s8857_s15 + $0xb8] sm:$0xff] %vm477_vm0, %v4432_v35 }
 0x3ea   : > { %4859 = vmatmul.msk.bf16.gmra.mxu2 %vm655_vm1, %v4905_v19 }
 0x3ed   : > { %v4434_v13 = vpop.f32.mrf.mxu2 }
 0x3ee   : > { %v4435_v7 = vadd.f32 %v8850_v32, %v4434_v13 }
 0x3f0   : > { %4503 = vst.msk [vmem:[%s8857_s15 + $0xc0] sm:$0xff] %vm477_vm0, %v4435_v7 }
 0x3f5   : > { %v4436_v55 = vpop.f32.mrf.mxu2 }
 0x3f6   : > { %v4437_v26 = vadd.f32 %v8850_v32, %v4436_v55 }
 0x3f8   : > { %4504 = vst.msk [vmem:[%s8857_s15 + $0xc8] sm:$0xff] %vm477_vm0, %v4437_v26 }
 0x3fd   : > { %v4439_v45 = vpop.f32.mrf.mxu2 }
 0x3fe   : > { %v4440_v60 = vadd.f32 %v8850_v32, %v4439_v45 }
 0x400   : > { %4505 = vst.msk [vmem:[%s8857_s15 + $0xd0] sm:$0xff] %vm477_vm0, %v4440_v60 }
 0x405   : > { %v4441_v39 = vpop.f32.mrf.mxu2 }
 0x406   : > { %v4442_v53 = vadd.f32 %v8850_v32, %v4441_v39 }
 0x408   : > { %4506 = vst.msk [vmem:[%s8857_s15 + $0xd8] sm:$0xff] %vm477_vm0, %v4442_v53 }
 0x40d   : > { %v4444_v31 = vpop.f32.mrf.mxu2 }
 0x40e   : > { %v4445_v12 = vadd.f32 %v8850_v32, %v4444_v31 }
 0x410   : > { %4507 = vst.msk [vmem:[%s8857_s15 + $0xe0] sm:$0xff] %vm477_vm0, %v4445_v12 }
 0x415   : > { %v4446_v15 = vpop.f32.mrf.mxu2 }
 0x416   : > { %v4447_v54 = vadd.f32 %v8850_v32, %v4446_v15 }
 0x418   : > { %4508 = vst.msk [vmem:[%s8857_s15 + $0xe8] sm:$0xff] %vm477_vm0, %v4447_v54 }
 0x41d   : > { %v4449_v62 = vpop.f32.mrf.mxu2 }
 0x41e   : > { %v4450_v14 = vadd.f32 %v8850_v32, %v4449_v62 }
 0x420   : > { %4509 = vst.msk [vmem:[%s8857_s15 + $0xf0] sm:$0xff] %vm477_vm0, %v4450_v14 }
 0x425   : > { %v4451_v58 = vpop.f32.mrf.mxu2 }
 0x426   : > { %v4452_v47 = vadd.f32 %v8850_v32, %v4451_v58 }
 0x428   : > { %4510 = vst.msk [vmem:[%s8857_s15 + $0xf8] sm:$0xff] %vm477_vm0, %v4452_v47 }
 0x42d   : > { %v4454_v2 = vpop.f32.mrf.mxu2 }
 0x42e   : > { %v4455_v28 = vadd.f32 %v8850_v32, %v4454_v2 }
 0x430   : > { %4511 = vst.msk [vmem:[%s8857_s15 + $0x100] sm:$0xff] %vm477_vm0, %v4455_v28 }
 0x435   : > { %v4456_v24 = vpop.f32.mrf.mxu2 }
 0x436   : > { %v4457_v8 = vadd.f32 %v8850_v32, %v4456_v24 }
 0x438   : > { %4512 = vst.msk [vmem:[%s8857_s15 + $0x108] sm:$0xff] %vm477_vm0, %v4457_v8 }
 0x43d   : > { %v4459_v22 = vpop.f32.mrf.mxu2 }
 0x43e   : > { %v4460_v50 = vadd.f32 %v8850_v32, %v4459_v22 }
 0x440   : > { %4513 = vst.msk [vmem:[%s8857_s15 + $0x110] sm:$0xff] %vm477_vm0, %v4460_v50 }
 0x445   : > { %v4461_v51 = vpop.f32.mrf.mxu2 }
 0x446   : > { %v4462_v43 = vadd.f32 %v8850_v32, %v4461_v51 }
 0x448   : > { %4514 = vst.msk [vmem:[%s8857_s15 + $0x118] sm:$0xff] %vm477_vm0, %v4462_v43 }
 0x44d   : > { %v4464_v42 = vpop.f32.mrf.mxu2 }
 0x44e   : > { %v4465_v9 = vadd.f32 %v8850_v32, %v4464_v42 }
 0x450   : > { %4515 = vst.msk [vmem:[%s8857_s15 + $0x120] sm:$0xff] %vm477_vm0, %v4465_v9 }
 0x455   : > { %v4466_v37 = vpop.f32.mrf.mxu2 }
 0x456   : > { %v4467_v57 = vadd.f32 %v8850_v32, %v4466_v37 }
 0x458   : > { %4516 = vst.msk [vmem:[%s8857_s15 + $0x128] sm:$0xff] %vm477_vm0, %v4467_v57 }
 0x45d   : > { %v4469_v20 = vpop.f32.mrf.mxu2 }
 0x45e   : > { %v4470_v23 = vadd.f32 %v8850_v32, %v4469_v20 }
 0x460   : > { %4517 = vst.msk [vmem:[%s8857_s15 + $0x130] sm:$0xff] %vm477_vm0, %v4470_v23 }
 0x465   : > { %v4471_v11 = vpop.f32.mrf.mxu2 }
 0x466   : > { %v4472_v1 = vadd.f32 %v8850_v32, %v4471_v11 }
 0x468   : > { %4518 = vst.msk [vmem:[%s8857_s15 + $0x138] sm:$0xff] %vm477_vm0, %v4472_v1 }
 0x46d   : > { %v4474_v25 = vpop.f32.mrf.mxu2 }
 0x46e   : > { %v4475_v48 = vadd.f32 %v8850_v32, %v4474_v25 }
 0x470   : > { %4519 = vst.msk [vmem:[%s8857_s15 + $0x140] sm:$0xff] %vm477_vm0, %v4475_v48 }
 0x475   : > { %v4476_v38 = vpop.f32.mrf.mxu2 }
 0x476   : > { %v4477_v4 = vadd.f32 %v8850_v32, %v4476_v38 }
 0x478   : > { %4520 = vst.msk [vmem:[%s8857_s15 + $0x148] sm:$0xff] %vm477_vm0, %v4477_v4 }
 0x479 PF: > { %s18_s27 = sadd.s32 1, %s5183_s27  }
 0x47a   : > { %p15_p4 = scmp.ge.s32.totalorder %s18_s27, 4  }
 0x47c   :  { %17 = sbr.rel (!%p15_p4) target bundleno = 1 (0x1), region = 82 }

</bundles_post_ra>
